<compile_context>
chip_gen: v7x
topology: tpu7x:2x2x1
jax: 0.10.0
libtpu: 0.0.40
codegen_flags: <defaults>
</compile_context>

<pallas_src>
import math

import jax
import jax.numpy as jnp
import numpy as np
from jax.experimental import pallas as pl
from jax.experimental.pallas import tpu as pltpu

_HALF_LOG_2PI = 0.9189385332046727          # 0.5 * log(2*pi)
_LGAMMA_0P1 = math.lgamma(0.1)              # lgamma of the Gamma-prior concentration (0.1)
_LOG_0P3 = math.log(0.3)                    # log of the Gamma-prior rate (0.3)


# ----------------------- special functions (VPU/EUP only) -----------------------
def _recip(x):
    """1/x: one EUP vrcp push + one VPU Newton step (VPU has slack; EUP binds)."""
    r = pl.reciprocal(x, approx=True)
    return r * (2.0 - x * r)


def _lgamma_digamma(x):
    """(lgamma(x), digamma(x)) for x > 0.

    Shift x -> x+8, apply Stirling / asymptotic series, sharing z, 1/z and
    log(z) between the two functions.  The lgamma shift correction is the log
    of two partial products (2 logs instead of 8; safe up to x ~ 1e9); the
    digamma shift is a sum of fast reciprocals.
    """
    rec = _recip(x)                  # sum_{k=0..7} 1/(x+k)   (digamma shift)
    p1 = x                           # x (x+1)(x+2)(x+3)
    p2 = None                        # (x+4)(x+5)(x+6)(x+7)
    for k in range(1, 8):
        xk = x + float(k)
        rec = rec + _recip(xk)
        if k < 4:
            p1 = p1 * xk
        elif k == 4:
            p2 = xk
        else:
            p2 = p2 * xk
    z = x + 8.0
    zi = _recip(z)
    zi2 = zi * zi
    log_z = jnp.log(z)
    lg = ((z - 0.5) * log_z - z + _HALF_LOG_2PI
          + zi * (1.0 / 12.0 - zi2 * (1.0 / 360.0
                                      - zi2 * (1.0 / 1260.0 - zi2 * (1.0 / 1680.0))))
          - jnp.log(p1) - jnp.log(p2))
    dg = (log_z - 0.5 * zi
          - zi2 * (1.0 / 12.0 - zi2 * (1.0 / 120.0 - zi2 * (1.0 / 252.0)))
          - rec)
    return lg, dg


# ---------------------------------- kernels ----------------------------------
def _gamma_kernel(logalpha_ref, logbeta_ref, logw_ref, ll_ref, kl_ref, ll_acc, kl_acc):
    i = pl.program_id(1)

    @pl.when(i == 0)
    def _init():
        ll_acc[...] = jnp.zeros_like(ll_acc)
        kl_acc[...] = jnp.zeros_like(kl_acc)

    la = logalpha_ref[...]
    lb = logbeta_ref[...]
    lw = logw_ref[...]
    a = jnp.exp(la)
    lg_a, dg_a = _lgamma_digamma(a)

    # log_prob_gamma(a, b, w):  a*log(b) + (a-1)*log(w) - b*w - lgamma(a)
    #   with log(b) = lb, log(w) = lw, b*w = exp(lb + lw)  (no log(exp) round trips)
    ll = a * lb + (a - 1.0) * lw - jnp.exp(lb + lw) - lg_a
    # KL(Gamma(a, b) || Gamma(0.1, 0.3)):
    #   0.1*log(b/0.3) + lgamma(0.1) - lgamma(a) + (a-0.1)*digamma(a) + (0.3-b)*(a/b)
    #   with (0.3-b)*(a/b) = 0.3*exp(la-lb) - a
    kl = (0.1 * (lb - _LOG_0P3) + (_LGAMMA_0P1 - lg_a)
          + (a - 0.1) * dg_a + 0.3 * jnp.exp(la - lb) - a)

    ll_acc[...] += ll
    kl_acc[...] += kl

    @pl.when(i == pl.num_programs(1) - 1)
    def _finalize():
        ll_ref[...] = jnp.sum(ll_acc[...]) + jnp.zeros_like(ll_ref)
        kl_ref[...] = jnp.sum(kl_acc[...]) + jnp.zeros_like(kl_ref)


def _beta_kernel(logtheta_ref, logeta_ref, logitz_ref, ll_ref, kl_ref, ll_acc, kl_acc):
    i = pl.program_id(1)

    @pl.when(i == 0)
    def _init():
        ll_acc[...] = jnp.zeros_like(ll_acc)
        kl_acc[...] = jnp.zeros_like(kl_acc)

    c1 = jnp.exp(logtheta_ref[...])     # theta == concentration1
    c0 = jnp.exp(logeta_ref[...])       # eta   == concentration0
    s = c1 + c0
    lg1, dg1 = _lgamma_digamma(c1)
    lg0, dg0 = _lgamma_digamma(c0)
    lgs, dgs = _lgamma_digamma(s)
    log_norm = lgs - lg1 - lg0          # shared between ll and kl

    # log z and log(1-z) straight from the logit (shared softplus; finite even
    # for saturated logits):  log sigmoid(x) = min(x,0) - log(1 + e^{-|x|}).
    x = logitz_ref[...]
    t = jnp.log(1.0 + jnp.exp(-jnp.abs(x)))
    log_z = jnp.minimum(x, 0.0) - t
    log_1mz = jnp.minimum(-x, 0.0) - t

    # log_prob_beta(c1, c0, z)
    ll = (c1 - 1.0) * log_z + (c0 - 1.0) * log_1mz + log_norm
    # KL(Beta(c1, c0) || Beta(1, 1))
    kl = log_norm + (c1 - 1.0) * dg1 + (c0 - 1.0) * dg0 + (2.0 - s) * dgs

    ll_acc[...] += ll
    kl_acc[...] += kl

    @pl.when(i == pl.num_programs(1) - 1)
    def _finalize():
        ll_ref[...] = jnp.sum(ll_acc[...]) + jnp.zeros_like(ll_ref)
        kl_ref[...] = jnp.sum(kl_acc[...]) + jnp.zeros_like(kl_ref)


# ------------------------------ tiling / launcher ------------------------------
def _pick_tiling(m, d, *, max_tile_rows=1024, vmem_budget_bytes=12 << 20):
    """Pick (tile_rows, cores, steps_per_core) with cores * steps * tile_rows == m.

    tile_rows must divide m and be 8-aligned (or the full row count, which is
    always legal); it is the largest such value keeping ~8 tile-sized f32
    buffers (3 inputs double-buffered + 2 accumulators) under a conservative
    VMEM budget.  If the tile count can be even, rows are split over a leading
    size-2 'parallel' axis so v7x's two TensorCores each take half.
    """
    cap = max(1, min(m, max_tile_rows, vmem_budget_bytes // (8 * d * 4)))
    best_any, best_even = None, None
    for t in range(cap, 0, -1):
        if m % t or (t % 8 and t != m):
            continue
        if best_any is None:
            best_any = t
        if (m // t) % 2 == 0:
            best_even = t
            break
    if best_any is None:          # no aligned divisor under the budget: one full block
        best_any = m
    tile = best_even if (best_even is not None and 4 * best_even >= best_any) else best_any
    n_tiles = m // tile
    cores = 2 if n_tiles % 2 == 0 else 1
    return tile, cores, n_tiles // cores


def _reduce_pair(kernel, x0, x1, x2):
    """Row-tiled grid over three equal-shape (m, d) inputs; returns (sum_ll, sum_kl)."""
    m, d = x0.shape
    tile, cores, steps = _pick_tiling(m, d)
    in_spec = pl.BlockSpec((tile, d), lambda c, i: (c * steps + i, 0))
    # One (8,128) f32 output block per core; each block holds that core's partial
    # sum broadcast across the block (lane-dense, (8,128)-aligned writeback).
    out_spec = pl.BlockSpec((8, 128), lambda c, i: (c, 0))
    out_struct = jax.ShapeDtypeStruct((8 * cores, 128), jnp.float32)
    ll, kl = pl.pallas_call(
        kernel,
        out_shape=(out_struct, out_struct),
        grid_spec=pltpu.PrefetchScalarGridSpec(
            num_scalar_prefetch=0,
            grid=(cores, steps),
            in_specs=[in_spec, in_spec, in_spec],
            out_specs=(out_spec, out_spec),
            scratch_shapes=[pltpu.VMEM((tile, d), jnp.float32),
                            pltpu.VMEM((tile, d), jnp.float32)],
        ),
        compiler_params=pltpu.CompilerParams(
            dimension_semantics=("parallel", "arbitrary")),
    )(x0, x1, x2)
    # Add the per-core partial sums (one scalar per (8,128) block).
    return jnp.sum(ll[::8, 0]), jnp.sum(kl[::8, 0])


# -------------------------------- module glue --------------------------------
def init_params(m_g, d_g, m_b, d_b):
    # Deterministic init, matching BetaGammaSampler.__init__ constants.
    return {
        "logalpha": jnp.full((m_g, d_g), math.log(1.0), jnp.float32),
        "logbeta":  jnp.full((m_g, d_g), math.log(15.0), jnp.float32),
        "logtheta": jnp.full((m_b, d_b), 2.0, jnp.float32),
        "logeta":   jnp.full((m_b, d_b), 2.0, jnp.float32),
    }


@jax.jit
def beta_gamma_sampler_forward(params, logit_z_updated, log_w_updated):
    ll_g, kl_g = _reduce_pair(_gamma_kernel, params["logalpha"], params["logbeta"],
                              log_w_updated)
    ll_b, kl_b = _reduce_pair(_beta_kernel, params["logtheta"], params["logeta"],
                              logit_z_updated)
    kl = kl_g + kl_b
    obj = ll_g + ll_b - kl
    return obj, kl      # (ll_gamma.sum() + ll_beta.sum() - kl, kl.detach())


# TODO(synk): BetaGammaSampler.sample() draws Beta/Gamma variates via rejection
# sampling; it is not part of forward() and is not ported here.


def _reference(params, logit_z, log_w):
    """Pure-JAX reference (jax.scipy lgamma/digamma) for validation."""
    from jax.scipy.special import digamma, gammaln
    a = jnp.exp(params["logalpha"])
    b = jnp.exp(params["logbeta"])
    w = jnp.exp(log_w)
    ll_g = jnp.sum(a * jnp.log(b) + (a - 1) * jnp.log(w) - b * w - gammaln(a))
    c1 = jnp.exp(params["logtheta"])
    c0 = jnp.exp(params["logeta"])
    z = jax.nn.sigmoid(logit_z)
    s = c1 + c0
    ll_b = jnp.sum((c1 - 1) * jnp.log(z) + (c0 - 1) * jnp.log(1 - z)
                   + gammaln(s) - gammaln(c1) - gammaln(c0))
    kl_g = jnp.sum(0.1 * jnp.log(b / 0.3) + gammaln(0.1) - gammaln(a)
                   + (a - 0.1) * digamma(a) + (0.3 - b) * (a / b))
    kl_b = jnp.sum(gammaln(s) - gammaln(c1) - gammaln(c0)
                   + (c1 - 1) * digamma(c1) + (c0 - 1) * digamma(c0)
                   + (2.0 - s) * digamma(s))
    kl = kl_g + kl_b
    return ll_g + ll_b - kl, kl


if __name__ == "__main__":
    # Small TPU-friendly shapes consistent with the module's (rows, cols) matrices.
    M_G, D_G = 16, 256    # stands in for (100, 784)
    M_B, D_B = 64, 128    # stands in for (5000, 100)

    params = init_params(M_G, D_G, M_B, D_B)

    key = jax.random.PRNGKey(0)
    k1, k2 = jax.random.split(key)
    logit_z_updated = jax.random.normal(k1, (M_B, D_B), jnp.float32)
    log_w_updated = jax.random.normal(k2, (M_G, D_G), jnp.float32)

    obj, kl = beta_gamma_sampler_forward(params, logit_z_updated, log_w_updated)
    obj, kl = jax.block_until_ready((obj, kl))

    ref_obj, ref_kl = _reference(params, logit_z_updated, log_w_updated)
    np.testing.assert_allclose(np.asarray(obj), np.asarray(ref_obj), rtol=5e-3, atol=0.5)
    np.testing.assert_allclose(np.asarray(kl), np.asarray(ref_kl), rtol=5e-3, atol=0.5)

    print("KERNEL_OK")
</pallas_src>

<mosaic_0001>
module attributes {stable_mosaic.version = 11 : i64} {
  func.func @_gamma_kernel(%arg0: i32, %arg1: i32, %arg2: memref<8x256xf32, #tpu.memory_space<vmem>>, %arg3: memref<8x256xf32, #tpu.memory_space<vmem>>, %arg4: memref<8x256xf32, #tpu.memory_space<vmem>>, %arg5: memref<8x128xf32, #tpu.memory_space<vmem>>, %arg6: memref<8x128xf32, #tpu.memory_space<vmem>>, %arg7: memref<8x256xf32, #tpu.memory_space<vmem>>, %arg8: memref<8x256xf32, #tpu.memory_space<vmem>>) attributes {dimension_semantics = [#tpu.dimension_semantics<parallel>, #tpu.dimension_semantics<arbitrary>], iteration_bounds = array<i64: 2, 1>, scalar_prefetch = 0 : i64, scratch_operands = 2 : i64, tpu.core_type = #tpu.core_type<tc>, window_params = [{transform_indices = @transform_0, window_bounds = array<i64: 8, 256>}, {transform_indices = @transform_1, window_bounds = array<i64: 8, 256>}, {transform_indices = @transform_2, window_bounds = array<i64: 8, 256>}, {transform_indices = @transform_3, window_bounds = array<i64: 8, 128>}, {transform_indices = @transform_4, window_bounds = array<i64: 8, 128>}]} {
    %c0_i32 = arith.constant 0 : i32
    %0 = arith.cmpi eq, %arg1, %c0_i32 : i32
    %1 = arith.extui %0 : i1 to i32
    %c0_i32_0 = arith.constant 0 : i32
    %2 = arith.cmpi ne, %1, %c0_i32_0 : i32
    scf.if %2 {
      %cst_48 = arith.constant 0.000000e+00 : f32
      %153 = vector.broadcast %cst_48 : f32 to vector<8x256xf32>
      %c0_49 = arith.constant 0 : index
      %c0_50 = arith.constant 0 : index
      %154 = vector.load %arg7[%c0_49, %c0_50] : memref<8x256xf32, #tpu.memory_space<vmem>>, vector<8x256xf32>
      tpu.vector_store %arg7[%c0_49, %c0_50], %153 {strides = array<i32>} : memref<8x256xf32, #tpu.memory_space<vmem>>, vector<8x256xf32>,
      %cst_51 = arith.constant 0.000000e+00 : f32
      %155 = vector.broadcast %cst_51 : f32 to vector<8x256xf32>
      %c0_52 = arith.constant 0 : index
      %c0_53 = arith.constant 0 : index
      %156 = vector.load %arg8[%c0_52, %c0_53] : memref<8x256xf32, #tpu.memory_space<vmem>>, vector<8x256xf32>
      tpu.vector_store %arg8[%c0_52, %c0_53], %155 {strides = array<i32>} : memref<8x256xf32, #tpu.memory_space<vmem>>, vector<8x256xf32>,
    } else {
    }
    %c0 = arith.constant 0 : index
    %c0_1 = arith.constant 0 : index
    %3 = vector.load %arg2[%c0, %c0_1] : memref<8x256xf32, #tpu.memory_space<vmem>>, vector<8x256xf32>
    %c0_2 = arith.constant 0 : index
    %c0_3 = arith.constant 0 : index
    %4 = vector.load %arg3[%c0_2, %c0_3] : memref<8x256xf32, #tpu.memory_space<vmem>>, vector<8x256xf32>
    %c0_4 = arith.constant 0 : index
    %c0_5 = arith.constant 0 : index
    %5 = vector.load %arg4[%c0_4, %c0_5] : memref<8x256xf32, #tpu.memory_space<vmem>>, vector<8x256xf32>
    %6 = math.exp %3 : vector<8x256xf32>
    %7 = tpu.reciprocal %6 {approx = true} : vector<8x256xf32> -> vector<8x256xf32>
    %8 = arith.mulf %6, %7 : vector<8x256xf32>
    %cst = arith.constant 2.000000e+00 : f32
    %9 = vector.broadcast %cst : f32 to vector<8x256xf32>
    %10 = arith.subf %9, %8 : vector<8x256xf32>
    %11 = arith.mulf %7, %10 : vector<8x256xf32>
    %cst_6 = arith.constant 1.000000e+00 : f32
    %12 = vector.broadcast %cst_6 : f32 to vector<8x256xf32>
    %13 = arith.addf %6, %12 : vector<8x256xf32>
    %14 = tpu.reciprocal %13 {approx = true} : vector<8x256xf32> -> vector<8x256xf32>
    %15 = arith.mulf %13, %14 : vector<8x256xf32>
    %cst_7 = arith.constant 2.000000e+00 : f32
    %16 = vector.broadcast %cst_7 : f32 to vector<8x256xf32>
    %17 = arith.subf %16, %15 : vector<8x256xf32>
    %18 = arith.mulf %14, %17 : vector<8x256xf32>
    %19 = arith.addf %11, %18 : vector<8x256xf32>
    %20 = arith.mulf %6, %13 : vector<8x256xf32>
    %cst_8 = arith.constant 2.000000e+00 : f32
    %21 = vector.broadcast %cst_8 : f32 to vector<8x256xf32>
    %22 = arith.addf %6, %21 : vector<8x256xf32>
    %23 = tpu.reciprocal %22 {approx = true} : vector<8x256xf32> -> vector<8x256xf32>
    %24 = arith.mulf %22, %23 : vector<8x256xf32>
    %cst_9 = arith.constant 2.000000e+00 : f32
    %25 = vector.broadcast %cst_9 : f32 to vector<8x256xf32>
    %26 = arith.subf %25, %24 : vector<8x256xf32>
    %27 = arith.mulf %23, %26 : vector<8x256xf32>
    %28 = arith.addf %19, %27 : vector<8x256xf32>
    %29 = arith.mulf %20, %22 : vector<8x256xf32>
    %cst_10 = arith.constant 3.000000e+00 : f32
    %30 = vector.broadcast %cst_10 : f32 to vector<8x256xf32>
    %31 = arith.addf %6, %30 : vector<8x256xf32>
    %32 = tpu.reciprocal %31 {approx = true} : vector<8x256xf32> -> vector<8x256xf32>
    %33 = arith.mulf %31, %32 : vector<8x256xf32>
    %cst_11 = arith.constant 2.000000e+00 : f32
    %34 = vector.broadcast %cst_11 : f32 to vector<8x256xf32>
    %35 = arith.subf %34, %33 : vector<8x256xf32>
    %36 = arith.mulf %32, %35 : vector<8x256xf32>
    %37 = arith.addf %28, %36 : vector<8x256xf32>
    %38 = arith.mulf %29, %31 : vector<8x256xf32>
    %cst_12 = arith.constant 4.000000e+00 : f32
    %39 = vector.broadcast %cst_12 : f32 to vector<8x256xf32>
    %40 = arith.addf %6, %39 : vector<8x256xf32>
    %41 = tpu.reciprocal %40 {approx = true} : vector<8x256xf32> -> vector<8x256xf32>
    %42 = arith.mulf %40, %41 : vector<8x256xf32>
    %cst_13 = arith.constant 2.000000e+00 : f32
    %43 = vector.broadcast %cst_13 : f32 to vector<8x256xf32>
    %44 = arith.subf %43, %42 : vector<8x256xf32>
    %45 = arith.mulf %41, %44 : vector<8x256xf32>
    %46 = arith.addf %37, %45 : vector<8x256xf32>
    %cst_14 = arith.constant 5.000000e+00 : f32
    %47 = vector.broadcast %cst_14 : f32 to vector<8x256xf32>
    %48 = arith.addf %6, %47 : vector<8x256xf32>
    %49 = tpu.reciprocal %48 {approx = true} : vector<8x256xf32> -> vector<8x256xf32>
    %50 = arith.mulf %48, %49 : vector<8x256xf32>
    %cst_15 = arith.constant 2.000000e+00 : f32
    %51 = vector.broadcast %cst_15 : f32 to vector<8x256xf32>
    %52 = arith.subf %51, %50 : vector<8x256xf32>
    %53 = arith.mulf %49, %52 : vector<8x256xf32>
    %54 = arith.addf %46, %53 : vector<8x256xf32>
    %55 = arith.mulf %40, %48 : vector<8x256xf32>
    %cst_16 = arith.constant 6.000000e+00 : f32
    %56 = vector.broadcast %cst_16 : f32 to vector<8x256xf32>
    %57 = arith.addf %6, %56 : vector<8x256xf32>
    %58 = tpu.reciprocal %57 {approx = true} : vector<8x256xf32> -> vector<8x256xf32>
    %59 = arith.mulf %57, %58 : vector<8x256xf32>
    %cst_17 = arith.constant 2.000000e+00 : f32
    %60 = vector.broadcast %cst_17 : f32 to vector<8x256xf32>
    %61 = arith.subf %60, %59 : vector<8x256xf32>
    %62 = arith.mulf %58, %61 : vector<8x256xf32>
    %63 = arith.addf %54, %62 : vector<8x256xf32>
    %64 = arith.mulf %55, %57 : vector<8x256xf32>
    %cst_18 = arith.constant 7.000000e+00 : f32
    %65 = vector.broadcast %cst_18 : f32 to vector<8x256xf32>
    %66 = arith.addf %6, %65 : vector<8x256xf32>
    %67 = tpu.reciprocal %66 {approx = true} : vector<8x256xf32> -> vector<8x256xf32>
    %68 = arith.mulf %66, %67 : vector<8x256xf32>
    %cst_19 = arith.constant 2.000000e+00 : f32
    %69 = vector.broadcast %cst_19 : f32 to vector<8x256xf32>
    %70 = arith.subf %69, %68 : vector<8x256xf32>
    %71 = arith.mulf %67, %70 : vector<8x256xf32>
    %72 = arith.addf %63, %71 : vector<8x256xf32>
    %73 = arith.mulf %64, %66 : vector<8x256xf32>
    %cst_20 = arith.constant 8.000000e+00 : f32
    %74 = vector.broadcast %cst_20 : f32 to vector<8x256xf32>
    %75 = arith.addf %6, %74 : vector<8x256xf32>
    %76 = tpu.reciprocal %75 {approx = true} : vector<8x256xf32> -> vector<8x256xf32>
    %77 = arith.mulf %75, %76 : vector<8x256xf32>
    %cst_21 = arith.constant 2.000000e+00 : f32
    %78 = vector.broadcast %cst_21 : f32 to vector<8x256xf32>
    %79 = arith.subf %78, %77 : vector<8x256xf32>
    %80 = arith.mulf %76, %79 : vector<8x256xf32>
    %81 = arith.mulf %80, %80 : vector<8x256xf32>
    %82 = math.log %75 : vector<8x256xf32>
    %cst_22 = arith.constant 5.000000e-01 : f32
    %83 = vector.broadcast %cst_22 : f32 to vector<8x256xf32>
    %84 = arith.subf %75, %83 : vector<8x256xf32>
    %85 = arith.mulf %84, %82 : vector<8x256xf32>
    %86 = arith.subf %85, %75 : vector<8x256xf32>
    %cst_23 = arith.constant 0.918938517 : f32
    %87 = vector.broadcast %cst_23 : f32 to vector<8x256xf32>
    %88 = arith.addf %86, %87 : vector<8x256xf32>
    %cst_24 = arith.constant 5.95238118E-4 : f32
    %89 = vector.broadcast %cst_24 : f32 to vector<8x256xf32>
    %90 = arith.mulf %81, %89 : vector<8x256xf32>
    %cst_25 = arith.constant 7.93650805E-4 : f32
    %91 = vector.broadcast %cst_25 : f32 to vector<8x256xf32>
    %92 = arith.subf %91, %90 : vector<8x256xf32>
    %93 = arith.mulf %81, %92 : vector<8x256xf32>
    %cst_26 = arith.constant 0.00277777785 : f32
    %94 = vector.broadcast %cst_26 : f32 to vector<8x256xf32>
    %95 = arith.subf %94, %93 : vector<8x256xf32>
    %96 = arith.mulf %81, %95 : vector<8x256xf32>
    %cst_27 = arith.constant 0.0833333358 : f32
    %97 = vector.broadcast %cst_27 : f32 to vector<8x256xf32>
    %98 = arith.subf %97, %96 : vector<8x256xf32>
    %99 = arith.mulf %80, %98 : vector<8x256xf32>
    %100 = arith.addf %88, %99 : vector<8x256xf32>
    %101 = math.log %38 : vector<8x256xf32>
    %102 = arith.subf %100, %101 : vector<8x256xf32>
    %103 = math.log %73 : vector<8x256xf32>
    %104 = arith.subf %102, %103 : vector<8x256xf32>
    %cst_28 = arith.constant 5.000000e-01 : f32
    %105 = vector.broadcast %cst_28 : f32 to vector<8x256xf32>
    %106 = arith.mulf %105, %80 : vector<8x256xf32>
    %107 = arith.subf %82, %106 : vector<8x256xf32>
    %cst_29 = arith.constant 0.0039682542 : f32
    %108 = vector.broadcast %cst_29 : f32 to vector<8x256xf32>
    %109 = arith.mulf %81, %108 : vector<8x256xf32>
    %cst_30 = arith.constant 0.00833333377 : f32
    %110 = vector.broadcast %cst_30 : f32 to vector<8x256xf32>
    %111 = arith.subf %110, %109 : vector<8x256xf32>
    %112 = arith.mulf %81, %111 : vector<8x256xf32>
    %cst_31 = arith.constant 0.0833333358 : f32
    %113 = vector.broadcast %cst_31 : f32 to vector<8x256xf32>
    %114 = arith.subf %113, %112 : vector<8x256xf32>
    %115 = arith.mulf %81, %114 : vector<8x256xf32>
    %116 = arith.subf %107, %115 : vector<8x256xf32>
    %117 = arith.subf %116, %72 : vector<8x256xf32>
    %118 = arith.mulf %6, %4 : vector<8x256xf32>
    %cst_32 = arith.constant 1.000000e+00 : f32
    %119 = vector.broadcast %cst_32 : f32 to vector<8x256xf32>
    %120 = arith.subf %6, %119 : vector<8x256xf32>
    %121 = arith.mulf %120, %5 : vector<8x256xf32>
    %122 = arith.addf %118, %121 : vector<8x256xf32>
    %123 = arith.addf %4, %5 : vector<8x256xf32>
    %124 = math.exp %123 : vector<8x256xf32>
    %125 = arith.subf %122, %124 : vector<8x256xf32>
    %126 = arith.subf %125, %104 : vector<8x256xf32>
    %cst_33 = arith.constant -1.20397282 : f32
    %127 = vector.broadcast %cst_33 : f32 to vector<8x256xf32>
    %128 = arith.subf %4, %127 : vector<8x256xf32>
    %cst_34 = arith.constant 1.000000e-01 : f32
    %129 = vector.broadcast %cst_34 : f32 to vector<8x256xf32>
    %130 = arith.mulf %129, %128 : vector<8x256xf32>
    %cst_35 = arith.constant 2.25271273 : f32
    %131 = vector.broadcast %cst_35 : f32 to vector<8x256xf32>
    %132 = arith.subf %131, %104 : vector<8x256xf32>
    %133 = arith.addf %130, %132 : vector<8x256xf32>
    %cst_36 = arith.constant 1.000000e-01 : f32
    %134 = vector.broadcast %cst_36 : f32 to vector<8x256xf32>
    %135 = arith.subf %6, %134 : vector<8x256xf32>
    %136 = arith.mulf %135, %117 : vector<8x256xf32>
    %137 = arith.addf %133, %136 : vector<8x256xf32>
    %138 = arith.subf %3, %4 : vector<8x256xf32>
    %139 = math.exp %138 : vector<8x256xf32>
    %cst_37 = arith.constant 3.000000e-01 : f32
    %140 = vector.broadcast %cst_37 : f32 to vector<8x256xf32>
    %141 = arith.mulf %140, %139 : vector<8x256xf32>
    %142 = arith.addf %137, %141 : vector<8x256xf32>
    %143 = arith.subf %142, %6 : vector<8x256xf32>
    %c0_38 = arith.constant 0 : index
    %c0_39 = arith.constant 0 : index
    %144 = vector.load %arg7[%c0_38, %c0_39] : memref<8x256xf32, #tpu.memory_space<vmem>>, vector<8x256xf32>
    %145 = arith.addf %144, %126 : vector<8x256xf32>
    %c0_40 = arith.constant 0 : index
    %c0_41 = arith.constant 0 : index
    %146 = vector.load %arg7[%c0_40, %c0_41] : memref<8x256xf32, #tpu.memory_space<vmem>>, vector<8x256xf32>
    tpu.vector_store %arg7[%c0_40, %c0_41], %145 {strides = array<i32>} : memref<8x256xf32, #tpu.memory_space<vmem>>, vector<8x256xf32>,
    %c0_42 = arith.constant 0 : index
    %c0_43 = arith.constant 0 : index
    %147 = vector.load %arg8[%c0_42, %c0_43] : memref<8x256xf32, #tpu.memory_space<vmem>>, vector<8x256xf32>
    %148 = arith.addf %147, %143 : vector<8x256xf32>
    %c0_44 = arith.constant 0 : index
    %c0_45 = arith.constant 0 : index
    %149 = vector.load %arg8[%c0_44, %c0_45] : memref<8x256xf32, #tpu.memory_space<vmem>>, vector<8x256xf32>
    tpu.vector_store %arg8[%c0_44, %c0_45], %148 {strides = array<i32>} : memref<8x256xf32, #tpu.memory_space<vmem>>, vector<8x256xf32>,
    %c0_i32_46 = arith.constant 0 : i32
    %150 = arith.cmpi eq, %arg1, %c0_i32_46 : i32
    %151 = arith.extui %150 : i1 to i32
    %c0_i32_47 = arith.constant 0 : i32
    %152 = arith.cmpi ne, %151, %c0_i32_47 : i32
    scf.if %152 {
      %c0_48 = arith.constant 0 : index
      %c0_49 = arith.constant 0 : index
      %153 = vector.load %arg7[%c0_48, %c0_49] : memref<8x256xf32, #tpu.memory_space<vmem>>, vector<8x256xf32>
      %154 = vector.shape_cast %153 : vector<8x256xf32> to vector<1x8x256xf32>
      %cst_50 = arith.constant dense<0.000000e+00> : vector<1xf32>
      %155 = vector.multi_reduction <add>, %154, %cst_50 [1, 2] : vector<1x8x256xf32> to vector<1xf32>
      %156 = vector.shape_cast %155 : vector<1xf32> to vector<1x1x1xf32>
      %157 = vector.extract %156[0, 0, 0] : f32 from vector<1x1x1xf32>
      %cst_51 = arith.constant 0.000000e+00 : f32
      %158 = vector.broadcast %cst_51 : f32 to vector<8x128xf32>
      %159 = vector.broadcast %157 : f32 to vector<8x128xf32>
      %160 = arith.addf %159, %158 : vector<8x128xf32>
      %c0_52 = arith.constant 0 : index
      %c0_53 = arith.constant 0 : index
      %161 = vector.load %arg5[%c0_52, %c0_53] : memref<8x128xf32, #tpu.memory_space<vmem>>, vector<8x128xf32>
      tpu.vector_store %arg5[%c0_52, %c0_53], %160 {strides = array<i32>} : memref<8x128xf32, #tpu.memory_space<vmem>>, vector<8x128xf32>,
      %c0_54 = arith.constant 0 : index
      %c0_55 = arith.constant 0 : index
      %162 = vector.load %arg8[%c0_54, %c0_55] : memref<8x256xf32, #tpu.memory_space<vmem>>, vector<8x256xf32>
      %163 = vector.shape_cast %162 : vector<8x256xf32> to vector<1x8x256xf32>
      %cst_56 = arith.constant dense<0.000000e+00> : vector<1xf32>
      %164 = vector.multi_reduction <add>, %163, %cst_56 [1, 2] : vector<1x8x256xf32> to vector<1xf32>
      %165 = vector.shape_cast %164 : vector<1xf32> to vector<1x1x1xf32>
      %166 = vector.extract %165[0, 0, 0] : f32 from vector<1x1x1xf32>
      %cst_57 = arith.constant 0.000000e+00 : f32
      %167 = vector.broadcast %cst_57 : f32 to vector<8x128xf32>
      %168 = vector.broadcast %166 : f32 to vector<8x128xf32>
      %169 = arith.addf %168, %167 : vector<8x128xf32>
      %c0_58 = arith.constant 0 : index
      %c0_59 = arith.constant 0 : index
      %170 = vector.load %arg6[%c0_58, %c0_59] : memref<8x128xf32, #tpu.memory_space<vmem>>, vector<8x128xf32>
      tpu.vector_store %arg6[%c0_58, %c0_59], %169 {strides = array<i32>} : memref<8x128xf32, #tpu.memory_space<vmem>>, vector<8x128xf32>,
    } else {
    }
    return
  }
  func.func @transform_0(%arg0: i32, %arg1: i32) -> (i32, i32) {
    %c1_i32 = arith.constant 1 : i32
    %0 = arith.muli %arg0, %c1_i32 : i32
    %1 = arith.addi %0, %arg1 : i32
    %c0_i32 = arith.constant 0 : i32
    %c0_i32_0 = arith.constant 0 : i32
    return %1, %c0_i32 : i32, i32
  }
  func.func @transform_1(%arg0: i32, %arg1: i32) -> (i32, i32) {
    %c1_i32 = arith.constant 1 : i32
    %0 = arith.muli %arg0, %c1_i32 : i32
    %1 = arith.addi %0, %arg1 : i32
    %c0_i32 = arith.constant 0 : i32
    %c0_i32_0 = arith.constant 0 : i32
    return %1, %c0_i32 : i32, i32
  }
  func.func @transform_2(%arg0: i32, %arg1: i32) -> (i32, i32) {
    %c1_i32 = arith.constant 1 : i32
    %0 = arith.muli %arg0, %c1_i32 : i32
    %1 = arith.addi %0, %arg1 : i32
    %c0_i32 = arith.constant 0 : i32
    %c0_i32_0 = arith.constant 0 : i32
    return %1, %c0_i32 : i32, i32
  }
  func.func @transform_3(%arg0: i32, %arg1: i32) -> (i32, i32) {
    %c0_i32 = arith.constant 0 : i32
    %c0_i32_0 = arith.constant 0 : i32
    return %arg0, %c0_i32 : i32, i32
  }
  func.func @transform_4(%arg0: i32, %arg1: i32) -> (i32, i32) {
    %c0_i32 = arith.constant 0 : i32
    %c0_i32_0 = arith.constant 0 : i32
    return %arg0, %c0_i32 : i32, i32
  }
}

module attributes {stable_mosaic.version = 11 : i64} {
  func.func @_beta_kernel(%arg0: i32, %arg1: i32, %arg2: memref<32x128xf32, #tpu.memory_space<vmem>>, %arg3: memref<32x128xf32, #tpu.memory_space<vmem>>, %arg4: memref<32x128xf32, #tpu.memory_space<vmem>>, %arg5: memref<8x128xf32, #tpu.memory_space<vmem>>, %arg6: memref<8x128xf32, #tpu.memory_space<vmem>>, %arg7: memref<32x128xf32, #tpu.memory_space<vmem>>, %arg8: memref<32x128xf32, #tpu.memory_space<vmem>>) attributes {dimension_semantics = [#tpu.dimension_semantics<parallel>, #tpu.dimension_semantics<arbitrary>], iteration_bounds = array<i64: 2, 1>, scalar_prefetch = 0 : i64, scratch_operands = 2 : i64, tpu.core_type = #tpu.core_type<tc>, window_params = [{transform_indices = @transform_0, window_bounds = array<i64: 32, 128>}, {transform_indices = @transform_1, window_bounds = array<i64: 32, 128>}, {transform_indices = @transform_2, window_bounds = array<i64: 32, 128>}, {transform_indices = @transform_3, window_bounds = array<i64: 8, 128>}, {transform_indices = @transform_4, window_bounds = array<i64: 8, 128>}]} {
    %c0_i32 = arith.constant 0 : i32
    %0 = arith.cmpi eq, %arg1, %c0_i32 : i32
    %1 = arith.extui %0 : i1 to i32
    %c0_i32_0 = arith.constant 0 : i32
    %2 = arith.cmpi ne, %1, %c0_i32_0 : i32
    scf.if %2 {
      %cst_106 = arith.constant 0.000000e+00 : f32
      %388 = vector.broadcast %cst_106 : f32 to vector<32x128xf32>
      %c0_107 = arith.constant 0 : index
      %c0_108 = arith.constant 0 : index
      %389 = vector.load %arg7[%c0_107, %c0_108] : memref<32x128xf32, #tpu.memory_space<vmem>>, vector<32x128xf32>
      tpu.vector_store %arg7[%c0_107, %c0_108], %388 {strides = array<i32>} : memref<32x128xf32, #tpu.memory_space<vmem>>, vector<32x128xf32>,
      %cst_109 = arith.constant 0.000000e+00 : f32
      %390 = vector.broadcast %cst_109 : f32 to vector<32x128xf32>
      %c0_110 = arith.constant 0 : index
      %c0_111 = arith.constant 0 : index
      %391 = vector.load %arg8[%c0_110, %c0_111] : memref<32x128xf32, #tpu.memory_space<vmem>>, vector<32x128xf32>
      tpu.vector_store %arg8[%c0_110, %c0_111], %390 {strides = array<i32>} : memref<32x128xf32, #tpu.memory_space<vmem>>, vector<32x128xf32>,
    } else {
    }
    %c0 = arith.constant 0 : index
    %c0_1 = arith.constant 0 : index
    %3 = vector.load %arg2[%c0, %c0_1] : memref<32x128xf32, #tpu.memory_space<vmem>>, vector<32x128xf32>
    %4 = math.exp %3 : vector<32x128xf32>
    %c0_2 = arith.constant 0 : index
    %c0_3 = arith.constant 0 : index
    %5 = vector.load %arg3[%c0_2, %c0_3] : memref<32x128xf32, #tpu.memory_space<vmem>>, vector<32x128xf32>
    %6 = math.exp %5 : vector<32x128xf32>
    %7 = arith.addf %4, %6 : vector<32x128xf32>
    %8 = tpu.reciprocal %4 {approx = true} : vector<32x128xf32> -> vector<32x128xf32>
    %9 = arith.mulf %4, %8 : vector<32x128xf32>
    %cst = arith.constant 2.000000e+00 : f32
    %10 = vector.broadcast %cst : f32 to vector<32x128xf32>
    %11 = arith.subf %10, %9 : vector<32x128xf32>
    %12 = arith.mulf %8, %11 : vector<32x128xf32>
    %cst_4 = arith.constant 1.000000e+00 : f32
    %13 = vector.broadcast %cst_4 : f32 to vector<32x128xf32>
    %14 = arith.addf %4, %13 : vector<32x128xf32>
    %15 = tpu.reciprocal %14 {approx = true} : vector<32x128xf32> -> vector<32x128xf32>
    %16 = arith.mulf %14, %15 : vector<32x128xf32>
    %cst_5 = arith.constant 2.000000e+00 : f32
    %17 = vector.broadcast %cst_5 : f32 to vector<32x128xf32>
    %18 = arith.subf %17, %16 : vector<32x128xf32>
    %19 = arith.mulf %15, %18 : vector<32x128xf32>
    %20 = arith.addf %12, %19 : vector<32x128xf32>
    %21 = arith.mulf %4, %14 : vector<32x128xf32>
    %cst_6 = arith.constant 2.000000e+00 : f32
    %22 = vector.broadcast %cst_6 : f32 to vector<32x128xf32>
    %23 = arith.addf %4, %22 : vector<32x128xf32>
    %24 = tpu.reciprocal %23 {approx = true} : vector<32x128xf32> -> vector<32x128xf32>
    %25 = arith.mulf %23, %24 : vector<32x128xf32>
    %cst_7 = arith.constant 2.000000e+00 : f32
    %26 = vector.broadcast %cst_7 : f32 to vector<32x128xf32>
    %27 = arith.subf %26, %25 : vector<32x128xf32>
    %28 = arith.mulf %24, %27 : vector<32x128xf32>
    %29 = arith.addf %20, %28 : vector<32x128xf32>
    %30 = arith.mulf %21, %23 : vector<32x128xf32>
    %cst_8 = arith.constant 3.000000e+00 : f32
    %31 = vector.broadcast %cst_8 : f32 to vector<32x128xf32>
    %32 = arith.addf %4, %31 : vector<32x128xf32>
    %33 = tpu.reciprocal %32 {approx = true} : vector<32x128xf32> -> vector<32x128xf32>
    %34 = arith.mulf %32, %33 : vector<32x128xf32>
    %cst_9 = arith.constant 2.000000e+00 : f32
    %35 = vector.broadcast %cst_9 : f32 to vector<32x128xf32>
    %36 = arith.subf %35, %34 : vector<32x128xf32>
    %37 = arith.mulf %33, %36 : vector<32x128xf32>
    %38 = arith.addf %29, %37 : vector<32x128xf32>
    %39 = arith.mulf %30, %32 : vector<32x128xf32>
    %cst_10 = arith.constant 4.000000e+00 : f32
    %40 = vector.broadcast %cst_10 : f32 to vector<32x128xf32>
    %41 = arith.addf %4, %40 : vector<32x128xf32>
    %42 = tpu.reciprocal %41 {approx = true} : vector<32x128xf32> -> vector<32x128xf32>
    %43 = arith.mulf %41, %42 : vector<32x128xf32>
    %cst_11 = arith.constant 2.000000e+00 : f32
    %44 = vector.broadcast %cst_11 : f32 to vector<32x128xf32>
    %45 = arith.subf %44, %43 : vector<32x128xf32>
    %46 = arith.mulf %42, %45 : vector<32x128xf32>
    %47 = arith.addf %38, %46 : vector<32x128xf32>
    %cst_12 = arith.constant 5.000000e+00 : f32
    %48 = vector.broadcast %cst_12 : f32 to vector<32x128xf32>
    %49 = arith.addf %4, %48 : vector<32x128xf32>
    %50 = tpu.reciprocal %49 {approx = true} : vector<32x128xf32> -> vector<32x128xf32>
    %51 = arith.mulf %49, %50 : vector<32x128xf32>
    %cst_13 = arith.constant 2.000000e+00 : f32
    %52 = vector.broadcast %cst_13 : f32 to vector<32x128xf32>
    %53 = arith.subf %52, %51 : vector<32x128xf32>
    %54 = arith.mulf %50, %53 : vector<32x128xf32>
    %55 = arith.addf %47, %54 : vector<32x128xf32>
    %56 = arith.mulf %41, %49 : vector<32x128xf32>
    %cst_14 = arith.constant 6.000000e+00 : f32
    %57 = vector.broadcast %cst_14 : f32 to vector<32x128xf32>
    %58 = arith.addf %4, %57 : vector<32x128xf32>
    %59 = tpu.reciprocal %58 {approx = true} : vector<32x128xf32> -> vector<32x128xf32>
    %60 = arith.mulf %58, %59 : vector<32x128xf32>
    %cst_15 = arith.constant 2.000000e+00 : f32
    %61 = vector.broadcast %cst_15 : f32 to vector<32x128xf32>
    %62 = arith.subf %61, %60 : vector<32x128xf32>
    %63 = arith.mulf %59, %62 : vector<32x128xf32>
    %64 = arith.addf %55, %63 : vector<32x128xf32>
    %65 = arith.mulf %56, %58 : vector<32x128xf32>
    %cst_16 = arith.constant 7.000000e+00 : f32
    %66 = vector.broadcast %cst_16 : f32 to vector<32x128xf32>
    %67 = arith.addf %4, %66 : vector<32x128xf32>
    %68 = tpu.reciprocal %67 {approx = true} : vector<32x128xf32> -> vector<32x128xf32>
    %69 = arith.mulf %67, %68 : vector<32x128xf32>
    %cst_17 = arith.constant 2.000000e+00 : f32
    %70 = vector.broadcast %cst_17 : f32 to vector<32x128xf32>
    %71 = arith.subf %70, %69 : vector<32x128xf32>
    %72 = arith.mulf %68, %71 : vector<32x128xf32>
    %73 = arith.addf %64, %72 : vector<32x128xf32>
    %74 = arith.mulf %65, %67 : vector<32x128xf32>
    %cst_18 = arith.constant 8.000000e+00 : f32
    %75 = vector.broadcast %cst_18 : f32 to vector<32x128xf32>
    %76 = arith.addf %4, %75 : vector<32x128xf32>
    %77 = tpu.reciprocal %76 {approx = true} : vector<32x128xf32> -> vector<32x128xf32>
    %78 = arith.mulf %76, %77 : vector<32x128xf32>
    %cst_19 = arith.constant 2.000000e+00 : f32
    %79 = vector.broadcast %cst_19 : f32 to vector<32x128xf32>
    %80 = arith.subf %79, %78 : vector<32x128xf32>
    %81 = arith.mulf %77, %80 : vector<32x128xf32>
    %82 = arith.mulf %81, %81 : vector<32x128xf32>
    %83 = math.log %76 : vector<32x128xf32>
    %cst_20 = arith.constant 5.000000e-01 : f32
    %84 = vector.broadcast %cst_20 : f32 to vector<32x128xf32>
    %85 = arith.subf %76, %84 : vector<32x128xf32>
    %86 = arith.mulf %85, %83 : vector<32x128xf32>
    %87 = arith.subf %86, %76 : vector<32x128xf32>
    %cst_21 = arith.constant 0.918938517 : f32
    %88 = vector.broadcast %cst_21 : f32 to vector<32x128xf32>
    %89 = arith.addf %87, %88 : vector<32x128xf32>
    %cst_22 = arith.constant 5.95238118E-4 : f32
    %90 = vector.broadcast %cst_22 : f32 to vector<32x128xf32>
    %91 = arith.mulf %82, %90 : vector<32x128xf32>
    %cst_23 = arith.constant 7.93650805E-4 : f32
    %92 = vector.broadcast %cst_23 : f32 to vector<32x128xf32>
    %93 = arith.subf %92, %91 : vector<32x128xf32>
    %94 = arith.mulf %82, %93 : vector<32x128xf32>
    %cst_24 = arith.constant 0.00277777785 : f32
    %95 = vector.broadcast %cst_24 : f32 to vector<32x128xf32>
    %96 = arith.subf %95, %94 : vector<32x128xf32>
    %97 = arith.mulf %82, %96 : vector<32x128xf32>
    %cst_25 = arith.constant 0.0833333358 : f32
    %98 = vector.broadcast %cst_25 : f32 to vector<32x128xf32>
    %99 = arith.subf %98, %97 : vector<32x128xf32>
    %100 = arith.mulf %81, %99 : vector<32x128xf32>
    %101 = arith.addf %89, %100 : vector<32x128xf32>
    %102 = math.log %39 : vector<32x128xf32>
    %103 = arith.subf %101, %102 : vector<32x128xf32>
    %104 = math.log %74 : vector<32x128xf32>
    %105 = arith.subf %103, %104 : vector<32x128xf32>
    %cst_26 = arith.constant 5.000000e-01 : f32
    %106 = vector.broadcast %cst_26 : f32 to vector<32x128xf32>
    %107 = arith.mulf %106, %81 : vector<32x128xf32>
    %108 = arith.subf %83, %107 : vector<32x128xf32>
    %cst_27 = arith.constant 0.0039682542 : f32
    %109 = vector.broadcast %cst_27 : f32 to vector<32x128xf32>
    %110 = arith.mulf %82, %109 : vector<32x128xf32>
    %cst_28 = arith.constant 0.00833333377 : f32
    %111 = vector.broadcast %cst_28 : f32 to vector<32x128xf32>
    %112 = arith.subf %111, %110 : vector<32x128xf32>
    %113 = arith.mulf %82, %112 : vector<32x128xf32>
    %cst_29 = arith.constant 0.0833333358 : f32
    %114 = vector.broadcast %cst_29 : f32 to vector<32x128xf32>
    %115 = arith.subf %114, %113 : vector<32x128xf32>
    %116 = arith.mulf %82, %115 : vector<32x128xf32>
    %117 = arith.subf %108, %116 : vector<32x128xf32>
    %118 = arith.subf %117, %73 : vector<32x128xf32>
    %119 = tpu.reciprocal %6 {approx = true} : vector<32x128xf32> -> vector<32x128xf32>
    %120 = arith.mulf %6, %119 : vector<32x128xf32>
    %cst_30 = arith.constant 2.000000e+00 : f32
    %121 = vector.broadcast %cst_30 : f32 to vector<32x128xf32>
    %122 = arith.subf %121, %120 : vector<32x128xf32>
    %123 = arith.mulf %119, %122 : vector<32x128xf32>
    %cst_31 = arith.constant 1.000000e+00 : f32
    %124 = vector.broadcast %cst_31 : f32 to vector<32x128xf32>
    %125 = arith.addf %6, %124 : vector<32x128xf32>
    %126 = tpu.reciprocal %125 {approx = true} : vector<32x128xf32> -> vector<32x128xf32>
    %127 = arith.mulf %125, %126 : vector<32x128xf32>
    %cst_32 = arith.constant 2.000000e+00 : f32
    %128 = vector.broadcast %cst_32 : f32 to vector<32x128xf32>
    %129 = arith.subf %128, %127 : vector<32x128xf32>
    %130 = arith.mulf %126, %129 : vector<32x128xf32>
    %131 = arith.addf %123, %130 : vector<32x128xf32>
    %132 = arith.mulf %6, %125 : vector<32x128xf32>
    %cst_33 = arith.constant 2.000000e+00 : f32
    %133 = vector.broadcast %cst_33 : f32 to vector<32x128xf32>
    %134 = arith.addf %6, %133 : vector<32x128xf32>
    %135 = tpu.reciprocal %134 {approx = true} : vector<32x128xf32> -> vector<32x128xf32>
    %136 = arith.mulf %134, %135 : vector<32x128xf32>
    %cst_34 = arith.constant 2.000000e+00 : f32
    %137 = vector.broadcast %cst_34 : f32 to vector<32x128xf32>
    %138 = arith.subf %137, %136 : vector<32x128xf32>
    %139 = arith.mulf %135, %138 : vector<32x128xf32>
    %140 = arith.addf %131, %139 : vector<32x128xf32>
    %141 = arith.mulf %132, %134 : vector<32x128xf32>
    %cst_35 = arith.constant 3.000000e+00 : f32
    %142 = vector.broadcast %cst_35 : f32 to vector<32x128xf32>
    %143 = arith.addf %6, %142 : vector<32x128xf32>
    %144 = tpu.reciprocal %143 {approx = true} : vector<32x128xf32> -> vector<32x128xf32>
    %145 = arith.mulf %143, %144 : vector<32x128xf32>
    %cst_36 = arith.constant 2.000000e+00 : f32
    %146 = vector.broadcast %cst_36 : f32 to vector<32x128xf32>
    %147 = arith.subf %146, %145 : vector<32x128xf32>
    %148 = arith.mulf %144, %147 : vector<32x128xf32>
    %149 = arith.addf %140, %148 : vector<32x128xf32>
    %150 = arith.mulf %141, %143 : vector<32x128xf32>
    %cst_37 = arith.constant 4.000000e+00 : f32
    %151 = vector.broadcast %cst_37 : f32 to vector<32x128xf32>
    %152 = arith.addf %6, %151 : vector<32x128xf32>
    %153 = tpu.reciprocal %152 {approx = true} : vector<32x128xf32> -> vector<32x128xf32>
    %154 = arith.mulf %152, %153 : vector<32x128xf32>
    %cst_38 = arith.constant 2.000000e+00 : f32
    %155 = vector.broadcast %cst_38 : f32 to vector<32x128xf32>
    %156 = arith.subf %155, %154 : vector<32x128xf32>
    %157 = arith.mulf %153, %156 : vector<32x128xf32>
    %158 = arith.addf %149, %157 : vector<32x128xf32>
    %cst_39 = arith.constant 5.000000e+00 : f32
    %159 = vector.broadcast %cst_39 : f32 to vector<32x128xf32>
    %160 = arith.addf %6, %159 : vector<32x128xf32>
    %161 = tpu.reciprocal %160 {approx = true} : vector<32x128xf32> -> vector<32x128xf32>
    %162 = arith.mulf %160, %161 : vector<32x128xf32>
    %cst_40 = arith.constant 2.000000e+00 : f32
    %163 = vector.broadcast %cst_40 : f32 to vector<32x128xf32>
    %164 = arith.subf %163, %162 : vector<32x128xf32>
    %165 = arith.mulf %161, %164 : vector<32x128xf32>
    %166 = arith.addf %158, %165 : vector<32x128xf32>
    %167 = arith.mulf %152, %160 : vector<32x128xf32>
    %cst_41 = arith.constant 6.000000e+00 : f32
    %168 = vector.broadcast %cst_41 : f32 to vector<32x128xf32>
    %169 = arith.addf %6, %168 : vector<32x128xf32>
    %170 = tpu.reciprocal %169 {approx = true} : vector<32x128xf32> -> vector<32x128xf32>
    %171 = arith.mulf %169, %170 : vector<32x128xf32>
    %cst_42 = arith.constant 2.000000e+00 : f32
    %172 = vector.broadcast %cst_42 : f32 to vector<32x128xf32>
    %173 = arith.subf %172, %171 : vector<32x128xf32>
    %174 = arith.mulf %170, %173 : vector<32x128xf32>
    %175 = arith.addf %166, %174 : vector<32x128xf32>
    %176 = arith.mulf %167, %169 : vector<32x128xf32>
    %cst_43 = arith.constant 7.000000e+00 : f32
    %177 = vector.broadcast %cst_43 : f32 to vector<32x128xf32>
    %178 = arith.addf %6, %177 : vector<32x128xf32>
    %179 = tpu.reciprocal %178 {approx = true} : vector<32x128xf32> -> vector<32x128xf32>
    %180 = arith.mulf %178, %179 : vector<32x128xf32>
    %cst_44 = arith.constant 2.000000e+00 : f32
    %181 = vector.broadcast %cst_44 : f32 to vector<32x128xf32>
    %182 = arith.subf %181, %180 : vector<32x128xf32>
    %183 = arith.mulf %179, %182 : vector<32x128xf32>
    %184 = arith.addf %175, %183 : vector<32x128xf32>
    %185 = arith.mulf %176, %178 : vector<32x128xf32>
    %cst_45 = arith.constant 8.000000e+00 : f32
    %186 = vector.broadcast %cst_45 : f32 to vector<32x128xf32>
    %187 = arith.addf %6, %186 : vector<32x128xf32>
    %188 = tpu.reciprocal %187 {approx = true} : vector<32x128xf32> -> vector<32x128xf32>
    %189 = arith.mulf %187, %188 : vector<32x128xf32>
    %cst_46 = arith.constant 2.000000e+00 : f32
    %190 = vector.broadcast %cst_46 : f32 to vector<32x128xf32>
    %191 = arith.subf %190, %189 : vector<32x128xf32>
    %192 = arith.mulf %188, %191 : vector<32x128xf32>
    %193 = arith.mulf %192, %192 : vector<32x128xf32>
    %194 = math.log %187 : vector<32x128xf32>
    %cst_47 = arith.constant 5.000000e-01 : f32
    %195 = vector.broadcast %cst_47 : f32 to vector<32x128xf32>
    %196 = arith.subf %187, %195 : vector<32x128xf32>
    %197 = arith.mulf %196, %194 : vector<32x128xf32>
    %198 = arith.subf %197, %187 : vector<32x128xf32>
    %cst_48 = arith.constant 0.918938517 : f32
    %199 = vector.broadcast %cst_48 : f32 to vector<32x128xf32>
    %200 = arith.addf %198, %199 : vector<32x128xf32>
    %cst_49 = arith.constant 5.95238118E-4 : f32
    %201 = vector.broadcast %cst_49 : f32 to vector<32x128xf32>
    %202 = arith.mulf %193, %201 : vector<32x128xf32>
    %cst_50 = arith.constant 7.93650805E-4 : f32
    %203 = vector.broadcast %cst_50 : f32 to vector<32x128xf32>
    %204 = arith.subf %203, %202 : vector<32x128xf32>
    %205 = arith.mulf %193, %204 : vector<32x128xf32>
    %cst_51 = arith.constant 0.00277777785 : f32
    %206 = vector.broadcast %cst_51 : f32 to vector<32x128xf32>
    %207 = arith.subf %206, %205 : vector<32x128xf32>
    %208 = arith.mulf %193, %207 : vector<32x128xf32>
    %cst_52 = arith.constant 0.0833333358 : f32
    %209 = vector.broadcast %cst_52 : f32 to vector<32x128xf32>
    %210 = arith.subf %209, %208 : vector<32x128xf32>
    %211 = arith.mulf %192, %210 : vector<32x128xf32>
    %212 = arith.addf %200, %211 : vector<32x128xf32>
    %213 = math.log %150 : vector<32x128xf32>
    %214 = arith.subf %212, %213 : vector<32x128xf32>
    %215 = math.log %185 : vector<32x128xf32>
    %216 = arith.subf %214, %215 : vector<32x128xf32>
    %cst_53 = arith.constant 5.000000e-01 : f32
    %217 = vector.broadcast %cst_53 : f32 to vector<32x128xf32>
    %218 = arith.mulf %217, %192 : vector<32x128xf32>
    %219 = arith.subf %194, %218 : vector<32x128xf32>
    %cst_54 = arith.constant 0.0039682542 : f32
    %220 = vector.broadcast %cst_54 : f32 to vector<32x128xf32>
    %221 = arith.mulf %193, %220 : vector<32x128xf32>
    %cst_55 = arith.constant 0.00833333377 : f32
    %222 = vector.broadcast %cst_55 : f32 to vector<32x128xf32>
    %223 = arith.subf %222, %221 : vector<32x128xf32>
    %224 = arith.mulf %193, %223 : vector<32x128xf32>
    %cst_56 = arith.constant 0.0833333358 : f32
    %225 = vector.broadcast %cst_56 : f32 to vector<32x128xf32>
    %226 = arith.subf %225, %224 : vector<32x128xf32>
    %227 = arith.mulf %193, %226 : vector<32x128xf32>
    %228 = arith.subf %219, %227 : vector<32x128xf32>
    %229 = arith.subf %228, %184 : vector<32x128xf32>
    %230 = tpu.reciprocal %7 {approx = true} : vector<32x128xf32> -> vector<32x128xf32>
    %231 = arith.mulf %7, %230 : vector<32x128xf32>
    %cst_57 = arith.constant 2.000000e+00 : f32
    %232 = vector.broadcast %cst_57 : f32 to vector<32x128xf32>
    %233 = arith.subf %232, %231 : vector<32x128xf32>
    %234 = arith.mulf %230, %233 : vector<32x128xf32>
    %cst_58 = arith.constant 1.000000e+00 : f32
    %235 = vector.broadcast %cst_58 : f32 to vector<32x128xf32>
    %236 = arith.addf %7, %235 : vector<32x128xf32>
    %237 = tpu.reciprocal %236 {approx = true} : vector<32x128xf32> -> vector<32x128xf32>
    %238 = arith.mulf %236, %237 : vector<32x128xf32>
    %cst_59 = arith.constant 2.000000e+00 : f32
    %239 = vector.broadcast %cst_59 : f32 to vector<32x128xf32>
    %240 = arith.subf %239, %238 : vector<32x128xf32>
    %241 = arith.mulf %237, %240 : vector<32x128xf32>
    %242 = arith.addf %234, %241 : vector<32x128xf32>
    %243 = arith.mulf %7, %236 : vector<32x128xf32>
    %cst_60 = arith.constant 2.000000e+00 : f32
    %244 = vector.broadcast %cst_60 : f32 to vector<32x128xf32>
    %245 = arith.addf %7, %244 : vector<32x128xf32>
    %246 = tpu.reciprocal %245 {approx = true} : vector<32x128xf32> -> vector<32x128xf32>
    %247 = arith.mulf %245, %246 : vector<32x128xf32>
    %cst_61 = arith.constant 2.000000e+00 : f32
    %248 = vector.broadcast %cst_61 : f32 to vector<32x128xf32>
    %249 = arith.subf %248, %247 : vector<32x128xf32>
    %250 = arith.mulf %246, %249 : vector<32x128xf32>
    %251 = arith.addf %242, %250 : vector<32x128xf32>
    %252 = arith.mulf %243, %245 : vector<32x128xf32>
    %cst_62 = arith.constant 3.000000e+00 : f32
    %253 = vector.broadcast %cst_62 : f32 to vector<32x128xf32>
    %254 = arith.addf %7, %253 : vector<32x128xf32>
    %255 = tpu.reciprocal %254 {approx = true} : vector<32x128xf32> -> vector<32x128xf32>
    %256 = arith.mulf %254, %255 : vector<32x128xf32>
    %cst_63 = arith.constant 2.000000e+00 : f32
    %257 = vector.broadcast %cst_63 : f32 to vector<32x128xf32>
    %258 = arith.subf %257, %256 : vector<32x128xf32>
    %259 = arith.mulf %255, %258 : vector<32x128xf32>
    %260 = arith.addf %251, %259 : vector<32x128xf32>
    %261 = arith.mulf %252, %254 : vector<32x128xf32>
    %cst_64 = arith.constant 4.000000e+00 : f32
    %262 = vector.broadcast %cst_64 : f32 to vector<32x128xf32>
    %263 = arith.addf %7, %262 : vector<32x128xf32>
    %264 = tpu.reciprocal %263 {approx = true} : vector<32x128xf32> -> vector<32x128xf32>
    %265 = arith.mulf %263, %264 : vector<32x128xf32>
    %cst_65 = arith.constant 2.000000e+00 : f32
    %266 = vector.broadcast %cst_65 : f32 to vector<32x128xf32>
    %267 = arith.subf %266, %265 : vector<32x128xf32>
    %268 = arith.mulf %264, %267 : vector<32x128xf32>
    %269 = arith.addf %260, %268 : vector<32x128xf32>
    %cst_66 = arith.constant 5.000000e+00 : f32
    %270 = vector.broadcast %cst_66 : f32 to vector<32x128xf32>
    %271 = arith.addf %7, %270 : vector<32x128xf32>
    %272 = tpu.reciprocal %271 {approx = true} : vector<32x128xf32> -> vector<32x128xf32>
    %273 = arith.mulf %271, %272 : vector<32x128xf32>
    %cst_67 = arith.constant 2.000000e+00 : f32
    %274 = vector.broadcast %cst_67 : f32 to vector<32x128xf32>
    %275 = arith.subf %274, %273 : vector<32x128xf32>
    %276 = arith.mulf %272, %275 : vector<32x128xf32>
    %277 = arith.addf %269, %276 : vector<32x128xf32>
    %278 = arith.mulf %263, %271 : vector<32x128xf32>
    %cst_68 = arith.constant 6.000000e+00 : f32
    %279 = vector.broadcast %cst_68 : f32 to vector<32x128xf32>
    %280 = arith.addf %7, %279 : vector<32x128xf32>
    %281 = tpu.reciprocal %280 {approx = true} : vector<32x128xf32> -> vector<32x128xf32>
    %282 = arith.mulf %280, %281 : vector<32x128xf32>
    %cst_69 = arith.constant 2.000000e+00 : f32
    %283 = vector.broadcast %cst_69 : f32 to vector<32x128xf32>
    %284 = arith.subf %283, %282 : vector<32x128xf32>
    %285 = arith.mulf %281, %284 : vector<32x128xf32>
    %286 = arith.addf %277, %285 : vector<32x128xf32>
    %287 = arith.mulf %278, %280 : vector<32x128xf32>
    %cst_70 = arith.constant 7.000000e+00 : f32
    %288 = vector.broadcast %cst_70 : f32 to vector<32x128xf32>
    %289 = arith.addf %7, %288 : vector<32x128xf32>
    %290 = tpu.reciprocal %289 {approx = true} : vector<32x128xf32> -> vector<32x128xf32>
    %291 = arith.mulf %289, %290 : vector<32x128xf32>
    %cst_71 = arith.constant 2.000000e+00 : f32
    %292 = vector.broadcast %cst_71 : f32 to vector<32x128xf32>
    %293 = arith.subf %292, %291 : vector<32x128xf32>
    %294 = arith.mulf %290, %293 : vector<32x128xf32>
    %295 = arith.addf %286, %294 : vector<32x128xf32>
    %296 = arith.mulf %287, %289 : vector<32x128xf32>
    %cst_72 = arith.constant 8.000000e+00 : f32
    %297 = vector.broadcast %cst_72 : f32 to vector<32x128xf32>
    %298 = arith.addf %7, %297 : vector<32x128xf32>
    %299 = tpu.reciprocal %298 {approx = true} : vector<32x128xf32> -> vector<32x128xf32>
    %300 = arith.mulf %298, %299 : vector<32x128xf32>
    %cst_73 = arith.constant 2.000000e+00 : f32
    %301 = vector.broadcast %cst_73 : f32 to vector<32x128xf32>
    %302 = arith.subf %301, %300 : vector<32x128xf32>
    %303 = arith.mulf %299, %302 : vector<32x128xf32>
    %304 = arith.mulf %303, %303 : vector<32x128xf32>
    %305 = math.log %298 : vector<32x128xf32>
    %cst_74 = arith.constant 5.000000e-01 : f32
    %306 = vector.broadcast %cst_74 : f32 to vector<32x128xf32>
    %307 = arith.subf %298, %306 : vector<32x128xf32>
    %308 = arith.mulf %307, %305 : vector<32x128xf32>
    %309 = arith.subf %308, %298 : vector<32x128xf32>
    %cst_75 = arith.constant 0.918938517 : f32
    %310 = vector.broadcast %cst_75 : f32 to vector<32x128xf32>
    %311 = arith.addf %309, %310 : vector<32x128xf32>
    %cst_76 = arith.constant 5.95238118E-4 : f32
    %312 = vector.broadcast %cst_76 : f32 to vector<32x128xf32>
    %313 = arith.mulf %304, %312 : vector<32x128xf32>
    %cst_77 = arith.constant 7.93650805E-4 : f32
    %314 = vector.broadcast %cst_77 : f32 to vector<32x128xf32>
    %315 = arith.subf %314, %313 : vector<32x128xf32>
    %316 = arith.mulf %304, %315 : vector<32x128xf32>
    %cst_78 = arith.constant 0.00277777785 : f32
    %317 = vector.broadcast %cst_78 : f32 to vector<32x128xf32>
    %318 = arith.subf %317, %316 : vector<32x128xf32>
    %319 = arith.mulf %304, %318 : vector<32x128xf32>
    %cst_79 = arith.constant 0.0833333358 : f32
    %320 = vector.broadcast %cst_79 : f32 to vector<32x128xf32>
    %321 = arith.subf %320, %319 : vector<32x128xf32>
    %322 = arith.mulf %303, %321 : vector<32x128xf32>
    %323 = arith.addf %311, %322 : vector<32x128xf32>
    %324 = math.log %261 : vector<32x128xf32>
    %325 = arith.subf %323, %324 : vector<32x128xf32>
    %326 = math.log %296 : vector<32x128xf32>
    %327 = arith.subf %325, %326 : vector<32x128xf32>
    %cst_80 = arith.constant 5.000000e-01 : f32
    %328 = vector.broadcast %cst_80 : f32 to vector<32x128xf32>
    %329 = arith.mulf %328, %303 : vector<32x128xf32>
    %330 = arith.subf %305, %329 : vector<32x128xf32>
    %cst_81 = arith.constant 0.0039682542 : f32
    %331 = vector.broadcast %cst_81 : f32 to vector<32x128xf32>
    %332 = arith.mulf %304, %331 : vector<32x128xf32>
    %cst_82 = arith.constant 0.00833333377 : f32
    %333 = vector.broadcast %cst_82 : f32 to vector<32x128xf32>
    %334 = arith.subf %333, %332 : vector<32x128xf32>
    %335 = arith.mulf %304, %334 : vector<32x128xf32>
    %cst_83 = arith.constant 0.0833333358 : f32
    %336 = vector.broadcast %cst_83 : f32 to vector<32x128xf32>
    %337 = arith.subf %336, %335 : vector<32x128xf32>
    %338 = arith.mulf %304, %337 : vector<32x128xf32>
    %339 = arith.subf %330, %338 : vector<32x128xf32>
    %340 = arith.subf %339, %295 : vector<32x128xf32>
    %341 = arith.subf %327, %105 : vector<32x128xf32>
    %342 = arith.subf %341, %216 : vector<32x128xf32>
    %c0_84 = arith.constant 0 : index
    %c0_85 = arith.constant 0 : index
    %343 = vector.load %arg4[%c0_84, %c0_85] : memref<32x128xf32, #tpu.memory_space<vmem>>, vector<32x128xf32>
    %344 = math.absf %343 : vector<32x128xf32>
    %cst_86 = arith.constant 0.000000e+00 : f32
    %345 = vector.broadcast %cst_86 : f32 to vector<32x128xf32>
    %346 = arith.subf %345, %344 : vector<32x128xf32>
    %347 = math.exp %346 : vector<32x128xf32>
    %cst_87 = arith.constant 1.000000e+00 : f32
    %348 = vector.broadcast %cst_87 : f32 to vector<32x128xf32>
    %349 = arith.addf %348, %347 : vector<32x128xf32>
    %350 = math.log %349 : vector<32x128xf32>
    %cst_88 = arith.constant 0.000000e+00 : f32
    %351 = vector.broadcast %cst_88 : f32 to vector<32x128xf32>
    %352 = arith.minimumf %343, %351 : vector<32x128xf32>
    %353 = arith.subf %352, %350 : vector<32x128xf32>
    %cst_89 = arith.constant 0.000000e+00 : f32
    %354 = vector.broadcast %cst_89 : f32 to vector<32x128xf32>
    %355 = arith.subf %354, %343 : vector<32x128xf32>
    %cst_90 = arith.constant 0.000000e+00 : f32
    %356 = vector.broadcast %cst_90 : f32 to vector<32x128xf32>
    %357 = arith.minimumf %355, %356 : vector<32x128xf32>
    %358 = arith.subf %357, %350 : vector<32x128xf32>
    %cst_91 = arith.constant 1.000000e+00 : f32
    %359 = vector.broadcast %cst_91 : f32 to vector<32x128xf32>
    %360 = arith.subf %4, %359 : vector<32x128xf32>
    %361 = arith.mulf %360, %353 : vector<32x128xf32>
    %cst_92 = arith.constant 1.000000e+00 : f32
    %362 = vector.broadcast %cst_92 : f32 to vector<32x128xf32>
    %363 = arith.subf %6, %362 : vector<32x128xf32>
    %364 = arith.mulf %363, %358 : vector<32x128xf32>
    %365 = arith.addf %361, %364 : vector<32x128xf32>
    %366 = arith.addf %365, %342 : vector<32x128xf32>
    %cst_93 = arith.constant 1.000000e+00 : f32
    %367 = vector.broadcast %cst_93 : f32 to vector<32x128xf32>
    %368 = arith.subf %4, %367 : vector<32x128xf32>
    %369 = arith.mulf %368, %118 : vector<32x128xf32>
    %370 = arith.addf %342, %369 : vector<32x128xf32>
    %cst_94 = arith.constant 1.000000e+00 : f32
    %371 = vector.broadcast %cst_94 : f32 to vector<32x128xf32>
    %372 = arith.subf %6, %371 : vector<32x128xf32>
    %373 = arith.mulf %372, %229 : vector<32x128xf32>
    %374 = arith.addf %370, %373 : vector<32x128xf32>
    %cst_95 = arith.constant 2.000000e+00 : f32
    %375 = vector.broadcast %cst_95 : f32 to vector<32x128xf32>
    %376 = arith.subf %375, %7 : vector<32x128xf32>
    %377 = arith.mulf %376, %340 : vector<32x128xf32>
    %378 = arith.addf %374, %377 : vector<32x128xf32>
    %c0_96 = arith.constant 0 : index
    %c0_97 = arith.constant 0 : index
    %379 = vector.load %arg7[%c0_96, %c0_97] : memref<32x128xf32, #tpu.memory_space<vmem>>, vector<32x128xf32>
    %380 = arith.addf %379, %366 : vector<32x128xf32>
    %c0_98 = arith.constant 0 : index
    %c0_99 = arith.constant 0 : index
    %381 = vector.load %arg7[%c0_98, %c0_99] : memref<32x128xf32, #tpu.memory_space<vmem>>, vector<32x128xf32>
    tpu.vector_store %arg7[%c0_98, %c0_99], %380 {strides = array<i32>} : memref<32x128xf32, #tpu.memory_space<vmem>>, vector<32x128xf32>,
    %c0_100 = arith.constant 0 : index
    %c0_101 = arith.constant 0 : index
    %382 = vector.load %arg8[%c0_100, %c0_101] : memref<32x128xf32, #tpu.memory_space<vmem>>, vector<32x128xf32>
    %383 = arith.addf %382, %378 : vector<32x128xf32>
    %c0_102 = arith.constant 0 : index
    %c0_103 = arith.constant 0 : index
    %384 = vector.load %arg8[%c0_102, %c0_103] : memref<32x128xf32, #tpu.memory_space<vmem>>, vector<32x128xf32>
    tpu.vector_store %arg8[%c0_102, %c0_103], %383 {strides = array<i32>} : memref<32x128xf32, #tpu.memory_space<vmem>>, vector<32x128xf32>,
    %c0_i32_104 = arith.constant 0 : i32
    %385 = arith.cmpi eq, %arg1, %c0_i32_104 : i32
    %386 = arith.extui %385 : i1 to i32
    %c0_i32_105 = arith.constant 0 : i32
    %387 = arith.cmpi ne, %386, %c0_i32_105 : i32
    scf.if %387 {
      %c0_106 = arith.constant 0 : index
      %c0_107 = arith.constant 0 : index
      %388 = vector.load %arg7[%c0_106, %c0_107] : memref<32x128xf32, #tpu.memory_space<vmem>>, vector<32x128xf32>
      %389 = vector.shape_cast %388 : vector<32x128xf32> to vector<1x32x128xf32>
      %cst_108 = arith.constant dense<0.000000e+00> : vector<1xf32>
      %390 = vector.multi_reduction <add>, %389, %cst_108 [1, 2] : vector<1x32x128xf32> to vector<1xf32>
      %391 = vector.shape_cast %390 : vector<1xf32> to vector<1x1x1xf32>
      %392 = vector.extract %391[0, 0, 0] : f32 from vector<1x1x1xf32>
      %cst_109 = arith.constant 0.000000e+00 : f32
      %393 = vector.broadcast %cst_109 : f32 to vector<8x128xf32>
      %394 = vector.broadcast %392 : f32 to vector<8x128xf32>
      %395 = arith.addf %394, %393 : vector<8x128xf32>
      %c0_110 = arith.constant 0 : index
      %c0_111 = arith.constant 0 : index
      %396 = vector.load %arg5[%c0_110, %c0_111] : memref<8x128xf32, #tpu.memory_space<vmem>>, vector<8x128xf32>
      tpu.vector_store %arg5[%c0_110, %c0_111], %395 {strides = array<i32>} : memref<8x128xf32, #tpu.memory_space<vmem>>, vector<8x128xf32>,
      %c0_112 = arith.constant 0 : index
      %c0_113 = arith.constant 0 : index
      %397 = vector.load %arg8[%c0_112, %c0_113] : memref<32x128xf32, #tpu.memory_space<vmem>>, vector<32x128xf32>
      %398 = vector.shape_cast %397 : vector<32x128xf32> to vector<1x32x128xf32>
      %cst_114 = arith.constant dense<0.000000e+00> : vector<1xf32>
      %399 = vector.multi_reduction <add>, %398, %cst_114 [1, 2] : vector<1x32x128xf32> to vector<1xf32>
      %400 = vector.shape_cast %399 : vector<1xf32> to vector<1x1x1xf32>
      %401 = vector.extract %400[0, 0, 0] : f32 from vector<1x1x1xf32>
      %cst_115 = arith.constant 0.000000e+00 : f32
      %402 = vector.broadcast %cst_115 : f32 to vector<8x128xf32>
      %403 = vector.broadcast %401 : f32 to vector<8x128xf32>
      %404 = arith.addf %403, %402 : vector<8x128xf32>
      %c0_116 = arith.constant 0 : index
      %c0_117 = arith.constant 0 : index
      %405 = vector.load %arg6[%c0_116, %c0_117] : memref<8x128xf32, #tpu.memory_space<vmem>>, vector<8x128xf32>
      tpu.vector_store %arg6[%c0_116, %c0_117], %404 {strides = array<i32>} : memref<8x128xf32, #tpu.memory_space<vmem>>, vector<8x128xf32>,
    } else {
    }
    return
  }
  func.func @transform_0(%arg0: i32, %arg1: i32) -> (i32, i32) {
    %c1_i32 = arith.constant 1 : i32
    %0 = arith.muli %arg0, %c1_i32 : i32
    %1 = arith.addi %0, %arg1 : i32
    %c0_i32 = arith.constant 0 : i32
    %c0_i32_0 = arith.constant 0 : i32
    return %1, %c0_i32 : i32, i32
  }
  func.func @transform_1(%arg0: i32, %arg1: i32) -> (i32, i32) {
    %c1_i32 = arith.constant 1 : i32
    %0 = arith.muli %arg0, %c1_i32 : i32
    %1 = arith.addi %0, %arg1 : i32
    %c0_i32 = arith.constant 0 : i32
    %c0_i32_0 = arith.constant 0 : i32
    return %1, %c0_i32 : i32, i32
  }
  func.func @transform_2(%arg0: i32, %arg1: i32) -> (i32, i32) {
    %c1_i32 = arith.constant 1 : i32
    %0 = arith.muli %arg0, %c1_i32 : i32
    %1 = arith.addi %0, %arg1 : i32
    %c0_i32 = arith.constant 0 : i32
    %c0_i32_0 = arith.constant 0 : i32
    return %1, %c0_i32 : i32, i32
  }
  func.func @transform_3(%arg0: i32, %arg1: i32) -> (i32, i32) {
    %c0_i32 = arith.constant 0 : i32
    %c0_i32_0 = arith.constant 0 : i32
    return %arg0, %c0_i32 : i32, i32
  }
  func.func @transform_4(%arg0: i32, %arg1: i32) -> (i32, i32) {
    %c0_i32 = arith.constant 0 : i32
    %c0_i32_0 = arith.constant 0 : i32
    return %arg0, %c0_i32 : i32, i32
  }
}

</mosaic_0001>

<bundles_post_ra>
// kernel: beta_gamma_sampler_forward.2
= control target key start
LH: loop header
LB: loop body
LE: loop exit
PB: predicated region body
PF: predicated region fallthrough
CT: control target
= control target key end

     0   :  { %10 = vsyncpa [#allocation5], 0  ;;  %s1515_s0 = inlined_call_operand.hbm [shape: f32[16,256], index: 0, kind: input, shape index: {}]   ;;  %s1516_s1 = inlined_call_operand.hbm [shape: f32[16,256], index: 1, kind: input, shape index: {}]   ;;  %s1517_s2 = inlined_call_operand.hbm [shape: f32[16,256], index: 2, kind: input, shape index: {}]   ;;  %s1518_s3 = inlined_call_operand.vmem [shape: f32[16,128], index: 3, kind: output, shape index: {0}]   ;;  %s1519_s4 = inlined_call_operand.vmem [shape: f32[16,128], index: 4, kind: output, shape index: {1}]  }
   0x1   :  { %12 = vsyncpa [#allocation5 + $0x1], 0 }
   0x2   :  { %13 = vsyncpa [#allocation7], 0 }
   0x3   :  { %15 = vsyncpa [#allocation7 + $0x1], 0  ;;  %s1088_s15 = smov 0   ;;  %s1090_s16 = smov 0  }
   0x4   :  { %s1092_s17 = smov 0   ;;  %s1094_s18 = smov 0  }
   0x5   :  { %s1096_s19 = smov 0   ;;  %s1098_s20 = smov 0  }
   0x6 LB: > { %s1521_s21 = sadd.s32 4294967295, %s1058_s20   ;;  %s33_s22 = sadd.s32 1, %s1054_s19  ;;  %s1058_s20 = sphi %s1098_s20, %s21_s20   ;;  %s1054_s19 = sphi %s1096_s19, %s1538_s19   ;;  %s1050_s18 = sphi %s1094_s18, %s1537_s18   ;;  %s1046_s17 = sphi %s1092_s17, %s1536_s17   ;;  %s1042_s16 = sphi %s1090_s16, %s1535_s16   ;;  %s1038_s15 = sphi %s1088_s15, %s1534_s15  }
   0x7   : > { %p35_p0 = scmp.ge.s32.totalorder %s33_s22, 2  ;;  %s42_s23 = sadd.s32 1, %s1046_s17 }
   0x8   : > { %p49_p1 = scmp.ne.s32.totalorder %s1046_s17, %s1042_s16  ;;  %p50_p2 = scmp.eq.s32.totalorder %s1058_s20, 0 }
   0x9   : > { %s1540_s22 = smov (%p35_p0, %s33_s22), 0  ;;  %p55_p4 = scmp.ne.s32.totalorder %s1042_s16, %s1038_s15 }
   0xa   : > { %p51_p3 = por %p50_p2, %p49_p1  ;;  %s39_s24 = ssub.s32 %s1054_s19, %s1540_s22 }
   0xb   : > { %p56_p5 = scmp.eq.s32.totalorder %s1521_s21, 0  ;;  %p40_p6 = scmp.eq.s32.totalorder %s39_s24, 0 }
   0xc   : > { %p805_p8 = scmp.lt.s32.totalorder %s1058_s20, 2  ;;  %s187_s27 = sand.u32 1, %s1046_s17  }
   0xd   : > { %p1129_p7 = por %p56_p5, %p55_p4  ;;  %s1139_s28 = sshll.u32 %s1054_s19, 8 }
   0xe   : > { %s1135_s26 = scalar_select %p40_p6, %s1046_s17, %s42_s23  }
   0xf   : > { %s1524_s25 = scalar_select %p1129_p7, 1, 0 }
  0x10   : > { %s1143_s29 = sshll.u32 %s187_s27, 4  ;;  %p1145_p9 = pnand %p805_p8, %p51_p3 }
  0x11   : > { %s207_s5 = sand.u32 1, %s1058_s20   ;;  %s1154_s8 = scalar_lea.hbm %s1516_s1, %s1139_s28 }
  0x12   : > { %s1525_s30 = scalar_select %p1145_p9, 1, 0 }
  0x13   : > { %s211_s9 = scalar_lea.vmem [#allocation6], %s1143_s29  ;;  %s1160_s11 = scalar_lea.sflag [#allocation7], %s207_s5 }
  0x14   : > { %s220_s10 = sshll.u32 %s211_s9, 4  ;;  %s914_s12 = scalar_lea.hbm %s1154_s8, 256  ;;  %s1157_s10 = int_to_ptr.vmem [resolvable:$true] %s220_s10 }
  0x15   : > { %p915_p11 = scmp.ne.s32.totalorder %s1154_s8, %s914_s12  ;;  %p1166_p12 = pneg %p1145_p9 }
  0x16   : > { %s919_s23 = scalar_lea.hbm %s1516_s1, 512  ;;  %p920_p1 = scmp.lt.u32.totalorder %s1154_s8, %s1516_s1 }
  0x17   : > { %p917_p13 = pnand %p1166_p12, %p915_p11  ;;  %p921_p2 = scmp.lt.u32.totalorder %s919_s23, %s914_s12 }
  0x18   : > { %p923_p4 = scmp.lt.u32.totalorder %s914_s12, %s1154_s8 }
  0x19   : > { %p918_p0 = pneg %p917_p13  ;;  %p922_p3 = por %p921_p2, %p920_p1 }
  0x1b   : > { %p924_p5 = por %p923_p4, %p922_p3 }
  0x1d   : > { %p925_p6 = pnand %p924_p5, %p918_p0 }
  0x1f   : > { %928 = shalt.err (!%p925_p6)
}
  0x20   : > { %s929_s5 = scalar_lea.vmem %s1157_s10, 256  ;;  %s1060_s7 = smov [#allocation6]  }
  0x21   : > { %p930_p8 = scmp.ne.s32.totalorder %s1157_s10, %s929_s5  ;;  %s934_s9 = sshll.u32 %s1060_s7, 4  ;;  %s935_s9 = int_to_ptr.vmem [resolvable:$false] %s934_s9 }
  0x22   : > { %s936_s14 = scalar_lea.vmem %s935_s9, 512  ;;  %p937_p10 = scmp.lt.s32.totalorder %s1157_s10, %s935_s9 }
  0x23   : > { %p932_p11 = pnand %p930_p8, %p1166_p12  ;;  %p938_p7 = scmp.lt.s32.totalorder %s936_s14, %s929_s5 }
  0x25   : > { %p933_p13 = pneg %p932_p11  ;;  %p939_p1 = por %p938_p7, %p937_p10 }
  0x27   : > { %p940_p2 = pnand %p939_p1, %p933_p13 }
  0x29   : > { %943 = shalt.err (!%p940_p2)
}
  0x2a   : > { %801 = dma.hbm_to_vmem [thread:$0]  (!%p1145_p9), %s1154_s8, 256, %s1157_s10, %s1160_s11  }
  0x2b   : > { %p245_p0 = scmp.lt.s32.totalorder %s1058_s20, 3  ;;  %p1527_p3 = scmp.ge.s32.totalorder %s1058_s20, 1 }
  0x2c   : > { %s1201_s24 = scalar_lea.hbm %s1515_s0, %s1139_s28  ;;  %s191_s6 = scalar_lea.vmem [#allocation4], %s1143_s29 }
  0x2d   : > { %p1193_p4 = pnand %p1527_p3, %p245_p0  ;;  %s200_s5 = sshll.u32 %s191_s6, 4  ;;  %s201_s5 = int_to_ptr.vmem [resolvable:$true] %s200_s5 }
  0x2e   : > { %s188_s8 = scalar_lea.sflag [#allocation5], %s187_s27  ;;  %s944_s10 = scalar_lea.hbm %s1201_s24, 256 }
  0x2f   : > { %s1528_s12 = scalar_select %p1193_p4, 1, 0 }
  0x30   : > { %p945_p7 = scmp.ne.s32.totalorder %s1201_s24, %s944_s10  ;;  %s949_s14 = scalar_lea.hbm %s1515_s0, 512 }
  0x31   : > { %p950_p6 = scmp.lt.u32.totalorder %s1201_s24, %s1515_s0  ;;  %p951_p8 = scmp.lt.u32.totalorder %s949_s14, %s944_s10 }
  0x32   : > { %p947_p10 = pnand %p945_p7, %p1166_p12  ;;  %p953_p13 = scmp.lt.u32.totalorder %s944_s10, %s1201_s24 }
  0x33   : > { %p952_p11 = por %p951_p8, %p950_p6 }
  0x34   : > { %p948_p5 = pneg %p947_p10 }
  0x35   : > { %p954_p1 = por %p953_p13, %p952_p11 }
  0x37   : > { %p955_p2 = pnand %p954_p1, %p948_p5 }
  0x39   : > { %958 = shalt.err (!%p955_p2)
}
  0x3a   : > { %s959_s27 = scalar_lea.vmem %s201_s5, 256  ;;  %s1061_s6 = smov [#allocation4]  }
  0x3b   : > { %p960_p0 = scmp.ne.s32.totalorder %s201_s5, %s959_s27  ;;  %s964_s21 = sshll.u32 %s1061_s6, 4  ;;  %s965_s21 = int_to_ptr.vmem [resolvable:$false] %s964_s21 }
  0x3c   : > { %s966_s7 = scalar_lea.vmem %s965_s21, 512  ;;  %p967_p10 = scmp.lt.s32.totalorder %s201_s5, %s965_s21 }
  0x3d   : > { %p962_p3 = pnand %p960_p0, %p1166_p12  ;;  %p968_p4 = scmp.lt.s32.totalorder %s966_s7, %s959_s27 }
  0x3f   : > { %p963_p7 = pneg %p962_p3  ;;  %p969_p9 = por %p968_p4, %p967_p10 }
  0x41   : > { %p970_p6 = pnand %p969_p9, %p963_p7 }
  0x43   : > { %973 = shalt.err (!%p970_p6)
}
  0x44   : > { %p1529_p8 = scmp.ne.s32.totalorder %s1525_s30, 0  ;;  %s1227_s14 = scalar_lea.hbm %s1517_s2, %s1139_s28 }
  0x45   : > { %s231_s21 = scalar_lea.vmem [#allocation8], %s1143_s29  ;;  %s974_s23 = scalar_lea.hbm %s1227_s14, 256 }
  0x46   : > { %798 = dma.hbm_to_vmem [thread:$0]  (!%p1529_p8), %s1201_s24, 256, %s201_s5, %s188_s8  }
  0x47   : > { %s240_s15 = sshll.u32 %s231_s21, 4  ;;  %p975_p9 = scmp.ne.s32.totalorder %s1227_s14, %s974_s23  ;;  %s241_s15 = int_to_ptr.vmem [resolvable:$true] %s240_s15 }
  0x48   : > { %s979_s24 = scalar_lea.hbm %s1517_s2, 512  ;;  %p980_p11 = scmp.lt.u32.totalorder %s1227_s14, %s1517_s2 }
  0x49   : > { %p977_p4 = pnand %p975_p9, %p1166_p12  ;;  %p981_p13 = scmp.lt.u32.totalorder %s979_s24, %s974_s23 }
  0x4a   : > { %p983_p2 = scmp.lt.u32.totalorder %s974_s23, %s1227_s14 }
  0x4b   : > { %p978_p5 = pneg %p977_p4  ;;  %p982_p1 = por %p981_p13, %p980_p11 }
  0x4d   : > { %p984_p0 = por %p983_p2, %p982_p1 }
  0x4f   : > { %p985_p3 = pnand %p984_p0, %p978_p5 }
  0x51   : > { %988 = shalt.err (!%p985_p3)
}
  0x52   : > { %s989_s28 = scalar_lea.vmem %s241_s15, 256  ;;  %s1062_s29 = smov [#allocation8]  }
  0x53   : > { %p990_p7 = scmp.ne.s32.totalorder %s241_s15, %s989_s28  ;;  %s994_s7 = sshll.u32 %s1062_s29, 4  ;;  %s995_s7 = int_to_ptr.vmem [resolvable:$false] %s994_s7 }
  0x54   : > { %s996_s10 = scalar_lea.vmem %s995_s7, 512  ;;  %p997_p9 = scmp.lt.s32.totalorder %s241_s15, %s995_s7 }
  0x55   : > { %p992_p10 = pnand %p990_p7, %p1166_p12  ;;  %p998_p4 = scmp.lt.s32.totalorder %s996_s10, %s989_s28 }
  0x57   : > { %p993_p6 = pneg %p992_p10  ;;  %p999_p8 = por %p998_p4, %p997_p9 }
  0x59   : > { %p1000_p11 = pnand %p999_p8, %p993_p6 }
  0x5b   : > { %1003 = shalt.err (!%p1000_p11)
}
  0x5c   : > { %p1530_p13 = scmp.ne.s32.totalorder %s1525_s30, 0  ;;  %p1531_p5 = scmp.ne.s32.totalorder %s1528_s12, 0 }
  0x5d   : > { %s251_s13 = sand.u32 (!%p1531_p5), 1, %s1042_s16   ;;  %p1532_p12 = scmp.ne.s32.totalorder (!%p1531_p5), %s1524_s25, 0 }
  0x5e   : > { %804 = dma.hbm_to_vmem [thread:$0]  (!%p1530_p13), %s1227_s14, 256, %s241_s15, %s1160_s11  }
  0x5f   : > { %249 = sbr.rel (%p1531_p5) target bundleno = 393 (0x189), region = 32  ;;  %s767_s9 = sshll.u32 (!%p1531_p5), %s251_s13, 4 }
  0x60   : > { %s252_s21 = scalar_lea.sflag (!%p1531_p5), [#allocation5], %s251_s13  ;;  %s255_s23 = scalar_lea.vmem (!%p1531_p5), [#allocation4], %s767_s9 }
  0x66   : > { %1029 = dma.done.wait (%p1532_p12), %s252_s21, 256  }
  0x67   : > { %1031 = vsyncadd (%p1532_p12), %s252_s21, 4294967040  ;;  %s1533_s27 = sadd.s32 4294967295, %s1058_s20   ;;  %s264_s11 = scalar_lea.vmem [#allocation6], %s767_s9 }
  0x68   : > { %s260_s30 = sand.u32 1, %s1533_s27  }
  0x69   : > { %s261_s6 = scalar_lea.sflag [#allocation7], %s260_s30 }
  0x6a   : > { %1033 = dma.done.wait (%p1532_p12), %s261_s6, 512  }
  0x6b   : > { %1035 = vsyncadd (%p1532_p12), %s261_s6, 4294966784  ;;  %v330_v0 = vld [vmem:[%s255_s23] sm:$0xff]  ;;  %v331_v1 = vld [vmem:[%s255_s23 + $0x8] sm:$0xff]  ;;  %s273_s12 = scalar_lea.vmem [#allocation8], %s767_s9  ;;  %p314_p8 = scmp.lt.s32.totalorder %s1050_s18, 1 }
  0x6c   : > { %v336_v2 = vmul.f32 1.442695, %v330_v0  ;;  %v338_v3 = vmul.f32 1.442695, %v331_v1  ;;  %v1261_v4 = vld [vmem:[%s264_s11] sm:$0xff]  ;;  %v1265_v6 = vld [vmem:[%s264_s11 + $0x8] sm:$0xff] }
  0x6d   : > { %v1263_v5 = vld [vmem:[%s273_s12] sm:$0xff]  ;;  %v1267_v7 = vld [vmem:[%s273_s12 + $0x8] sm:$0xff]  ;;  %v546_v8 = vsub.f32 %v330_v0, %v1261_v4  ;;  %v547_v15 = vsub.f32 %v331_v1, %v1265_v6  ;;  %v1339_v45 = vadd.f32 1.2039728, %v1261_v4  ;;  %v1348_v53 = vadd.f32 1.2039728, %v1265_v6 }
  0x6e   : > { %854 = vpow2.f32 %v336_v2  ;;  %v522_v9 = vadd.f32 %v1263_v5, %v1261_v4  ;;  %v523_v10 = vadd.f32 %v1267_v7, %v1265_v6  ;;  %s1542_s18 = smov (!%p314_p8, %s1050_s18), 1 }
  0x6f   : > { %856 = vpow2.f32 %v338_v3  ;;  %v548_v11 = vmul.f32 1.442695, %v546_v8  ;;  %v550_v21 = vmul.f32 1.442695, %v547_v15  ;;  %s770_s25 = sshll.u32 %s1542_s18, 3 }
  0x70   : > { %v524_v12 = vmul.f32 1.442695, %v522_v9  ;;  %v526_v13 = vmul.f32 1.442695, %v523_v10  ;;  %s317_s24 = scalar_lea.vmem %s1518_s3, %s770_s25  ;;  %s321_s29 = scalar_lea.vmem %s1519_s4, %s770_s25 }
  0x71   : > { %858 = vpow2.f32 %v548_v11 }
  0x72   : > { %860 = vpow2.f32 %v524_v12 }
  0x73   : > { %862 = vpow2.f32 %v526_v13 }
  0x78   : > { %v1274_v14 = vpop.eup %854 }
  0x79   : > { %v1277_v16 = vpop.eup %856  ;;  %v362_v17 = vadd.f32 2.0, %v1274_v14  ;;  %v376_v20 = vadd.f32 3.0, %v1274_v14  ;;  %v1285_v23 = vadd.f32 4.0, %v1274_v14  ;;  %v1291_v25 = vadd.f32 5.0, %v1274_v14 }
  0x7a   : > { %v349_v18 = vadd.f32 1.0, %v1277_v16  ;;  %v363_v19 = vadd.f32 2.0, %v1277_v16  ;;  %v377_v22 = vadd.f32 3.0, %v1277_v16  ;;  %v1288_v24 = vadd.f32 4.0, %v1277_v16 }
  0x7b   : > { %864 = vrcp.f32 %v362_v17  ;;  %v1294_v26 = vadd.f32 5.0, %v1277_v16  ;;  %v1297_v27 = vadd.f32 1.0, %v1274_v14  ;;  %v1301_v28 = vadd.f32 6.0, %v1274_v14  ;;  %v1303_v29 = vpop.eup %858 }
  0x7c   : > { %866 = vrcp.f32 %v349_v18  ;;  %v1307_v30 = vadd.f32 6.0, %v1277_v16  ;;  %v1309_v31 = vpop.eup %860  ;;  %v1315_v33 = vadd.f32 8.0, %v1274_v14  ;;  %v361_v35 = vmul.f32 %v1277_v16, %v349_v18 }
  0x7d   : > { %868 = vrcp.f32 %v363_v19  ;;  %v360_v32 = vmul.f32 %v1274_v14, %v1297_v27  ;;  %v1317_v34 = vpop.eup %862  ;;  %v414_v36 = vmul.f32 %v1291_v25, %v1285_v23  ;;  %v1324_v37 = vadd.f32 8.0, %v1277_v16 }
  0x7e   : > { %870 = vrcp.f32 %v376_v20  ;;  %v1328_v39 = vadd.f32 7.0, %v1274_v14  ;;  %v415_v41 = vmul.f32 %v1294_v26, %v1288_v24  ;;  %v1334_v43 = vadd.f32 7.0, %v1277_v16 }
  0x7f   : > { %872 = vpow2.f32 %v550_v21  ;;  %v774_v44 = vadd.f32 -1.0, %v1274_v14  ;;  %v374_v47 = vmul.f32 %v362_v17, %v360_v32  ;;  %v375_v48 = vmul.f32 %v363_v19, %v361_v35 }
  0x80   : > { %874 = vrcp.f32 %v377_v22  ;;  %v428_v49 = vmul.f32 %v1301_v28, %v414_v36  ;;  %v775_v52 = vadd.f32 -1.0, %v1277_v16  ;;  %v429_v56 = vmul.f32 %v1307_v30, %v415_v41 }
  0x81   : > { %876 = vrcp.f32 %v1285_v23  ;;  %v514_v57 = vmul.f32 %v1274_v14, %v1261_v4  ;;  %v518_v61 = vmul.f32 %v774_v44, %v1263_v5  ;;  %v388_v63 = vmul.f32 %v376_v20, %v374_v47 }
  0x82   : > { %878 = vrcp.f32 %v1288_v24  ;;  %v389_v0 = vmul.f32 %v377_v22, %v375_v48  ;;  %v442_v1 = vmul.f32 %v1328_v39, %v428_v49  ;;  %v515_v4 = vmul.f32 %v1277_v16, %v1265_v6 }
  0x83   : > { %880 = vrcp.f32 %v1291_v25  ;;  %v519_v9 = vmul.f32 %v775_v52, %v1267_v7  ;;  %v443_v12 = vmul.f32 %v1334_v43, %v429_v56  ;;  %v772_v5 = vadd.f32 -0.5, %v1315_v33 }
  0x84   : > { %882 = vrcp.f32 %v1294_v26  ;;  %v1366_v13 = vadd.f32 -0.5, %v1324_v37 }
  0x85   : > { %v865_v38 = vpop.eup %864  ;;  %884 = vrcp.f32 %v1301_v28  ;;  %v1380_v36 = vadd.f32 %v519_v9, %v515_v4 }
  0x86   : > { %v867_v40 = vpop.eup %866  ;;  %886 = vrcp.f32 %v1307_v30  ;;  %v366_v51 = vmul.f32 %v865_v38, %v362_v17 }
  0x87   : > { %v869_v42 = vpop.eup %868  ;;  %888 = vrcp.f32 %v1315_v33  ;;  %v353_v55 = vmul.f32 %v867_v40, %v349_v18 }
  0x88   : > { %v871_v46 = vpop.eup %870  ;;  %890 = vrcp.f32 %v1324_v37  ;;  %v367_v59 = vmul.f32 %v869_v42, %v363_v19  ;;  %v368_v3 = vsub.f32 2.0, %v366_v51  ;;  %v1368_v19 = vadd.f32 %v518_v61, %v514_v57 }
  0x89   : > { %v1343_v50 = vpop.eup %872  ;;  %892 = vrcp.f32 %v1328_v39  ;;  %v380_v60 = vmul.f32 %v871_v46, %v376_v20  ;;  %v355_v11 = vsub.f32 2.0, %v353_v55 }
  0x8a   : > { %v875_v54 = vpop.eup %874  ;;  %894 = vlog2.f32 %v1315_v33  ;;  %v369_v17 = vsub.f32 2.0, %v367_v59  ;;  %v1378_v32 = vmul.f32 %v865_v38, %v368_v3 }
  0x8b   : > { %v1354_v58 = vpop.eup %876  ;;  %896 = vrcp.f32 %v1334_v43  ;;  %v381_v8 = vmul.f32 %v875_v54, %v377_v22  ;;  %v382_v18 = vsub.f32 2.0, %v380_v60  ;;  %v1383_v44 = vmul.f32 %v867_v40, %v355_v11 }
  0x8c   : > { %v879_v62 = vpop.eup %878  ;;  %898 = vlog2.f32 %v1324_v37  ;;  %v394_v6 = vmul.f32 %v1354_v58, %v1285_v23 }
  0x8d   : > { %v881_v2 = vpop.eup %880  ;;  %900 = vrcp.f32 %v1297_v27  ;;  %v395_v7 = vmul.f32 %v879_v62, %v1288_v24  ;;  %v383_v35 = vsub.f32 2.0, %v381_v8  ;;  %v1392_v38 = vmul.f32 %v871_v46, %v382_v18 }
  0x8e   : > { %v883_v10 = vpop.eup %882  ;;  %902 = vrcp.f32 %v1274_v14  ;;  %v406_v21 = vmul.f32 %v881_v2, %v1291_v25  ;;  %v1390_v25 = vmul.f32 %v869_v42, %v369_v17  ;;  %v396_v52 = vsub.f32 2.0, %v394_v6 }
  0x8f   : > { %v885_v15 = vpop.eup %884  ;;  %904 = vrcp.f32 %v1277_v16  ;;  %v407_v23 = vmul.f32 %v883_v10, %v1294_v26  ;;  %v397_v55 = vsub.f32 2.0, %v395_v7  ;;  %v1397_v59 = vmul.f32 %v875_v54, %v383_v35 }
  0x90   : > { %v1371_v20 = vpop.eup %886  ;;  %v420_v24 = vmul.f32 %v885_v15, %v1301_v28  ;;  %906 = vlog2.f32 %v388_v63  ;;  %v408_v56 = vsub.f32 2.0, %v406_v21 }
  0x91   : > { %v889_v22 = vpop.eup %888  ;;  %908 = vlog2.f32 %v389_v0  ;;  %v421_v28 = vmul.f32 %v1371_v20, %v1307_v30  ;;  %v409_v60 = vsub.f32 2.0, %v407_v23  ;;  %v1416_v30 = vmul.f32 %v1354_v58, %v396_v52 }
  0x92   : > { %v891_v41 = vpop.eup %890  ;;  %v448_v47 = vmul.f32 %v889_v22, %v1315_v33  ;;  %910 = vlog2.f32 %v442_v1  ;;  %v422_v61 = vsub.f32 2.0, %v420_v24  ;;  %v1418_v8 = vmul.f32 %v879_v62, %v397_v55 }
  0x93   : > { %v1388_v48 = vpop.eup %892  ;;  %v449_v49 = vmul.f32 %v891_v41, %v1324_v37  ;;  %912 = vlog2.f32 %v443_v12  ;;  %v1420_v1 = vmul.f32 %v881_v2, %v408_v56  ;;  %v1434_v18 = vmul.f32 %v883_v10, %v409_v60 }
  0x94   : > { %v895_v51 = vpop.eup %894  ;;  %v450_v40 = vsub.f32 2.0, %v448_v47  ;;  %v1409_v54 = vmul.f32 %v1388_v48, %v1328_v39  ;;  %v423_v39 = vsub.f32 2.0, %v421_v28  ;;  %v1436_v2 = vmul.f32 %v885_v15, %v422_v61 }
  0x95   : > { %v1395_v57 = vpop.eup %896  ;;  %v451_v26 = vsub.f32 2.0, %v449_v49  ;;  %v1405_v3 = vmul.f32 0.6931472, %v895_v51 }
  0x96   : > { %v899_v42 = vpop.eup %898  ;;  %v1401_v46 = vmul.f32 %v889_v22, %v450_v40  ;;  %v1430_v12 = vmul.f32 %v1395_v57, %v1334_v43  ;;  %v436_v35 = vsub.f32 2.0, %v1409_v54  ;;  %v425_v28 = vmul.f32 %v1371_v20, %v423_v39 }
  0x97   : > { %v1403_v63 = vmul.f32 %v891_v41, %v451_v26  ;;  %v901_v4 = vpop.eup %900  ;;  %v1426_v11 = vmul.f32 0.6931472, %v899_v42  ;;  %v462_v7 = vmul.f32 %v772_v5, %v1405_v3 }
  0x98   : > { %v1413_v0 = vmul.f32 %v1401_v46, %v1401_v46  ;;  %v903_v17 = vpop.eup %902  ;;  %v352_v62 = vmul.f32 %v901_v4, %v1297_v27  ;;  %v437_v20 = vsub.f32 2.0, %v1430_v12  ;;  %v496_v39 = vmul.f32 0.5, %v1401_v46 }
  0x99   : > { %v1424_v9 = vmul.f32 %v1403_v63, %v1403_v63  ;;  %v905_v6 = vpop.eup %904  ;;  %v342_v22 = vmul.f32 %v903_v17, %v1274_v14  ;;  %v463_v10 = vmul.f32 %v1366_v13, %v1426_v11  ;;  %v464_v61 = vsub.f32 %v462_v7, %v1315_v33 }
  0x9a   : > { %v468_v58 = vmul.f32 0.0005952381, %v1413_v0  ;;  %v354_v41 = vsub.f32 2.0, %v352_v62  ;;  %v343_v47 = vmul.f32 %v905_v6, %v1277_v16  ;;  %v500_v23 = vmul.f32 0.003968254, %v1413_v0  ;;  %v907_v27 = vpop.eup %906 }
  0x9b   : > { %v469_v21 = vmul.f32 0.0005952381, %v1424_v9  ;;  %v344_v24 = vsub.f32 2.0, %v342_v22  ;;  %v501_v5 = vmul.f32 0.003968254, %v1424_v9  ;;  %v909_v40 = vpop.eup %908  ;;  %v497_v7 = vmul.f32 0.5, %v1403_v63 }
  0x9c   : > { %v470_v43 = vsub.f32 0.0007936508, %v468_v58  ;;  %v356_v51 = vmul.f32 %v901_v4, %v354_v41  ;;  %v345_v52 = vsub.f32 2.0, %v343_v47  ;;  %v502_v55 = vsub.f32 0.008333334, %v500_v23  ;;  %v911_v60 = vpop.eup %910 }
  0x9d   : > { %v471_v15 = vsub.f32 0.0007936508, %v469_v21  ;;  %v346_v26 = vmul.f32 %v903_v17, %v344_v24  ;;  %v503_v42 = vsub.f32 0.008333334, %v501_v5  ;;  %v913_v62 = vpop.eup %912  ;;  %v465_v21 = vsub.f32 %v463_v10, %v1324_v37 }
  0x9e   : > { %v472_v49 = vmul.f32 %v470_v43, %v1413_v0  ;;  %v347_v54 = vmul.f32 %v905_v6, %v345_v52  ;;  %v504_v58 = vmul.f32 %v502_v55, %v1413_v0  ;;  %v466_v37 = vadd.f32 0.9189385, %v464_v61 }
  0x9f   : > { %v473_v56 = vmul.f32 %v471_v15, %v1424_v9  ;;  %v358_v22 = vadd.f32 %v356_v51, %v346_v26  ;;  %v505_v43 = vmul.f32 %v503_v42, %v1424_v9  ;;  %v467_v24 = vadd.f32 0.9189385, %v465_v21 }
  0xa0   : > { %v474_v13 = vsub.f32 0.0027777778, %v472_v49  ;;  %v359_v17 = vadd.f32 %v1383_v44, %v347_v54  ;;  %v506_v47 = vsub.f32 0.083333336, %v504_v58  ;;  %v485_v49 = vmul.f32 0.6931472, %v907_v27 }
  0xa1   : > { %v475_v4 = vsub.f32 0.0027777778, %v473_v56  ;;  %v372_v6 = vadd.f32 %v1378_v32, %v358_v22  ;;  %v507_v15 = vsub.f32 0.083333336, %v505_v43  ;;  %v487_v51 = vmul.f32 0.6931472, %v909_v40 }
  0xa2   : > { %v476_v41 = vmul.f32 %v474_v13, %v1413_v0  ;;  %v373_v10 = vadd.f32 %v1390_v25, %v359_v17  ;;  %v491_v52 = vmul.f32 0.6931472, %v911_v60  ;;  %v498_v26 = vsub.f32 %v1405_v3, %v496_v39 }
  0xa3   : > { %v477_v33 = vmul.f32 %v475_v4, %v1424_v9  ;;  %v386_v44 = vadd.f32 %v1392_v38, %v372_v6  ;;  %v508_v25 = vmul.f32 %v506_v47, %v1413_v0  ;;  %v499_v27 = vsub.f32 %v1426_v11, %v497_v7 }
  0xa4   : > { %v478_v23 = vsub.f32 0.083333336, %v476_v41  ;;  %v387_v55 = vadd.f32 %v1397_v59, %v373_v10  ;;  %v509_v38 = vmul.f32 %v507_v15, %v1424_v9  ;;  %v493_v40 = vmul.f32 0.6931472, %v913_v62 }
  0xa5   : > { %v479_v5 = vsub.f32 0.083333336, %v477_v33  ;;  %v400_v56 = vadd.f32 %v1416_v30, %v386_v44  ;;  %v438_v59 = vmul.f32 %v1388_v48, %v436_v35  ;;  %v528_v30 = vsub.f32 %v1368_v19, %v1309_v31 }
  0xa6   : > { %v480_v12 = vmul.f32 %v478_v23, %v1401_v46  ;;  %v401_v61 = vadd.f32 %v1418_v8, %v387_v55  ;;  %v439_v0 = vmul.f32 %v1395_v57, %v437_v20  ;;  %v529_v8 = vsub.f32 %v1380_v36, %v1317_v34 }
  0xa7   : > { %v481_v32 = vmul.f32 %v479_v5, %v1403_v63  ;;  %v412_v60 = vadd.f32 %v1420_v1, %v400_v56  ;;  %v510_v11 = vsub.f32 %v498_v26, %v508_v25  ;;  %v534_v1 = vmul.f32 0.1, %v1339_v45 }
  0xa8   : > { %v482_v42 = vadd.f32 %v480_v12, %v466_v37  ;;  %v413_v3 = vadd.f32 %v1434_v18, %v401_v61  ;;  %v511_v48 = vsub.f32 %v499_v27, %v509_v38  ;;  %v535_v62 = vmul.f32 0.1, %v1348_v53 }
  0xa9   : > { %v483_v46 = vadd.f32 %v481_v32, %v467_v24  ;;  %v426_v9 = vadd.f32 %v1436_v2, %v412_v60  ;;  %v778_v19 = vadd.f32 -0.1, %v1274_v14  ;;  %v779_v4 = vadd.f32 -0.1, %v1277_v16 }
  0xaa   : > { %v488_v63 = vsub.f32 %v482_v42, %v485_v49  ;;  %v427_v58 = vadd.f32 %v425_v28, %v413_v3  ;;  %v552_v17 = vmul.f32 0.3, %v1303_v29  ;;  %v553_v53 = vmul.f32 0.3, %v1343_v50 }
  0xab   : > { %v489_v13 = vsub.f32 %v483_v46, %v487_v51  ;;  %v440_v31 = vadd.f32 %v438_v59, %v426_v9 }
  0xac   : > { %v494_v54 = vsub.f32 %v488_v63, %v491_v52  ;;  %v441_v21 = vadd.f32 %v439_v0, %v427_v58 }
  0xad   : > { %v495_v35 = vsub.f32 %v489_v13, %v493_v40  ;;  %v512_v2 = vsub.f32 %v510_v11, %v440_v31 }
  0xae   : > { %v530_v18 = vsub.f32 %v528_v30, %v494_v54  ;;  %v536_v57 = vsub.f32 2.2527127, %v494_v54  ;;  %v513_v43 = vsub.f32 %v511_v48, %v441_v21 }
  0xaf   : > { %v531_v34 = vsub.f32 %v529_v8, %v495_v35  ;;  %v537_v36 = vsub.f32 2.2527127, %v495_v35  ;;  %v542_v28 = vmul.f32 %v778_v19, %v512_v2 }
  0xb0   : > { %v538_v22 = vadd.f32 %v536_v57, %v534_v1  ;;  %v543_v20 = vmul.f32 %v779_v4, %v513_v43 }
  0xb1   : > { %v539_v41 = vadd.f32 %v537_v36, %v535_v62  ;;  %v575_v45 = vadd.f32 %v531_v34, %v530_v18 }
  0xb2   : > { %v544_v39 = vadd.f32 %v542_v28, %v538_v22 }
  0xb3   : > { %576 = vadd.xlane.f32.xlu0 %v575_v45  ;;  %v545_v33 = vadd.f32 %v543_v20, %v539_v41 }
  0xb4   : > { %v554_v6 = vadd.f32 %v552_v17, %v544_v39 }
  0xb5   : > { %v555_v7 = vadd.f32 %v553_v53, %v545_v33 }
  0xb6   : > { %v556_v47 = vsub.f32 %v554_v6, %v1274_v14 }
  0xb7   : > { %v557_v37 = vsub.f32 %v555_v7, %v1277_v16 }
  0xb9   : > { %v590_v23 = vadd.f32 %v557_v37, %v556_v47 }
  0xbb   : > { %591 = vadd.xlane.f32.xlu0 %v590_v23 }
 0x140   : > { %v577_v10 = vpop.xlane.xlu0 %576 }
 0x141   : > { %v578_v15 = vrot.slane %v577_v10, 4 }
 0x143   : > { %v579_v24 = vadd.f32 %v578_v15, %v577_v10 }
 0x145   : > { %v580_v29 = vrot.slane %v579_v24, 2 }
 0x147   : > { %v581_v5 = vadd.f32 %v580_v29, %v579_v24 }
 0x148   : > { %v592_v49 = vpop.xlane.xlu0 %591 }
 0x149   : > { %v582_v50 = vrot.slane %v581_v5, 1  ;;  %v593_v44 = vrot.slane %v592_v49, 4 }
 0x14b   : > { %v583_v12 = vadd.f32 %v582_v50, %v581_v5  ;;  %v594_v51 = vadd.f32 %v593_v44, %v592_v49 }
 0x14d   : > { %785 = vpush %v583_v12  ;;  %v595_v52 = vrot.slane %v594_v51, 2 }
 0x14f   : > { %v596_v55 = vadd.f32 %v595_v52, %v594_v51 }
 0x151   : > { %v597_v14 = vrot.slane %v596_v55, 1 }
 0x153   : > { %v598_v32 = vadd.f32 %v597_v14, %v596_v55 }
 0x155   : > { %787 = vpush %v598_v32 }
 0x17e   : > { %s786_s5 = spop %785 }
 0x17f   : > { %v585_v16 = vstv %s786_s5 }
 0x180   : > { %587 = vst [vmem:[%s317_s24] sm:$0xff] %v585_v16 }
 0x186   : > { %s788_s7 = spop %787 }
 0x187   : > { %v600_v56 = vstv %s788_s7 }
 0x188   : > { %602 = vst [vmem:[%s321_s29] sm:$0xff] %v600_v56 }
 0x189 PF: > { %s21_s20 = sadd.s32 1, %s1058_s20   ;;  %s1534_s15 = smov %s1042_s16 }
 0x18a   : > { %p18_p1 = scmp.ge.s32.totalorder %s21_s20, 4   ;;  %s1535_s16 = smov %s1046_s17 }
 0x18b   : > { %s1536_s17 = smov %s1135_s26  ;;  %s1537_s18 = smov %s1054_s19 }
 0x18c   : > { %s1538_s19 = smov %s1540_s22  ;;  %20 = sbr.rel (!%p18_p1) target bundleno = 6 (0x6), region = 116 }
 0x193   :  { %636 = vsyncpa [#allocation5], 1 }
 0x194   :  { %638 = vsyncpa [#allocation5 + $0x1], 1 }
 0x195   :  { %639 = vsyncpa [#allocation7], 1 }
 0x196   :  { %641 = vsyncpa [#allocation7 + $0x1], 1 }

// kernel: beta_gamma_sampler_forward.3
= control target key start
LH: loop header
LB: loop body
LE: loop exit
PB: predicated region body
PF: predicated region fallthrough
CT: control target
= control target key end

     0   :  { %10 = vsyncpa [#allocation5], 0  ;;  %s3686_s0 = inlined_call_operand.vmem [shape: f32[64,128], index: 0, kind: input, shape index: {}]   ;;  %s3687_s1 = inlined_call_operand.hbm [shape: f32[64,128], index: 1, kind: input, shape index: {}]   ;;  %s3688_s2 = inlined_call_operand.vmem [shape: f32[64,128], index: 2, kind: input, shape index: {}]   ;;  %s3689_s3 = inlined_call_operand.vmem [shape: f32[16,128], index: 3, kind: output, shape index: {0}]   ;;  %s3690_s4 = inlined_call_operand.vmem [shape: f32[16,128], index: 4, kind: output, shape index: {1}]  }
   0x1   :  { %12 = vsyncpa [#allocation5 + $0x1], 0  ;;  %s2221_s15 = smov 0   ;;  %s2223_s16 = smov 0  }
   0x2   :  { %s2225_s17 = smov 0   ;;  %s2227_s18 = smov 0  }
   0x3   :  { %s2229_s19 = smov 0   ;;  %s2231_s20 = smov 0  }
   0x4 LB: > { %s1692_s21 = sadd.s32 4294967295, %s2191_s20   ;;  %s30_s22 = sadd.s32 1, %s2187_s19  ;;  %s2191_s20 = sphi %s2231_s20, %s18_s20   ;;  %s2187_s19 = sphi %s2229_s19, %s4329_s19   ;;  %s2183_s18 = sphi %s2227_s18, %s4328_s18   ;;  %s2179_s17 = sphi %s2225_s17, %s4327_s17   ;;  %s2175_s16 = sphi %s2223_s16, %s4326_s16   ;;  %s2171_s15 = sphi %s2221_s15, %s4325_s15  }
   0x5   : > { %p32_p0 = scmp.ge.s32.totalorder %s30_s22, 2  ;;  %s67_s23 = sadd.s32 1, %s2179_s17 }
   0x6   : > { %p74_p1 = scmp.ne.s32.totalorder %s2179_s17, %s2175_s16  ;;  %p75_p2 = scmp.eq.s32.totalorder %s2191_s20, 0 }
   0x7   : > { %s4331_s22 = smov (%p32_p0, %s30_s22), 0  ;;  %p80_p4 = scmp.ne.s32.totalorder %s2175_s16, %s2171_s15 }
   0x8   : > { %p2257_p3 = por %p75_p2, %p74_p1  ;;  %s64_s25 = ssub.s32 %s2187_s19, %s4331_s22 }
   0x9   : > { %p81_p5 = scmp.eq.s32.totalorder %s1692_s21, 0  ;;  %p65_p6 = scmp.eq.s32.totalorder %s64_s25, 0 }
   0xa   : > { %p1740_p8 = scmp.lt.s32.totalorder %s2191_s20, 2  ;;  %s195_s28 = sand.u32 1, %s2179_s17  }
   0xb   : > { %p2264_p7 = por %p81_p5, %p80_p4  ;;  %s1729_s29 = sshll.u32 %s2187_s19, 9 }
   0xc   : > { %s2270_s27 = scalar_select %p65_p6, %s2179_s17, %s67_s23  }
   0xd   : > { %s1696_s30 = sshll.u32 %s195_s28, 5  ;;  %s2277_s7 = scalar_lea.hbm %s3687_s1, %s1729_s29 }
   0xe   : > { %s199_s8 = scalar_lea.vmem [#allocation4], %s1696_s30  ;;  %p2281_p9 = pnand %p1740_p8, %p2257_p3 }
   0xf   : > { %s207_s9 = sshll.u32 %s199_s8, 4  ;;  %s2287_s11 = scalar_lea.sflag [#allocation5], %s195_s28  ;;  %s2285_s9 = int_to_ptr.vmem [resolvable:$true] %s207_s9 }
  0x10   : > { %s2111_s12 = scalar_lea.hbm %s2277_s7, 512  ;;  %p2113_p11 = pneg %p2281_p9 }
  0x11   : > { %p2112_p10 = scmp.ne.s32.totalorder %s2277_s7, %s2111_s12  ;;  %s2116_s15 = scalar_lea.hbm %s3687_s1, 1024 }
  0x12   : > { %p2117_p0 = scmp.lt.u32.totalorder %s2277_s7, %s3687_s1  ;;  %p2118_p1 = scmp.lt.u32.totalorder %s2116_s15, %s2111_s12 }
  0x13   : > { %p2114_p12 = pnand %p2113_p11, %p2112_p10  ;;  %p2120_p3 = scmp.lt.u32.totalorder %s2111_s12, %s2277_s7 }
  0x14   : > { %p2119_p2 = por %p2118_p1, %p2117_p0 }
  0x15   : > { %p2115_p13 = pneg %p2114_p12 }
  0x16   : > { %p2121_p4 = por %p2120_p3, %p2119_p2 }
  0x18   : > { %p2122_p5 = pnand %p2121_p4, %p2115_p13 }
  0x1a   : > { %2125 = shalt.err (!%p2122_p5)
}
  0x1b   : > { %s2126_s24 = scalar_lea.vmem %s2285_s9, 512  ;;  %s2193_s25 = smov [#allocation4]  }
  0x1c   : > { %p2127_p6 = scmp.ne.s32.totalorder %s2285_s9, %s2126_s24  ;;  %s2131_s28 = sshll.u32 %s2193_s25, 4  ;;  %s2132_s28 = int_to_ptr.vmem [resolvable:$false] %s2131_s28 }
  0x1d   : > { %s2133_s29 = scalar_lea.vmem %s2132_s28, 1024  ;;  %p2134_p12 = scmp.lt.s32.totalorder %s2285_s9, %s2132_s28 }
  0x1e   : > { %p2129_p8 = pnand %p2127_p6, %p2113_p11  ;;  %p2135_p0 = scmp.lt.s32.totalorder %s2133_s29, %s2126_s24 }
  0x20   : > { %p2130_p10 = pneg %p2129_p8  ;;  %p2136_p1 = por %p2135_p0, %p2134_p12 }
  0x22   : > { %p2137_p2 = pnand %p2136_p1, %p2130_p10 }
  0x24   : > { %2140 = shalt.err (!%p2137_p2)
}
  0x25   : > { %s2194_s30 = smov 128   ;;  %s2195_s5 = smov 8  }
  0x26   : > { %1739 = dma.hbm_to_vmem [thread:$0]  (!%p2281_p9), %s2277_s7, 512, %s2285_s9, %s2287_s11, %s2194_s30, %s2194_s30, %s2195_s5  }
  0x27   : > { %p1699_p11 = scmp.ge.s32.totalorder %s2191_s20, 1  ;;  %p226_p13 = scmp.lt.s32.totalorder %s2191_s20, 3 }
  0x29   : > { %p227_p3 = pnand %p1699_p11, %p226_p13 }
  0x2b   : > { %230 = sbr.rel (%p227_p3) target bundleno = 575 (0x23f), region = 32 }
  0x32   : > { %s232_s6 = sand.u32 1, %s2175_s16  }
  0x33   : > { %s1700_s8 = sshll.u32 %s232_s6, 5  ;;  %s233_s12 = scalar_lea.sflag [#allocation5], %s232_s6 }
  0x34   : > { %s236_s13 = scalar_lea.vmem [#allocation4], %s1700_s8 }
  0x35   : > { %2166 = dma.done.wait (%p2264_p7), %s233_s12, 512  }
  0x36   : > { %2168 = vsyncadd (%p2264_p7), %s233_s12, 4294966784  ;;  %s1701_s14 = sshll.u32 %s2183_s18, 2  ;;  %v326_v6 = vld [vmem:[%s236_s13] sm:$0xff]  ;;  %v327_v8 = vld [vmem:[%s236_s13 + $0x8] sm:$0xff]  ;;  %p294_p7 = scmp.lt.s32.totalorder %s2183_s18, 1 }
  0x37   : > { %p278_p4 = scmp.lt.s32.totalorder %s1701_s14, 7  ;;  %v328_v11 = vld [vmem:[%s236_s13 + $0x10] sm:$0xff]  ;;  %v329_v14 = vld [vmem:[%s236_s13 + $0x18] sm:$0xff]  ;;  %v330_v15 = vmul.f32 1.442695, %v326_v6 }
  0x38   : > { %v332_v17 = vmul.f32 1.442695, %v327_v8  ;;  %v334_v19 = vmul.f32 1.442695, %v328_v11  ;;  %v336_v21 = vmul.f32 1.442695, %v329_v14 }
  0x39   : > { %s4333_s14 = smov (!%p278_p4, %s1701_s14), 7  ;;  %s4335_s18 = smov (!%p294_p7, %s2183_s18), 1 }
  0x3a   : > { %s1702_s7 = sshll.u32 %s4333_s14, 3  ;;  %s1705_s26 = sshll.u32 %s4335_s18, 3 }
  0x3b   : > { %s281_s11 = scalar_lea.vmem %s3686_s0, %s1702_s7  ;;  %s291_s23 = scalar_lea.vmem %s3688_s2, %s1702_s7 }
  0x3c   : > { %v314_v0 = vld [vmem:[%s281_s11] sm:$0xff]  ;;  %v315_v1 = vld [vmem:[%s281_s11 + $0x8] sm:$0xff]  ;;  %v316_v2 = vld [vmem:[%s281_s11 + $0x10] sm:$0xff]  ;;  %s297_s28 = scalar_lea.vmem %s3689_s3, %s1705_s26  ;;  %s301_s6 = scalar_lea.vmem %s3690_s4, %s1705_s26 }
  0x3d   : > { %v317_v3 = vld [vmem:[%s281_s11 + $0x18] sm:$0xff]  ;;  %v318_v4 = vmul.f32 1.442695, %v314_v0  ;;  %v320_v5 = vmul.f32 1.442695, %v315_v1  ;;  %v2329_v9 = vld [vmem:[%s291_s23] sm:$0xff] }
  0x3e   : > { %v322_v7 = vmul.f32 1.442695, %v316_v2  ;;  %v324_v10 = vmul.f32 1.442695, %v317_v3  ;;  %v2331_v12 = vld [vmem:[%s291_s23 + $0x8] sm:$0xff]  ;;  %v2333_v13 = vld [vmem:[%s291_s23 + $0x10] sm:$0xff] }
  0x3f   : > { %1791 = vpow2.f32 %v318_v4  ;;  %v1398_v16 = vand.u32 2147483647, %v2329_v9  ;;  %v1399_v18 = vand.u32 2147483647, %v2331_v12  ;;  %v1400_v20 = vand.u32 2147483647, %v2333_v13 }
  0x40   : > { %1793 = vpow2.f32 %v320_v5  ;;  %v2338_v22 = vld [vmem:[%s291_s23 + $0x18] sm:$0xff] }
  0x41   : > { %1795 = vpow2.f32 %v322_v7  ;;  %v1402_v23 = vsub.f32 0.0, %v1398_v16  ;;  %v1403_v24 = vsub.f32 0.0, %v1399_v18  ;;  %v1401_v25 = vand.u32 2147483647, %v2338_v22 }
  0x42   : > { %1797 = vpow2.f32 %v324_v10  ;;  %v1404_v26 = vsub.f32 0.0, %v1400_v20 }
  0x43   : > { %1799 = vpow2.f32 %v330_v15  ;;  %v1406_v27 = vmul.f32 1.442695, %v1402_v23  ;;  %v1408_v29 = vmul.f32 1.442695, %v1403_v24  ;;  %v1405_v32 = vsub.f32 0.0, %v1401_v25 }
  0x44   : > { %1801 = vpow2.f32 %v332_v17  ;;  %v1410_v33 = vmul.f32 1.442695, %v1404_v26 }
  0x45   : > { %1803 = vpow2.f32 %v334_v19  ;;  %v2367_v42 = vmul.f32 1.442695, %v1405_v32 }
  0x46   : > { %1805 = vpow2.f32 %v336_v21 }
  0x47   : > { %1807 = vpow2.f32 %v1406_v27  ;;  %3972 = vst [vmem:[#allocation12_spill] sm:$0xff] %v2367_v42 }
  0x48   : > { %1809 = vpow2.f32 %v1408_v29 }
  0x49   : > { %v2341_v28 = vpop.eup %1791  ;;  %1811 = vpow2.f32 %v1410_v33 }
  0x4a   : > { %v2343_v30 = vpop.eup %1793  ;;  %v2346_v31 = vadd.f32 1.0, %v2341_v28  ;;  %v2365_v41 = vadd.f32 2.0, %v2341_v28  ;;  %v2380_v47 = vadd.f32 3.0, %v2341_v28  ;;  %v2389_v51 = vadd.f32 4.0, %v2341_v28 }
  0x4b   : > { %v2349_v34 = vadd.f32 1.0, %v2343_v30  ;;  %v2351_v35 = vpop.eup %1795  ;;  %v2377_v46 = vadd.f32 2.0, %v2343_v30  ;;  %v2386_v50 = vadd.f32 3.0, %v2343_v30  ;;  %v2392_v52 = vadd.f32 4.0, %v2343_v30 }
  0x4c   : > { %3967 = vst [vmem:[#allocation7_spill] sm:$0xff] %v2346_v31  ;;  %v382_v36 = vmul.f32 %v2341_v28, %v2346_v31  ;;  %v2355_v37 = vpop.eup %1797  ;;  %v2358_v38 = vadd.f32 1.0, %v2351_v35  ;;  %3971 = vst [vmem:[#allocation11_spill] sm:$0xff] %v2365_v41  ;;  %v2399_v55 = vadd.f32 2.0, %v2351_v35  ;;  %v2403_v57 = vadd.f32 3.0, %v2351_v35 }
  0x4d   : > { %3968 = vst [vmem:[#allocation8_spill] sm:$0xff] %v2349_v34  ;;  %v383_v39 = vmul.f32 %v2343_v30, %v2349_v34  ;;  %v2362_v40 = vpop.eup %1799  ;;  %v2372_v44 = vadd.f32 1.0, %v2355_v37  ;;  %3975 = vst [vmem:[#allocation15_spill] sm:$0xff] %v2377_v46  ;;  %v2410_v59 = vadd.f32 2.0, %v2355_v37  ;;  %v2413_v60 = vadd.f32 3.0, %v2355_v37 }
  0x4e   : > { %3969 = vst [vmem:[#allocation9_spill] sm:$0xff] %v2358_v38  ;;  %3970 = vst [vmem:[#allocation10_spill] sm:$0xff] %v2362_v40  ;;  %v2369_v43 = vpop.eup %1801  ;;  %v384_v45 = vmul.f32 %v2351_v35, %v2358_v38  ;;  %v410_v49 = vmul.f32 %v2365_v41, %v382_v36  ;;  %v2407_v58 = vadd.f32 %v2362_v40, %v2341_v28  ;;  %v2416_v61 = vadd.f32 4.0, %v2351_v35 }
  0x4f   : > { %3973 = vst [vmem:[#allocation13_spill] sm:$0xff] %v2369_v43  ;;  %3974 = vst [vmem:[#allocation14_spill] sm:$0xff] %v2372_v44  ;;  %v2382_v48 = vpop.eup %1803  ;;  %v385_v54 = vmul.f32 %v2355_v37, %v2372_v44  ;;  %v411_v56 = vmul.f32 %v2377_v46, %v383_v39  ;;  %v2420_v62 = vadd.f32 %v2369_v43, %v2343_v30  ;;  %v2428_v1 = vadd.f32 4.0, %v2355_v37 }
  0x50   : > { %3976 = vst [vmem:[#allocation16_spill] sm:$0xff] %v2380_v47  ;;  %3977 = vst [vmem:[#allocation17_spill] sm:$0xff] %v2382_v48  ;;  %v2394_v53 = vpop.eup %1805  ;;  %v2424_v63 = vadd.f32 %v2382_v48, %v2351_v35  ;;  %v412_v0 = vmul.f32 %v2399_v55, %v384_v45  ;;  %v2435_v3 = vmul.f32 %v2380_v47, %v410_v49  ;;  %v2438_v4 = vadd.f32 5.0, %v2341_v28 }
  0x51   : > { %3978 = vst [vmem:[#allocation18_spill] sm:$0xff] %v2386_v50  ;;  %3979 = vst [vmem:[#allocation19_spill] sm:$0xff] %v2389_v51  ;;  %v2432_v2 = vadd.f32 %v2394_v53, %v2355_v37  ;;  %v2441_v5 = vadd.f32 5.0, %v2343_v30  ;;  %v413_v6 = vmul.f32 %v2410_v59, %v385_v54  ;;  %v2445_v7 = vmul.f32 %v2386_v50, %v411_v56  ;;  %v2453_v11 = vpop.eup %1807 }
  0x52   : > { %3980 = vst [vmem:[#allocation20_spill] sm:$0xff] %v2392_v52  ;;  %3981 = vst [vmem:[#allocation21_spill] sm:$0xff] %v2394_v53  ;;  %v2448_v8 = vadd.f32 5.0, %v2351_v35  ;;  %v2451_v10 = vadd.f32 5.0, %v2355_v37  ;;  %v490_v14 = vmul.f32 %v2438_v4, %v2389_v51  ;;  %v2460_v16 = vadd.f32 8.0, %v2341_v28  ;;  %v2465_v18 = vpop.eup %1809 }
  0x53   : > { %3982 = vst [vmem:[#allocation22_spill] sm:$0xff] %v2399_v55  ;;  %3983 = vst [vmem:[#allocation23_spill] sm:$0xff] %v2403_v57  ;;  %v491_v15 = vmul.f32 %v2441_v5, %v2392_v52  ;;  %v2463_v17 = vadd.f32 8.0, %v2343_v30  ;;  %v2468_v19 = vmul.f32 %v2403_v57, %v412_v0  ;;  %v2473_v21 = vadd.f32 8.0, %v2351_v35  ;;  %v2478_v24 = vpop.eup %1811 }
  0x54   : > { %3984 = vst [vmem:[#allocation24_spill] sm:$0xff] %v2407_v58  ;;  %3985 = vst [vmem:[#allocation25_spill] sm:$0xff] %v2410_v59  ;;  %v492_v20 = vmul.f32 %v2448_v8, %v2416_v61  ;;  %v2476_v23 = vadd.f32 8.0, %v2355_v37  ;;  %v493_v25 = vmul.f32 %v2451_v10, %v2428_v1  ;;  %v2483_v26 = vadd.f32 6.0, %v2341_v28 }
  0x55   : > { %3986 = vst [vmem:[#allocation26_spill] sm:$0xff] %v2413_v60  ;;  %3987 = vst [vmem:[#allocation27_spill] sm:$0xff] %v2416_v61  ;;  %v2486_v27 = vadd.f32 6.0, %v2343_v30  ;;  %1813 = vrcp.f32 %v2460_v16  ;;  %v2490_v29 = vmul.f32 %v2413_v60, %v413_v6  ;;  %v2493_v32 = vadd.f32 6.0, %v2351_v35 }
  0x56   : > { %3988 = vst [vmem:[#allocation28_spill] sm:$0xff] %v2420_v62  ;;  %3989 = vst [vmem:[#allocation29_spill] sm:$0xff] %v2424_v63  ;;  %v2496_v33 = vadd.f32 6.0, %v2355_v37  ;;  %1815 = vrcp.f32 %v2463_v17  ;;  %v518_v36 = vmul.f32 %v2483_v26, %v490_v14  ;;  %v2502_v45 = vadd.f32 7.0, %v2341_v28 }
  0x57   : > { %3990 = vst [vmem:[#allocation30_spill] sm:$0xff] %v2428_v1  ;;  %3991 = vst [vmem:[#allocation31_spill] sm:$0xff] %v2432_v2  ;;  %v519_v39 = vmul.f32 %v2486_v27, %v491_v15  ;;  %1817 = vrcp.f32 %v2473_v21  ;;  %v520_v49 = vmul.f32 %v2493_v32, %v492_v20  ;;  %v2507_v54 = vadd.f32 7.0, %v2343_v30 }
  0x58   : > { %3992 = vst [vmem:[#allocation32_spill] sm:$0xff] %v2438_v4  ;;  %3993 = vst [vmem:[#allocation33_spill] sm:$0xff] %v2441_v5  ;;  %1819 = vrcp.f32 %v2476_v23  ;;  %v2511_v56 = vadd.f32 1.0, %v2362_v40  ;;  %v521_v0 = vmul.f32 %v2496_v33, %v493_v25  ;;  %v2515_v6 = vadd.f32 7.0, %v2351_v35 }
  0x59   : > { %3994 = vst [vmem:[#allocation34_spill] sm:$0xff] %v2448_v8  ;;  %3995 = vst [vmem:[#allocation35_spill] sm:$0xff] %v2451_v10  ;;  %1821 = vlog2.f32 %v2460_v16  ;;  %v2519_v14 = vadd.f32 1.0, %v2369_v43  ;;  %v2522_v15 = vadd.f32 7.0, %v2355_v37  ;;  %v2526_v20 = vadd.f32 1.0, %v2382_v48 }
  0x5a   : > { %3996 = vst [vmem:[#allocation36_spill] sm:$0xff] %v2483_v26  ;;  %3997 = vst [vmem:[#allocation37_spill] sm:$0xff] %v2486_v27  ;;  %1823 = vlog2.f32 %v2463_v17  ;;  %v546_v25 = vmul.f32 %v2502_v45, %v518_v36  ;;  %v547_v26 = vmul.f32 %v2507_v54, %v519_v39  ;;  %v2542_v8 = vadd.f32 2.0, %v2362_v40 }
  0x5b   : > { %3998 = vst [vmem:[#allocation38_spill] sm:$0xff] %v2493_v32  ;;  %3999 = vst [vmem:[#allocation39_spill] sm:$0xff] %v2496_v33  ;;  %v730_v32 = vmul.f32 %v2362_v40, %v2511_v56  ;;  %1825 = vlog2.f32 %v2473_v21  ;;  %v2533_v33 = vadd.f32 1.0, %v2394_v53  ;;  %v731_v27 = vmul.f32 %v2369_v43, %v2519_v14 }
  0x5c   : > { %4000 = vst [vmem:[#allocation40_spill] sm:$0xff] %v2502_v45  ;;  %4001 = vst [vmem:[#allocation41_spill] sm:$0xff] %v2507_v54  ;;  %1827 = vlog2.f32 %v2476_v23  ;;  %v732_v10 = vmul.f32 %v2382_v48, %v2526_v20  ;;  %v548_v36 = vmul.f32 %v2515_v6, %v520_v49  ;;  %v1707_v39 = vadd.f32 -0.5, %v2460_v16 }
  0x5d   : > { %4002 = vst [vmem:[#allocation42_spill] sm:$0xff] %v2511_v56  ;;  %4003 = vst [vmem:[#allocation43_spill] sm:$0xff] %v2515_v6  ;;  %v2546_v56 = vmul.f32 %v2522_v15, %v521_v0  ;;  %v733_v45 = vmul.f32 %v2394_v53, %v2533_v33  ;;  %v2555_v54 = vadd.f32 -0.5, %v2463_v17  ;;  %v758_v5 = vmul.f32 %v2542_v8, %v730_v32 }
  0x5e   : > { %4004 = vst [vmem:[#allocation44_spill] sm:$0xff] %v2519_v14  ;;  %4005 = vst [vmem:[#allocation45_spill] sm:$0xff] %v2522_v15  ;;  %v2551_v14 = vadd.f32 2.0, %v2369_v43  ;;  %v1709_v0 = vadd.f32 -0.5, %v2473_v21  ;;  %v2563_v15 = vadd.f32 -0.5, %v2476_v23  ;;  %v2572_v52 = vadd.f32 3.0, %v2362_v40 }
  0x5f   : > { %4006 = vst [vmem:[#allocation46_spill] sm:$0xff] %v2526_v20  ;;  %4007 = vst [vmem:[#allocation47_spill] sm:$0xff] %v2533_v33  ;;  %v2558_v20 = vadd.f32 2.0, %v2382_v48  ;;  %v1814_v49 = vpop.eup %1813  ;;  %v2566_v33 = vadd.f32 2.0, %v2394_v53  ;;  %v2575_v32 = vadd.f32 3.0, %v2369_v43  ;;  %v2580_v57 = vadd.f32 3.0, %v2382_v48 }
  0x60   : > { %4008 = vst [vmem:[#allocation48_spill] sm:$0xff] %v2542_v8  ;;  %4009 = vst [vmem:[#allocation49_spill] sm:$0xff] %v2551_v14  ;;  %v759_v6 = vmul.f32 %v2551_v14, %v731_v27  ;;  %v1816_v4 = vpop.eup %1815  ;;  %v558_v1 = vmul.f32 %v1814_v49, %v2460_v16  ;;  %v2583_v27 = vadd.f32 3.0, %v2394_v53  ;;  %1829 = vlog2.f32 %v2435_v3 }
  0x61   : > { %4010 = vst [vmem:[#allocation50_spill] sm:$0xff] %v2558_v20  ;;  %4011 = vst [vmem:[#allocation51_spill] sm:$0xff] %v2566_v33  ;;  %v760_v61 = vmul.f32 %v2558_v20, %v732_v10  ;;  %v1818_v8 = vpop.eup %1817  ;;  %v559_v51 = vmul.f32 %v1816_v4, %v2463_v17  ;;  %v761_v60 = vmul.f32 %v2566_v33, %v733_v45  ;;  %v2595_v33 = vadd.f32 4.0, %v2362_v40 }
  0x62   : > { %4012 = vst [vmem:[#allocation52_spill] sm:$0xff] %v2572_v52  ;;  %4013 = vst [vmem:[#allocation53_spill] sm:$0xff] %v2575_v32  ;;  %v1820_v14 = vpop.eup %1819  ;;  %v560_v10 = vmul.f32 %v1818_v8, %v2473_v21  ;;  %v562_v20 = vsub.f32 2.0, %v558_v1  ;;  %v2588_v50 = vmul.f32 %v2572_v52, %v758_v5  ;;  %v2592_v45 = vmul.f32 %v2575_v32, %v759_v6 }
  0x63   : > { %4014 = vst [vmem:[#allocation54_spill] sm:$0xff] %v2580_v57  ;;  %4015 = vst [vmem:[#allocation55_spill] sm:$0xff] %v2583_v27  ;;  %v1822_v47 = vpop.eup %1821  ;;  %v561_v59 = vmul.f32 %v1820_v14, %v2476_v23  ;;  %v563_v55 = vsub.f32 2.0, %v559_v51  ;;  %1831 = vlog2.f32 %v2445_v7  ;;  %v2601_v1 = vmul.f32 %v2580_v57, %v760_v61 }
  0x64   : > { %4016 = vst [vmem:[#allocation56_spill] sm:$0xff] %v2595_v33  ;;  %v1824_v46 = vpop.eup %1823  ;;  %v564_v41 = vsub.f32 2.0, %v560_v10  ;;  %v2597_v44 = vmul.f32 %v1814_v49, %v562_v20  ;;  %1833 = vlog2.f32 %v2468_v19  ;;  %v2607_v51 = vmul.f32 %v2583_v27, %v761_v60 }
  0x65   : > { %v1826_v3 = vpop.eup %1825  ;;  %v565_v5 = vsub.f32 2.0, %v561_v59  ;;  %v2603_v52 = vmul.f32 %v1816_v4, %v563_v55  ;;  %1835 = vlog2.f32 %v2490_v29  ;;  %v2617_v61 = vadd.f32 4.0, %v2369_v43 }
  0x66   : > { %4017 = vst [vmem:[#allocation57_spill] sm:$0xff] %v2597_v44  ;;  %v1828_v6 = vpop.eup %1827  ;;  %v2609_v32 = vmul.f32 %v1818_v8, %v564_v41  ;;  %v2613_v20 = vmul.f32 %v2597_v44, %v2597_v44  ;;  %v2625_v60 = vmul.f32 0.6931472, %v1822_v47  ;;  %1837 = vlog2.f32 %v546_v25 }
  0x67   : > { %4018 = vst [vmem:[#allocation58_spill] sm:$0xff] %v2603_v52  ;;  %4021 = vst [vmem:[#allocation61_spill] sm:$0xff] %v2617_v61  ;;  %v2619_v59 = vmul.f32 %v1820_v14, %v565_v5  ;;  %v2623_v55 = vmul.f32 %v2603_v52, %v2603_v52  ;;  %v2631_v4 = vmul.f32 0.6931472, %v1824_v46  ;;  %v2633_v7 = vmul.f32 0.6931472, %v1826_v3 }
  0x68   : > { %4019 = vst [vmem:[#allocation59_spill] sm:$0xff] %v2609_v32  ;;  %4020 = vst [vmem:[#allocation60_spill] sm:$0xff] %v2613_v20  ;;  %v2629_v41 = vmul.f32 %v2609_v32, %v2609_v32  ;;  %v598_v8 = vmul.f32 0.0005952381, %v2613_v20  ;;  %v2640_v29 = vmul.f32 0.6931472, %v1828_v6  ;;  %1839 = vlog2.f32 %v547_v26 }
  0x69   : > { %4022 = vst [vmem:[#allocation62_spill] sm:$0xff] %v2619_v59  ;;  %4023 = vst [vmem:[#allocation63_spill] sm:$0xff] %v2623_v55  ;;  %v2638_v19 = vmul.f32 %v2619_v59, %v2619_v59  ;;  %v599_v47 = vmul.f32 0.0005952381, %v2623_v55  ;;  %1841 = vlog2.f32 %v548_v36  ;;  %v2645_v46 = vadd.f32 4.0, %v2382_v48 }
  0x6a   : > { %4024 = vst [vmem:[#allocation64_spill] sm:$0xff] %v2625_v60  ;;  %4025 = vst [vmem:[#allocation65_spill] sm:$0xff] %v2629_v41  ;;  %v600_v14 = vmul.f32 0.0005952381, %v2629_v41  ;;  %v602_v25 = vsub.f32 0.0007936508, %v598_v8  ;;  %v586_v49 = vmul.f32 %v1707_v39, %v2625_v60  ;;  %1843 = vlog2.f32 %v2546_v56  ;;  %v1830_v5 = vpop.eup %1829 }
  0x6b   : > { %4026 = vst [vmem:[#allocation66_spill] sm:$0xff] %v2631_v4  ;;  %4027 = vst [vmem:[#allocation67_spill] sm:$0xff] %v2633_v7  ;;  %v601_v10 = vmul.f32 0.0005952381, %v2638_v19  ;;  %v603_v3 = vsub.f32 0.0007936508, %v599_v47  ;;  %v587_v6 = vmul.f32 %v2555_v54, %v2631_v4  ;;  %v588_v26 = vmul.f32 %v1709_v0, %v2633_v7 }
  0x6c   : > { %4028 = vst [vmem:[#allocation68_spill] sm:$0xff] %v2638_v19  ;;  %4029 = vst [vmem:[#allocation69_spill] sm:$0xff] %v2640_v29  ;;  %v604_v27 = vsub.f32 0.0007936508, %v600_v14  ;;  %v606_v8 = vmul.f32 %v602_v25, %v2613_v20  ;;  %v589_v36 = vmul.f32 %v2563_v15, %v2640_v29  ;;  %v2658_v60 = vadd.f32 4.0, %v2394_v53 }
  0x6d   : > { %4030 = vst [vmem:[#allocation70_spill] sm:$0xff] %v2645_v46  ;;  %v605_v57 = vsub.f32 0.0007936508, %v601_v10  ;;  %v607_v39 = vmul.f32 %v603_v3, %v2623_v55  ;;  %v1832_v47 = vpop.eup %1831  ;;  %v2662_v54 = vadd.f32 5.0, %v2362_v40  ;;  %v2665_v0 = vadd.f32 5.0, %v2369_v43 }
  0x6e   : > { %4031 = vst [vmem:[#allocation71_spill] sm:$0xff] %v2658_v60  ;;  %v608_v56 = vmul.f32 %v604_v27, %v2629_v41  ;;  %v610_v38 = vsub.f32 0.0027777778, %v606_v8  ;;  %v1834_v14 = vpop.eup %1833  ;;  %v590_v25 = vsub.f32 %v586_v49, %v2460_v16  ;;  %v2670_v3 = vadd.f32 5.0, %v2382_v48 }
  0x6f   : > { %4032 = vst [vmem:[#allocation72_spill] sm:$0xff] %v2662_v54  ;;  %4033 = vst [vmem:[#allocation73_spill] sm:$0xff] %v2665_v0  ;;  %v609_v15 = vmul.f32 %v605_v57, %v2638_v19  ;;  %v611_v10 = vsub.f32 0.0027777778, %v607_v39  ;;  %v1836_v29 = vpop.eup %1835  ;;  %v591_v7 = vsub.f32 %v587_v6, %v2463_v17  ;;  %v592_v27 = vsub.f32 %v588_v26, %v2473_v21 }
  0x70   : > { %4034 = vst [vmem:[#allocation74_spill] sm:$0xff] %v2670_v3  ;;  %v612_v8 = vsub.f32 0.0027777778, %v608_v56  ;;  %v614_v4 = vmul.f32 %v610_v38, %v2613_v20  ;;  %v1838_v34 = vpop.eup %1837  ;;  %v593_v31 = vsub.f32 %v589_v36, %v2476_v23  ;;  %v2678_v57 = vadd.f32 5.0, %v2394_v53 }
  0x71   : > { %v613_v42 = vsub.f32 0.0027777778, %v609_v15  ;;  %v615_v16 = vmul.f32 %v611_v10, %v2623_v55  ;;  %v838_v17 = vmul.f32 %v2662_v54, %v2595_v33  ;;  %v839_v21 = vmul.f32 %v2665_v0, %v2617_v61 }
  0x72   : > { %4035 = vst [vmem:[#allocation75_spill] sm:$0xff] %v2678_v57  ;;  %v616_v49 = vmul.f32 %v612_v8, %v2629_v41  ;;  %v618_v39 = vsub.f32 0.083333336, %v614_v4  ;;  %v1840_v6 = vpop.eup %1839  ;;  %v594_v38 = vadd.f32 0.9189385, %v590_v25  ;;  %v840_v36 = vmul.f32 %v2670_v3, %v2645_v46 }
  0x73   : > { %v617_v26 = vmul.f32 %v613_v42, %v2638_v19  ;;  %v619_v23 = vsub.f32 0.083333336, %v615_v16  ;;  %v1842_v56 = vpop.eup %1841  ;;  %v595_v15 = vadd.f32 0.9189385, %v591_v7  ;;  %v596_v10 = vadd.f32 0.9189385, %v592_v27 }
  0x74   : > { %v620_v55 = vsub.f32 0.083333336, %v616_v49  ;;  %v841_v4 = vmul.f32 %v2678_v57, %v2658_v60  ;;  %v1844_v8 = vpop.eup %1843  ;;  %v597_v54 = vadd.f32 0.9189385, %v593_v31  ;;  %v622_v0 = vmul.f32 %v618_v39, %v2597_v44 }
  0x75   : > { %v621_v33 = vsub.f32 0.083333336, %v617_v26  ;;  %v631_v61 = vmul.f32 0.6931472, %v1830_v5  ;;  %v623_v25 = vmul.f32 %v619_v23, %v2603_v52  ;;  %v633_v42 = vmul.f32 0.6931472, %v1832_v47 }
  0x76   : > { %v635_v16 = vmul.f32 0.6931472, %v1834_v14  ;;  %v637_v19 = vmul.f32 0.6931472, %v1836_v29  ;;  %v624_v3 = vmul.f32 %v620_v55, %v2609_v32  ;;  %v643_v46 = vmul.f32 0.6931472, %v1838_v34 }
  0x77   : > { %v645_v7 = vmul.f32 0.6931472, %v1840_v6  ;;  %v647_v27 = vmul.f32 0.6931472, %v1842_v56  ;;  %v649_v49 = vmul.f32 0.6931472, %v1844_v8  ;;  %v625_v5 = vmul.f32 %v621_v33, %v2619_v59 }
  0x78   : > { %v2694_v41 = vadd.f32 6.0, %v2362_v40  ;;  %v2697_v31 = vadd.f32 6.0, %v2369_v43  ;;  %v2700_v39 = vadd.f32 6.0, %v2382_v48  ;;  %v626_v47 = vadd.f32 %v622_v0, %v594_v38 }
  0x79   : > { %v2704_v29 = vadd.f32 8.0, %v2362_v40  ;;  %v2707_v34 = vadd.f32 8.0, %v2369_v43  ;;  %v627_v55 = vadd.f32 %v623_v25, %v595_v15  ;;  %v2710_v14 = vadd.f32 6.0, %v2394_v53 }
  0x7a   : > { %4036 = vst [vmem:[#allocation76_spill] sm:$0xff] %v2694_v41  ;;  %4037 = vst [vmem:[#allocation77_spill] sm:$0xff] %v2697_v31  ;;  %v2713_v6 = vadd.f32 8.0, %v2382_v48  ;;  %v2716_v26 = vadd.f32 8.0, %v2394_v53  ;;  %v628_v23 = vadd.f32 %v624_v3, %v596_v10  ;;  %v866_v33 = vmul.f32 %v2694_v41, %v838_v17 }
  0x7b   : > { %4038 = vst [vmem:[#allocation78_spill] sm:$0xff] %v2700_v39  ;;  %4039 = vst [vmem:[#allocation79_spill] sm:$0xff] %v2710_v14  ;;  %v867_v0 = vmul.f32 %v2697_v31, %v839_v21  ;;  %1845 = vrcp.f32 %v2704_v29  ;;  %v868_v38 = vmul.f32 %v2700_v39, %v840_v36  ;;  %v869_v56 = vmul.f32 %v2710_v14, %v841_v4 }
  0x7c   : > { %v2724_v15 = vadd.f32 7.0, %v2362_v40  ;;  %1847 = vrcp.f32 %v2707_v34  ;;  %v629_v8 = vadd.f32 %v625_v5, %v597_v54  ;;  %v638_v25 = vsub.f32 %v626_v47, %v631_v61 }
  0x7d   : > { %v2728_v57 = vadd.f32 7.0, %v2369_v43  ;;  %1849 = vrcp.f32 %v2713_v6  ;;  %v639_v3 = vsub.f32 %v627_v55, %v633_v42  ;;  %v2732_v17 = vadd.f32 7.0, %v2382_v48 }
  0x7e   : > { %4040 = vst [vmem:[#allocation80_spill] sm:$0xff] %v2724_v15  ;;  %v2735_v21 = vadd.f32 7.0, %v2394_v53  ;;  %1851 = vrcp.f32 %v2716_v26  ;;  %v640_v36 = vsub.f32 %v628_v23, %v635_v16  ;;  %v2739_v10 = vmul.f32 %v2724_v15, %v866_v33 }
  0x7f   : > { %4041 = vst [vmem:[#allocation81_spill] sm:$0xff] %v2728_v57  ;;  %4042 = vst [vmem:[#allocation82_spill] sm:$0xff] %v2732_v17  ;;  %v2742_v61 = vmul.f32 %v2728_v57, %v867_v0  ;;  %1853 = vlog2.f32 %v2704_v29  ;;  %v2746_v54 = vmul.f32 %v2732_v17, %v868_v38  ;;  %v2753_v42 = vadd.f32 1.0, %v2407_v58 }
  0x80   : > { %4043 = vst [vmem:[#allocation83_spill] sm:$0xff] %v2735_v21  ;;  %v2749_v4 = vmul.f32 %v2735_v21, %v869_v56  ;;  %1855 = vlog2.f32 %v2707_v34  ;;  %v641_v16 = vsub.f32 %v629_v8, %v637_v19  ;;  %v2755_v5 = vsub.f32 %v638_v25, %v643_v46 }
  0x81   : > { %4044 = vst [vmem:[#allocation84_spill] sm:$0xff] %v2753_v42  ;;  %1857 = vlog2.f32 %v2713_v6  ;;  %v2759_v47 = vadd.f32 1.0, %v2420_v62  ;;  %v2761_v55 = vsub.f32 %v639_v3, %v645_v7  ;;  %v2765_v23 = vadd.f32 1.0, %v2424_v63 }
  0x82   : > { %4045 = vst [vmem:[#allocation85_spill] sm:$0xff] %v2755_v5  ;;  %1859 = vlog2.f32 %v2716_v26  ;;  %v1078_v33 = vmul.f32 %v2753_v42, %v2407_v58  ;;  %v2769_v0 = vsub.f32 %v640_v36, %v647_v27  ;;  %v1711_v19 = vadd.f32 -0.5, %v2704_v29 }
  0x83   : > { %4046 = vst [vmem:[#allocation86_spill] sm:$0xff] %v2759_v47  ;;  %4047 = vst [vmem:[#allocation87_spill] sm:$0xff] %v2761_v55  ;;  %v2773_v46 = vadd.f32 1.0, %v2432_v2  ;;  %v1079_v38 = vmul.f32 %v2759_v47, %v2420_v62  ;;  %v1712_v7 = vadd.f32 -0.5, %v2707_v34  ;;  %v1713_v56 = vadd.f32 -0.5, %v2713_v6 }
  0x84   : > { %4048 = vst [vmem:[#allocation88_spill] sm:$0xff] %v2765_v23  ;;  %4049 = vst [vmem:[#allocation89_spill] sm:$0xff] %v2769_v0  ;;  %v1080_v8 = vmul.f32 %v2765_v23, %v2424_v63  ;;  %v2782_v25 = vadd.f32 2.0, %v2407_v58  ;;  %v2784_v3 = vsub.f32 %v641_v16, %v649_v49  ;;  %v1714_v36 = vadd.f32 -0.5, %v2716_v26 }
  0x85   : > { %4050 = vst [vmem:[#allocation90_spill] sm:$0xff] %v2773_v46  ;;  %v1846_v27 = vpop.eup %1845  ;;  %v1081_v42 = vmul.f32 %v2773_v46, %v2432_v2  ;;  %v2790_v47 = vadd.f32 2.0, %v2420_v62  ;;  %v2794_v57 = vadd.f32 2.0, %v2424_v63  ;;  %v2797_v23 = vadd.f32 2.0, %v2432_v2 }
  0x86   : > { %4051 = vst [vmem:[#allocation91_spill] sm:$0xff] %v2782_v25  ;;  %4052 = vst [vmem:[#allocation92_spill] sm:$0xff] %v2784_v3  ;;  %v1848_v21 = vpop.eup %1847  ;;  %v906_v17 = vmul.f32 %v1846_v27, %v2704_v29  ;;  %v2800_v49 = vmul.f32 %v2782_v25, %v1078_v33  ;;  %v2807_v14 = vadd.f32 3.0, %v2407_v58  ;;  %v2810_v39 = vadd.f32 3.0, %v2420_v62 }
  0x87   : > { %4053 = vst [vmem:[#allocation93_spill] sm:$0xff] %v2790_v47  ;;  %4054 = vst [vmem:[#allocation94_spill] sm:$0xff] %v2794_v57  ;;  %v1850_v16 = vpop.eup %1849  ;;  %v907_v15 = vmul.f32 %v1848_v21, %v2707_v34  ;;  %v2804_v46 = vmul.f32 %v2790_v47, %v1079_v38  ;;  %1861 = vlog2.f32 %v2588_v50  ;;  %v2815_v33 = vmul.f32 %v2794_v57, %v1080_v8 }
  0x88   : > { %4055 = vst [vmem:[#allocation95_spill] sm:$0xff] %v2797_v23  ;;  %4056 = vst [vmem:[#allocation96_spill] sm:$0xff] %v2807_v14  ;;  %v1852_v31 = vpop.eup %1851  ;;  %v908_v41 = vmul.f32 %v1850_v16, %v2713_v6  ;;  %v910_v60 = vsub.f32 2.0, %v906_v17  ;;  %v2819_v47 = vmul.f32 %v2797_v23, %v1081_v42  ;;  %v2822_v59 = vadd.f32 3.0, %v2424_v63 }
  0x89   : > { %4057 = vst [vmem:[#allocation97_spill] sm:$0xff] %v2810_v39  ;;  %v1854_v25 = vpop.eup %1853  ;;  %v909_v20 = vmul.f32 %v1852_v31, %v2716_v26  ;;  %v911_v38 = vsub.f32 2.0, %v907_v15  ;;  %1863 = vlog2.f32 %v2592_v45  ;;  %v2828_v50 = vadd.f32 3.0, %v2432_v2 }
  0x8a   : > { %4058 = vst [vmem:[#allocation98_spill] sm:$0xff] %v2822_v59  ;;  %v1856_v32 = vpop.eup %1855  ;;  %v912_v52 = vsub.f32 2.0, %v908_v41  ;;  %v2824_v44 = vmul.f32 %v1846_v27, %v910_v60  ;;  %1865 = vlog2.f32 %v2601_v1  ;;  %v2834_v15 = vadd.f32 4.0, %v2407_v58 }
  0x8b   : > { %4060 = vst [vmem:[#allocation100_spill] sm:$0xff] %v2828_v50  ;;  %v1858_v17 = vpop.eup %1857  ;;  %v913_v8 = vsub.f32 2.0, %v909_v20  ;;  %v2830_v57 = vmul.f32 %v1848_v21, %v911_v38  ;;  %v2842_v45 = vmul.f32 0.6931472, %v1854_v25  ;;  %v2844_v41 = vmul.f32 0.6931472, %v1856_v32 }
  0x8c   : > { %4059 = vst [vmem:[#allocation99_spill] sm:$0xff] %v2824_v44  ;;  %4062 = vst [vmem:[#allocation102_spill] sm:$0xff] %v2834_v15  ;;  %v1860_v42 = vpop.eup %1859  ;;  %v2836_v23 = vmul.f32 %v1850_v16, %v912_v52  ;;  %v2840_v60 = vmul.f32 %v2824_v44, %v2824_v44  ;;  %v2852_v1 = vmul.f32 0.6931472, %v1858_v17  ;;  %v2855_v21 = vadd.f32 4.0, %v2420_v62 }
  0x8d   : > { %4061 = vst [vmem:[#allocation101_spill] sm:$0xff] %v2830_v57  ;;  %4065 = vst [vmem:[#allocation105_spill] sm:$0xff] %v2842_v45  ;;  %v2846_v27 = vmul.f32 %v1852_v31, %v913_v8  ;;  %v2850_v20 = vmul.f32 %v2830_v57, %v2830_v57  ;;  %v2861_v16 = vmul.f32 0.6931472, %v1860_v42  ;;  %1867 = vlog2.f32 %v2607_v51 }
  0x8e   : > { %4063 = vst [vmem:[#allocation103_spill] sm:$0xff] %v2836_v23  ;;  %4064 = vst [vmem:[#allocation104_spill] sm:$0xff] %v2840_v60  ;;  %v2859_v52 = vmul.f32 %v2836_v23, %v2836_v23  ;;  %v946_v32 = vmul.f32 0.0005952381, %v2840_v60  ;;  %1869 = vlog2.f32 %v2739_v10  ;;  %v2872_v38 = vadd.f32 4.0, %v2424_v63 }
  0x8f   : > { %4066 = vst [vmem:[#allocation106_spill] sm:$0xff] %v2844_v41  ;;  %4067 = vst [vmem:[#allocation107_spill] sm:$0xff] %v2846_v27  ;;  %v2867_v31 = vmul.f32 %v2846_v27, %v2846_v27  ;;  %v947_v25 = vmul.f32 0.0005952381, %v2850_v20  ;;  %v934_v17 = vmul.f32 %v1711_v19, %v2842_v45  ;;  %v935_v8 = vmul.f32 %v1712_v7, %v2844_v41 }
  0x90   : > { %4068 = vst [vmem:[#allocation108_spill] sm:$0xff] %v2850_v20  ;;  %4069 = vst [vmem:[#allocation109_spill] sm:$0xff] %v2852_v1  ;;  %v948_v42 = vmul.f32 0.0005952381, %v2859_v52  ;;  %v950_v3 = vsub.f32 0.0007936508, %v946_v32  ;;  %v936_v51 = vmul.f32 %v1713_v56, %v2852_v1  ;;  %1871 = vlog2.f32 %v2742_v61 }
  0x91   : > { %4070 = vst [vmem:[#allocation110_spill] sm:$0xff] %v2855_v21  ;;  %4071 = vst [vmem:[#allocation111_spill] sm:$0xff] %v2859_v52  ;;  %v949_v0 = vmul.f32 0.0005952381, %v2867_v31  ;;  %v951_v55 = vsub.f32 0.0007936508, %v947_v25  ;;  %v1862_v5 = vpop.eup %1861  ;;  %v937_v10 = vmul.f32 %v1714_v36, %v2861_v16  ;;  %1873 = vlog2.f32 %v2746_v54 }
  0x92   : > { %4072 = vst [vmem:[#allocation112_spill] sm:$0xff] %v2861_v16  ;;  %4073 = vst [vmem:[#allocation113_spill] sm:$0xff] %v2867_v31  ;;  %v952_v53 = vsub.f32 0.0007936508, %v948_v42  ;;  %v954_v48 = vmul.f32 %v950_v3, %v2840_v60  ;;  %v2885_v32 = vadd.f32 4.0, %v2432_v2  ;;  %v2888_v56 = vadd.f32 5.0, %v2407_v58 }
  0x93   : > { %4074 = vst [vmem:[#allocation114_spill] sm:$0xff] %v2872_v38  ;;  %v953_v19 = vsub.f32 0.0007936508, %v949_v0  ;;  %v955_v7 = vmul.f32 %v951_v55, %v2850_v20  ;;  %v1864_v25 = vpop.eup %1863  ;;  %v938_v61 = vsub.f32 %v934_v17, %v2704_v29  ;;  %v939_v1 = vsub.f32 %v935_v8, %v2707_v34 }
  0x94   : > { %4075 = vst [vmem:[#allocation115_spill] sm:$0xff] %v2885_v32  ;;  %4076 = vst [vmem:[#allocation116_spill] sm:$0xff] %v2888_v56  ;;  %v956_v36 = vmul.f32 %v952_v53, %v2859_v52  ;;  %v958_v42 = vsub.f32 0.0027777778, %v954_v48  ;;  %v1866_v3 = vpop.eup %1865  ;;  %v940_v54 = vsub.f32 %v936_v51, %v2713_v6  ;;  %v2896_v16 = vadd.f32 5.0, %v2420_v62 }
  0x95   : > { %v957_v0 = vmul.f32 %v953_v19, %v2867_v31  ;;  %v959_v55 = vsub.f32 0.0027777778, %v955_v7  ;;  %v941_v41 = vsub.f32 %v937_v10, %v2716_v26  ;;  %v2901_v29 = vadd.f32 5.0, %v2424_v63 }
  0x96   : > { %4077 = vst [vmem:[#allocation117_spill] sm:$0xff] %v2896_v16  ;;  %v960_v45 = vsub.f32 0.0027777778, %v956_v36  ;;  %v962_v43 = vmul.f32 %v958_v42, %v2840_v60  ;;  %1875 = vlog2.f32 %v2749_v4  ;;  %v2906_v53 = vadd.f32 5.0, %v2432_v2 }
  0x97   : > { %4078 = vst [vmem:[#allocation118_spill] sm:$0xff] %v2901_v29  ;;  %v961_v34 = vsub.f32 0.0027777778, %v957_v0  ;;  %v963_v48 = vmul.f32 %v959_v55, %v2850_v20  ;;  %v1868_v6 = vpop.eup %1867  ;;  %v942_v17 = vadd.f32 0.9189385, %v938_v61  ;;  %v1186_v4 = vmul.f32 %v2888_v56, %v2834_v15 }
  0x98   : > { %4079 = vst [vmem:[#allocation119_spill] sm:$0xff] %v2906_v53  ;;  %v943_v8 = vadd.f32 0.9189385, %v939_v1  ;;  %v964_v51 = vmul.f32 %v960_v45, %v2859_v52  ;;  %v966_v26 = vsub.f32 0.083333336, %v962_v43  ;;  %v1870_v10 = vpop.eup %1869  ;;  %v1187_v55 = vmul.f32 %v2896_v16, %v2855_v21 }
  0x99   : > { %v944_v19 = vadd.f32 0.9189385, %v940_v54  ;;  %v965_v7 = vmul.f32 %v961_v34, %v2867_v31  ;;  %v967_v36 = vsub.f32 0.083333336, %v963_v48  ;;  %v979_v42 = vmul.f32 0.6931472, %v1862_v5 }
  0x9a   : > { %v945_v0 = vadd.f32 0.9189385, %v941_v41  ;;  %v968_v60 = vsub.f32 0.083333336, %v964_v51  ;;  %v1872_v20 = vpop.eup %1871  ;;  %v970_v1 = vmul.f32 %v966_v26, %v2824_v44  ;;  %v1188_v43 = vmul.f32 %v2901_v29, %v2872_v38 }
  0x9b   : > { %v969_v61 = vsub.f32 0.083333336, %v965_v7  ;;  %v2918_v45 = vadd.f32 6.0, %v2407_v58  ;;  %v1874_v54 = vpop.eup %1873  ;;  %v971_v5 = vmul.f32 %v967_v36, %v2830_v57  ;;  %v2923_v34 = vadd.f32 6.0, %v2420_v62 }
  0x9c   : > { %v972_v41 = vmul.f32 %v968_v60, %v2836_v23  ;;  %v2926_v48 = vadd.f32 6.0, %v2424_v63  ;;  %v981_v26 = vmul.f32 0.6931472, %v1864_v25  ;;  %v1189_v7 = vmul.f32 %v2906_v53, %v2885_v32 }
  0x9d   : > { %4080 = vst [vmem:[#allocation120_spill] sm:$0xff] %v2918_v45  ;;  %4081 = vst [vmem:[#allocation121_spill] sm:$0xff] %v2923_v34  ;;  %v973_v51 = vmul.f32 %v969_v61, %v2846_v27  ;;  %v2932_v29 = vadd.f32 6.0, %v2432_v2  ;;  %v983_v16 = vmul.f32 0.6931472, %v1866_v3  ;;  %v1134_v60 = vmul.f32 %v2807_v14, %v2800_v49 }
  0x9e   : > { %4082 = vst [vmem:[#allocation122_spill] sm:$0xff] %v2926_v48  ;;  %v985_v56 = vmul.f32 0.6931472, %v1868_v6  ;;  %v991_v36 = vmul.f32 0.6931472, %v1870_v10  ;;  %v974_v38 = vadd.f32 %v970_v1, %v942_v17  ;;  %v1214_v31 = vmul.f32 %v2918_v45, %v1186_v4 }
  0x9f   : > { %4083 = vst [vmem:[#allocation123_spill] sm:$0xff] %v2932_v29  ;;  %v993_v21 = vmul.f32 0.6931472, %v1872_v20  ;;  %v995_v15 = vmul.f32 0.6931472, %v1874_v54  ;;  %v975_v52 = vadd.f32 %v971_v5, %v943_v8  ;;  %v976_v61 = vadd.f32 %v972_v41, %v944_v19 }
  0xa0   : > { %v1215_v25 = vmul.f32 %v2923_v34, %v1187_v55  ;;  %v1216_v53 = vmul.f32 %v2926_v48, %v1188_v43  ;;  %v1876_v32 = vpop.eup %1875  ;;  %v977_v27 = vadd.f32 %v973_v51, %v945_v0  ;;  %v1217_v3 = vmul.f32 %v2932_v29, %v1189_v7 }
  0xa1   : > { %v2941_v6 = vadd.f32 8.0, %v2407_v58  ;;  %v2944_v49 = vadd.f32 8.0, %v2420_v62  ;;  %v2947_v20 = vadd.f32 7.0, %v2407_v58  ;;  %v2950_v17 = vadd.f32 8.0, %v2424_v63 }
  0xa2   : > { %v2953_v8 = vadd.f32 8.0, %v2432_v2  ;;  %1877 = vlog2.f32 %v1134_v60  ;;  %v986_v10 = vsub.f32 %v974_v38, %v979_v42  ;;  %v2956_v19 = vadd.f32 7.0, %v2420_v62 }
  0xa3   : > { %4084 = vst [vmem:[#allocation124_spill] sm:$0xff] %v2947_v20  ;;  %v2959_v0 = vadd.f32 7.0, %v2424_v63  ;;  %1879 = vrcp.f32 %v2941_v6  ;;  %v987_v4 = vsub.f32 %v975_v52, %v981_v26  ;;  %v988_v55 = vsub.f32 %v976_v61, %v983_v16 }
  0xa4   : > { %4085 = vst [vmem:[#allocation125_spill] sm:$0xff] %v2956_v19  ;;  %v2963_v1 = vadd.f32 7.0, %v2432_v2  ;;  %1881 = vrcp.f32 %v2944_v49  ;;  %v989_v43 = vsub.f32 %v977_v27, %v985_v56  ;;  %v997_v54 = vmul.f32 0.6931472, %v1876_v32 }
  0xa5   : > { %4086 = vst [vmem:[#allocation126_spill] sm:$0xff] %v2959_v0  ;;  %v1135_v38 = vmul.f32 %v2810_v39, %v2804_v46  ;;  %1883 = vrcp.f32 %v2950_v17  ;;  %v1136_v42 = vmul.f32 %v2822_v59, %v2815_v33  ;;  %v1137_v5 = vmul.f32 %v2828_v50, %v2819_v47  ;;  %v4094_v50 = vld [vmem:[#allocation12_spill] sm:$0xff] }
  0xa6   : > { %4087 = vst [vmem:[#allocation127_spill] sm:$0xff] %v2963_v1  ;;  %v1242_v52 = vmul.f32 %v2947_v20, %v1214_v31  ;;  %1885 = vrcp.f32 %v2953_v8  ;;  %v2975_v16 = vsub.f32 %v986_v10, %v991_v36  ;;  %v2978_v27 = vmul.f32 %v2956_v19, %v1215_v25 }
  0xa7   : > { %v2981_v32 = vmul.f32 %v2959_v0, %v1216_v53  ;;  %1887 = vlog2.f32 %v2941_v6  ;;  %v2984_v46 = vsub.f32 %v987_v4, %v993_v21  ;;  %v2986_v33 = vsub.f32 %v988_v55, %v995_v15 }
  0xa8   : > { %v2989_v47 = vmul.f32 %v2963_v1, %v1217_v3  ;;  %1889 = vlog2.f32 %v2944_v49  ;;  %v2992_v31 = vsub.f32 %v989_v43, %v997_v54  ;;  %v1715_v56 = vadd.f32 -0.5, %v2941_v6 }
  0xa9   : > { %1891 = vlog2.f32 %v2950_v17  ;;  %v1716_v53 = vadd.f32 -0.5, %v2944_v49  ;;  %v1717_v21 = vadd.f32 -0.5, %v2950_v17  ;;  %v1434_v15 = vsub.f32 0.0, %v2329_v9 }
  0xaa   : > { %1893 = vlog2.f32 %v2953_v8  ;;  %v1435_v41 = vsub.f32 0.0, %v2331_v12  ;;  %v1718_v51 = vadd.f32 -0.5, %v2953_v8  ;;  %v1414_v26 = vadd.f32 1.0, %v2453_v11 }
  0xab   : > { %v1436_v7 = vsub.f32 0.0, %v2333_v13  ;;  %v1437_v36 = vsub.f32 0.0, %v2338_v22  ;;  %v3008_v61 = vadd.f32 1.0, %v2465_v18  ;;  %v3011_v25 = vadd.f32 1.0, %v2478_v24 }
  0xac   : > { %v3005_v60 = vpop.eup %1877  ;;  %v3018_v43 = vadd.f32 -1.0, %v2341_v28  ;;  %v3021_v54 = vadd.f32 -1.0, %v2343_v30  ;;  %1895 = vlog2.f32 %v1135_v38  ;;  %v3024_v24 = vmin.f32 %v1434_v15, 0.0 }
  0xad   : > { %v1880_v4 = vpop.eup %1879  ;;  %v3026_v3 = vmin.f32 %v1435_v41, 0.0  ;;  %1897 = vlog2.f32 %v1136_v42  ;;  %v3029_v55 = vmin.f32 %v1436_v7, 0.0  ;;  %v3031_v11 = vmin.f32 %v1437_v36, 0.0 }
  0xae   : > { %4088 = vst [vmem:[#allocation128_spill] sm:$0xff] %v3018_v43  ;;  %4089 = vst [vmem:[#allocation129_spill] sm:$0xff] %v3021_v54  ;;  %v1882_v18 = vpop.eup %1881  ;;  %v1254_v1 = vmul.f32 %v1880_v4, %v2941_v6  ;;  %1899 = vlog2.f32 %v1137_v5  ;;  %v3035_v48 = vadd.f32 -1.0, %v2351_v35  ;;  %v3039_v34 = vadd.f32 -1.0, %v2355_v37 }
  0xaf   : > { %v1884_v10 = vpop.eup %1883  ;;  %v1255_v0 = vmul.f32 %v1882_v18, %v2944_v49  ;;  %1901 = vlog2.f32 %v1242_v52 }
  0xb0   : > { %v1886_v19 = vpop.eup %1885  ;;  %v1256_v20 = vmul.f32 %v1884_v10, %v2950_v17  ;;  %v1258_v29 = vsub.f32 2.0, %v1254_v1  ;;  %4090 = vst [vmem:[#allocation130_spill] sm:$0xff] %v3035_v48  ;;  %4091 = vst [vmem:[#allocation131_spill] sm:$0xff] %v3039_v34  ;;  %1903 = vpow2.f32 %v4094_v50 }
  0xb1   : > { %v1888_v38 = vpop.eup %1887  ;;  %v1257_v15 = vmul.f32 %v1886_v19, %v2953_v8  ;;  %v1259_v41 = vsub.f32 2.0, %v1255_v0  ;;  %1905 = vlog2.f32 %v1414_v26 }
  0xb2   : > { %v1890_v42 = vpop.eup %1889  ;;  %v1260_v7 = vsub.f32 2.0, %v1256_v20  ;;  %v3041_v36 = vmul.f32 %v1880_v4, %v1258_v29  ;;  %v3043_v45 = vmul.f32 0.6931472, %v1888_v38  ;;  %1907 = vlog2.f32 %v2978_v27 }
  0xb3   : > { %v1892_v1 = vpop.eup %1891  ;;  %v1261_v5 = vsub.f32 2.0, %v1257_v15  ;;  %v3046_v59 = vmul.f32 %v1882_v18, %v1259_v41  ;;  %v3048_v39 = vmul.f32 0.6931472, %v1890_v42  ;;  %1909 = vlog2.f32 %v2981_v32 }
  0xb4   : > { %4092 = vst [vmem:[#allocation132_spill] sm:$0xff] %v3041_v36  ;;  %4093 = vst [vmem:[#allocation133_spill] sm:$0xff] %v3043_v45  ;;  %v1894_v0 = vpop.eup %1893  ;;  %v3050_v52 = vmul.f32 %v1884_v10, %v1260_v7  ;;  %v3054_v14 = vmul.f32 %v3041_v36, %v3041_v36  ;;  %v3056_v29 = vmul.f32 0.6931472, %v1892_v1  ;;  %v1282_v20 = vmul.f32 %v1715_v56, %v3043_v45 }
  0xb5   : > { %4095 = vst [vmem:[#allocation12_spill] sm:$0xff] %v3046_v59  ;;  %4096 = vst [vmem:[#allocation134_spill] sm:$0xff] %v3048_v39  ;;  %v3059_v4 = vmul.f32 %v1886_v19, %v1261_v5  ;;  %v3063_v50 = vmul.f32 %v3046_v59, %v3046_v59  ;;  %v3065_v18 = vmul.f32 0.6931472, %v1894_v0  ;;  %v1283_v26 = vmul.f32 %v1716_v53, %v3048_v39 }
  0xb6   : > { %4097 = vst [vmem:[#allocation135_spill] sm:$0xff] %v3050_v52  ;;  %4098 = vst [vmem:[#allocation136_spill] sm:$0xff] %v3054_v14  ;;  %v3070_v10 = vmul.f32 %v3050_v52, %v3050_v52  ;;  %v1284_v38 = vmul.f32 %v1717_v21, %v3056_v29  ;;  %v1294_v15 = vmul.f32 0.0005952381, %v3054_v14  ;;  %v3082_v53 = vadd.f32 -1.0, %v2362_v40  ;;  %v1896_v41 = vpop.eup %1895 }
  0xb7   : > { %4099 = vst [vmem:[#allocation137_spill] sm:$0xff] %v3056_v29  ;;  %4100 = vst [vmem:[#allocation138_spill] sm:$0xff] %v3059_v4  ;;  %v3077_v19 = vmul.f32 %v3059_v4, %v3059_v4  ;;  %v1295_v56 = vmul.f32 0.0005952381, %v3063_v50  ;;  %v1285_v42 = vmul.f32 %v1718_v51, %v3065_v18  ;;  %v1286_v21 = vsub.f32 %v1282_v20, %v2941_v6  ;;  %v1898_v27 = vpop.eup %1897  ;;  %v4106_v51 = vld [vmem:[#allocation13_spill] sm:$0xff] }
  0xb8   : > { %4101 = vst [vmem:[#allocation139_spill] sm:$0xff] %v3063_v50  ;;  %4102 = vst [vmem:[#allocation140_spill] sm:$0xff] %v3065_v18  ;;  %v1296_v7 = vmul.f32 0.0005952381, %v3070_v10  ;;  %v1298_v1 = vsub.f32 0.0007936508, %v1294_v15  ;;  %v1287_v5 = vsub.f32 %v1283_v26, %v2944_v49  ;;  %v1288_v0 = vsub.f32 %v1284_v38, %v2950_v17  ;;  %v1900_v32 = vpop.eup %1899 }
  0xb9   : > { %4103 = vst [vmem:[#allocation141_spill] sm:$0xff] %v3070_v10  ;;  %4104 = vst [vmem:[#allocation142_spill] sm:$0xff] %v3077_v19  ;;  %v1297_v29 = vmul.f32 0.0005952381, %v3077_v19  ;;  %v1299_v39 = vsub.f32 0.0007936508, %v1295_v56  ;;  %1911 = vlog2.f32 %v2989_v47  ;;  %v1902_v6 = vpop.eup %1901  ;;  %v1289_v56 = vsub.f32 %v1285_v42, %v2953_v8 }
  0xba   : > { %4105 = vst [vmem:[#allocation143_spill] sm:$0xff] %v3082_v53  ;;  %v1300_v45 = vsub.f32 0.0007936508, %v1296_v7  ;;  %v1302_v2 = vmul.f32 %v1298_v1, %v3054_v14  ;;  %v3093_v18 = vadd.f32 -1.0, %v4106_v51  ;;  %v1327_v49 = vmul.f32 0.6931472, %v3005_v60  ;;  %v1904_v38 = vpop.eup %1903 }
  0xbb   : > { %v1301_v20 = vsub.f32 0.0007936508, %v1297_v29  ;;  %v1303_v15 = vmul.f32 %v1299_v39, %v3063_v50  ;;  %v4108_v26 = vld [vmem:[#allocation17_spill] sm:$0xff]  ;;  %v1290_v7 = vadd.f32 0.9189385, %v1286_v21  ;;  %v1906_v47 = vpop.eup %1905  ;;  %v1417_v23 = vadd.f32 1.0, %v1904_v38 }
  0xbc   : > { %4107 = vst [vmem:[#allocation144_spill] sm:$0xff] %v3093_v18  ;;  %v3098_v17 = vadd.f32 -1.0, %v4108_v26  ;;  %v1304_v1 = vmul.f32 %v1300_v45, %v3070_v10  ;;  %v1306_v63 = vsub.f32 0.0027777778, %v1302_v2  ;;  %v1291_v62 = vadd.f32 0.9189385, %v1287_v5  ;;  %v1908_v8 = vpop.eup %1907 }
  0xbd   : > { %v1292_v58 = vadd.f32 0.9189385, %v1288_v0  ;;  %v1305_v51 = vmul.f32 %v1301_v20, %v3077_v19  ;;  %v1307_v29 = vsub.f32 0.0027777778, %v1303_v15  ;;  %v1329_v60 = vmul.f32 0.6931472, %v1896_v41  ;;  %v1910_v21 = vpop.eup %1909 }
  0xbe   : > { %4109 = vst [vmem:[#allocation145_spill] sm:$0xff] %v3098_v17  ;;  %v1308_v40 = vsub.f32 0.0027777778, %v1304_v1  ;;  %v1310_v39 = vmul.f32 %v1306_v63, %v3054_v14  ;;  %v1419_v44 = vmul.f32 0.6931472, %v1906_v47  ;;  %1913 = vlog2.f32 %v3008_v61  ;;  %v4151_v14 = vld [vmem:[#allocation30_spill] sm:$0xff] }
  0xbf   : > { %v1309_v26 = vsub.f32 0.0027777778, %v1305_v51  ;;  %v1311_v57 = vmul.f32 %v1307_v29, %v3063_v50  ;;  %v1293_v45 = vadd.f32 0.9189385, %v1289_v56  ;;  %1915 = vlog2.f32 %v3011_v25 }
  0xc0   : > { %v1312_v2 = vmul.f32 %v1308_v40, %v3070_v10  ;;  %v1314_v42 = vsub.f32 0.083333336, %v1310_v39  ;;  %1917 = vlog2.f32 %v1417_v23  ;;  %v4110_v63 = vmin.f32 %v2329_v9, 0.0  ;;  %v4150_v10 = vld [vmem:[#allocation27_spill] sm:$0xff] }
  0xc1   : > { %v1313_v5 = vmul.f32 %v1309_v26, %v3077_v19  ;;  %v1315_v0 = vsub.f32 0.083333336, %v1311_v57  ;;  %v1331_v15 = vmul.f32 0.6931472, %v1898_v27  ;;  %v1442_v61 = vsub.f32 %v3024_v24, %v1419_v44 }
  0xc2   : > { %v1430_v41 = vsub.f32 %v4110_v63, %v1419_v44  ;;  %v1316_v51 = vsub.f32 0.083333336, %v1312_v2  ;;  %v1318_v20 = vmul.f32 %v1314_v42, %v3041_v36  ;;  %v1333_v56 = vmul.f32 0.6931472, %v1900_v32  ;;  %v4111_v42 = vld [vmem:[#allocation21_spill] sm:$0xff] }
  0xc3   : > { %v1317_v38 = vsub.f32 0.083333336, %v1313_v5  ;;  %v1319_v40 = vmul.f32 %v1315_v0, %v3046_v59  ;;  %v1339_v1 = vmul.f32 0.6931472, %v1902_v6  ;;  %v1912_v25 = vpop.eup %1911  ;;  %v1341_v57 = vmul.f32 0.6931472, %v1908_v8 }
  0xc4   : > { %v1320_v47 = vmul.f32 %v1316_v51, %v3050_v52  ;;  %v1322_v26 = vadd.f32 %v1318_v20, %v1290_v7  ;;  %1919 = vrcp.f32 %v2341_v28  ;;  %v1450_v29 = vmul.f32 %v3018_v43, %v1430_v41  ;;  %v4115_v20 = vld [vmem:[#allocation8_spill] sm:$0xff]  ;;  %v4160_v52 = vld [vmem:[#allocation39_spill] sm:$0xff]  ;;  %v4161_v59 = vld [vmem:[#allocation101_spill] sm:$0xff] }
  0xc5   : > { %v1321_v9 = vmul.f32 %v1317_v38, %v3059_v4  ;;  %v1323_v23 = vadd.f32 %v1319_v40, %v1291_v62  ;;  %v1458_v27 = vmul.f32 %v3082_v53, %v1442_v61  ;;  %v1343_v39 = vmul.f32 0.6931472, %v1910_v21  ;;  %v4116_v38 = vld [vmem:[#allocation87_spill] sm:$0xff]  ;;  %v4159_v4 = vld [vmem:[#allocation38_spill] sm:$0xff] }
  0xc6   : > { %v1324_v44 = vadd.f32 %v1320_v47, %v1292_v58  ;;  %v1334_v24 = vsub.f32 %v1322_v26, %v1327_v49  ;;  %1921 = vrcp.f32 %v2343_v30  ;;  %v1345_v2 = vmul.f32 0.6931472, %v1912_v25  ;;  %v4113_v49 = vld [vmem:[#allocation7_spill] sm:$0xff]  ;;  %v4117_v25 = vld [vmem:[#allocation9_spill] sm:$0xff] }
  0xc7   : > { %v1325_v32 = vadd.f32 %v1321_v9, %v1293_v45  ;;  %v1335_v6 = vsub.f32 %v1323_v23, %v1329_v60  ;;  %1923 = vrcp.f32 %v2351_v35  ;;  %v3122_v5 = vadd.f32 -1.0, %v4111_v42  ;;  %v4114_v45 = vld [vmem:[#allocation85_spill] sm:$0xff]  ;;  %v4120_v23 = vld [vmem:[#allocation14_spill] sm:$0xff] }
  0xc8   : > { %v1336_v7 = vsub.f32 %v1324_v44, %v1331_v15  ;;  %v1346_v8 = vsub.f32 %v1334_v24, %v1339_v1  ;;  %1925 = vrcp.f32 %v2355_v37  ;;  %v1914_v62 = vpop.eup %1913  ;;  %v1462_v58 = vadd.f32 %v1458_v27, %v1450_v29  ;;  %v4118_v47 = vld [vmem:[#allocation89_spill] sm:$0xff]  ;;  %v4121_v29 = vld [vmem:[#allocation92_spill] sm:$0xff] }
  0xc9   : > { %4112 = vst [vmem:[#allocation146_spill] sm:$0xff] %v3122_v5  ;;  %v1337_v0 = vsub.f32 %v1325_v32, %v1333_v56  ;;  %v1347_v63 = vsub.f32 %v1335_v6, %v1341_v57  ;;  %1927 = vrcp.f32 %v4113_v49  ;;  %v1916_v21 = vpop.eup %1915  ;;  %v1421_v51 = vmul.f32 0.6931472, %v1914_v62  ;;  %v4125_v62 = vld [vmem:[#allocation11_spill] sm:$0xff] }
  0xca   : > { %v1348_v41 = vsub.f32 %v1336_v7, %v1343_v39  ;;  %v1386_v60 = vsub.f32 %v1346_v8, %v4114_v45  ;;  %1929 = vrcp.f32 %v4115_v20  ;;  %v1918_v15 = vpop.eup %1917  ;;  %v1423_v1 = vmul.f32 0.6931472, %v1916_v21 }
  0xcb   : > { %v1349_v61 = vsub.f32 %v1337_v0, %v1345_v2  ;;  %v1387_v40 = vsub.f32 %v1347_v63, %v4116_v38  ;;  %1931 = vrcp.f32 %v4117_v25  ;;  %v1425_v26 = vmul.f32 0.6931472, %v1918_v15 }
  0xcc   : > { %v1388_v56 = vsub.f32 %v1348_v41, %v4118_v47  ;;  %v4119_v57 = vmin.f32 %v2331_v12, 0.0  ;;  %1933 = vrcp.f32 %v4120_v23  ;;  %v3136_v44 = vsub.f32 %v1386_v60, %v2975_v16 }
  0xcd   : > { %v1389_v27 = vsub.f32 %v1349_v61, %v4121_v29  ;;  %v4123_v24 = vmin.f32 %v2333_v13, 0.0  ;;  %v1443_v32 = vsub.f32 %v3026_v3, %v1421_v51  ;;  %v4124_v2 = vmin.f32 %v2338_v22, 0.0 }
  0xce   : > { %v1431_v9 = vsub.f32 %v4119_v57, %v1421_v51  ;;  %4122 = vst [vmem:[#allocation7_spill] sm:$0xff] %v3136_v44  ;;  %v3141_v6 = vpop.eup %1919  ;;  %v1444_v12 = vsub.f32 %v3029_v55, %v1423_v1  ;;  %v1445_v8 = vsub.f32 %v3031_v11, %v1425_v26  ;;  %1935 = vrcp.f32 %v4125_v62 }
  0xcf   : > { %v1432_v39 = vsub.f32 %v4123_v24, %v1423_v1  ;;  %v1433_v7 = vsub.f32 %v4124_v2, %v1425_v26  ;;  %v3149_v0 = vsub.f32 %v1387_v40, %v2984_v46  ;;  %v1459_v3 = vmul.f32 %v3093_v18, %v1443_v32  ;;  %v4129_v40 = vld [vmem:[#allocation15_spill] sm:$0xff]  ;;  %v4133_v32 = vld [vmem:[#allocation62_spill] sm:$0xff] }
  0xd0   : > { %v1451_v16 = vmul.f32 %v3021_v54, %v1431_v9  ;;  %v3154_v63 = vpop.eup %1921  ;;  %v3157_v22 = vsub.f32 %v1388_v56, %v2986_v33  ;;  %v1460_v11 = vmul.f32 %v3098_v17, %v1444_v12  ;;  %v1461_v21 = vmul.f32 %v3122_v5, %v1445_v8  ;;  %v4130_v56 = vld [vmem:[#allocation57_spill] sm:$0xff]  ;;  %v4132_v24 = vld [vmem:[#allocation59_spill] sm:$0xff] }
  0xd1   : > { %4126 = vst [vmem:[#allocation85_spill] sm:$0xff] %v3149_v0  ;;  %v1452_v13 = vmul.f32 %v3035_v48, %v1432_v39  ;;  %v1453_v55 = vmul.f32 %v3039_v34, %v1433_v7  ;;  %v3162_v41 = vpop.eup %1923  ;;  %v3165_v46 = vsub.f32 %v1389_v27, %v2992_v31  ;;  %v1466_v60 = vadd.f32 %v1462_v58, %v3136_v44  ;;  %v4131_v58 = vld [vmem:[#allocation58_spill] sm:$0xff]  ;;  %v4144_v5 = vld [vmem:[#allocation23_spill] sm:$0xff]  ;;  %v4146_v17 = vld [vmem:[#allocation65_spill] sm:$0xff] }
  0xd2   : > { %4127 = vst [vmem:[#allocation8_spill] sm:$0xff] %v3157_v22  ;;  %v1463_v45 = vadd.f32 %v1459_v3, %v1451_v16  ;;  %v3168_v51 = vpop.eup %1925  ;;  %1937 = vrcp.f32 %v4129_v40  ;;  %v3174_v26 = vmul.f32 0.5, %v4130_v56  ;;  %v3178_v29 = vmul.f32 0.5, %v4131_v58  ;;  %v4134_v16 = vld [vmem:[#allocation22_spill] sm:$0xff]  ;;  %v4141_v58 = vld [vmem:[#allocation60_spill] sm:$0xff] }
  0xd3   : > { %4128 = vst [vmem:[#allocation87_spill] sm:$0xff] %v3165_v46  ;;  %v1464_v15 = vadd.f32 %v1460_v11, %v1452_v13  ;;  %v1465_v61 = vadd.f32 %v1461_v21, %v1453_v55  ;;  %v1928_v33 = vpop.eup %1927  ;;  %v3181_v39 = vmul.f32 0.5, %v4132_v24  ;;  %v3184_v2 = vmul.f32 0.5, %v4133_v32  ;;  %v4135_v13 = vld [vmem:[#allocation64_spill] sm:$0xff]  ;;  %v4136_v21 = vld [vmem:[#allocation25_spill] sm:$0xff] }
  0xd4   : > { %v1467_v38 = vadd.f32 %v1463_v45, %v3149_v0  ;;  %v1930_v1 = vpop.eup %1929  ;;  %v346_v8 = vmul.f32 %v3141_v6, %v2341_v28  ;;  %1939 = vrcp.f32 %v4134_v16  ;;  %v366_v11 = vmul.f32 %v1928_v33, %v4113_v49  ;;  %v4137_v45 = vld [vmem:[#allocation66_spill] sm:$0xff]  ;;  %v4139_v28 = vld [vmem:[#allocation67_spill] sm:$0xff] }
  0xd5   : > { %v1468_v47 = vadd.f32 %v1464_v15, %v3157_v22  ;;  %v1932_v31 = vpop.eup %1931  ;;  %v1469_v57 = vadd.f32 %v1465_v61, %v3165_v46  ;;  %1941 = vrcp.f32 %v4136_v21  ;;  %v347_v15 = vmul.f32 %v3154_v63, %v2343_v30  ;;  %v4138_v61 = vld [vmem:[#allocation16_spill] sm:$0xff]  ;;  %v4148_v0 = vld [vmem:[#allocation19_spill] sm:$0xff] }
  0xd6   : > { %v1529_v9 = vadd.f32 %v1467_v38, %v1466_v60  ;;  %v1934_v27 = vpop.eup %1933  ;;  %1943 = vrcp.f32 %v4138_v61  ;;  %v348_v49 = vmul.f32 %v3162_v41, %v2351_v35  ;;  %v662_v24 = vmul.f32 0.003968254, %v4141_v58  ;;  %v4143_v38 = vld [vmem:[#allocation63_spill] sm:$0xff]  ;;  %v4147_v46 = vld [vmem:[#allocation68_spill] sm:$0xff] }
  0xd7   : > { %v349_v30 = vmul.f32 %v3168_v51, %v2355_v37  ;;  %v350_v32 = vsub.f32 2.0, %v346_v8  ;;  %v663_v60 = vmul.f32 0.003968254, %v4143_v38  ;;  %v370_v56 = vsub.f32 2.0, %v366_v11  ;;  %v4149_v11 = vld [vmem:[#allocation20_spill] sm:$0xff] }
  0xd8   : > { %v1530_v7 = vadd.f32 %v1529_v9, %v1468_v47  ;;  %v1936_v12 = vpop.eup %1935  ;;  %v4140_v47 = vld [vmem:[#allocation69_spill] sm:$0xff]  ;;  %v368_v9 = vmul.f32 %v1932_v31, %v4117_v25  ;;  %v4145_v25 = vld [vmem:[#allocation26_spill] sm:$0xff]  ;;  %v664_v18 = vmul.f32 0.003968254, %v4146_v17  ;;  %v665_v37 = vmul.f32 0.003968254, %v4147_v46 }
  0xd9   : > { %v394_v35 = vmul.f32 %v1936_v12, %v4125_v62  ;;  %v352_v8 = vsub.f32 2.0, %v348_v49  ;;  %v353_v44 = vsub.f32 2.0, %v349_v30  ;;  %v666_v62 = vsub.f32 0.008333334, %v662_v24 }
  0xda   : > { %v1531_v55 = vadd.f32 %v1530_v7, %v1469_v57  ;;  %v367_v57 = vmul.f32 %v1930_v1, %v4115_v20  ;;  %v4142_v7 = vld [vmem:[#allocation18_spill] sm:$0xff]  ;;  %v351_v20 = vsub.f32 2.0, %v347_v15  ;;  %v372_v53 = vsub.f32 2.0, %v368_v9 }
  0xdb   : > { %1945 = vrcp.f32 %v4142_v7  ;;  %v354_v34 = vmul.f32 %v3141_v6, %v350_v32  ;;  %v374_v48 = vmul.f32 %v1928_v33, %v370_v56  ;;  %v398_v54 = vsub.f32 2.0, %v394_v35  ;;  %v4152_v33 = vld [vmem:[#allocation32_spill] sm:$0xff] }
  0xdc   : > { %1532 = vadd.xlane.f32.xlu0 %v1531_v55  ;;  %v1938_v3 = vpop.eup %1937  ;;  %v369_v55 = vmul.f32 %v1934_v27, %v4120_v23  ;;  %1947 = vrcp.f32 %v4144_v5  ;;  %v371_v22 = vsub.f32 2.0, %v367_v57  ;;  %v355_v19 = vmul.f32 %v3154_v63, %v351_v20  ;;  %v4153_v20 = vld [vmem:[#allocation33_spill] sm:$0xff] }
  0xdd   : > { %1949 = vrcp.f32 %v4145_v25  ;;  %v395_v23 = vmul.f32 %v1938_v3, %v4129_v40  ;;  %v667_v49 = vsub.f32 0.008333334, %v663_v60  ;;  %v668_v57 = vsub.f32 0.008333334, %v664_v18 }
  0xde   : > { %1951 = vrcp.f32 %v4148_v0  ;;  %v373_v15 = vsub.f32 2.0, %v369_v55  ;;  %v1940_v43 = vpop.eup %1939  ;;  %v356_v30 = vmul.f32 %v3162_v41, %v352_v8  ;;  %v375_v50 = vmul.f32 %v1930_v1, %v371_v22 }
  0xdf   : > { %1953 = vrcp.f32 %v4149_v11  ;;  %v1942_v9 = vpop.eup %1941  ;;  %v376_v40 = vmul.f32 %v1932_v31, %v372_v53  ;;  %v357_v6 = vmul.f32 %v3168_v51, %v353_v44  ;;  %v399_v32 = vsub.f32 2.0, %v395_v23  ;;  %v4154_v53 = vld [vmem:[#allocation34_spill] sm:$0xff] }
  0xe0   : > { %1955 = vrcp.f32 %v4150_v10  ;;  %v1944_v24 = vpop.eup %1943  ;;  %v669_v56 = vsub.f32 0.008333334, %v665_v37  ;;  %v377_v55 = vmul.f32 %v1934_v27, %v373_v15  ;;  %v378_v63 = vadd.f32 %v374_v48, %v354_v34  ;;  %v4155_v37 = vld [vmem:[#allocation35_spill] sm:$0xff]  ;;  %v4157_v15 = vld [vmem:[#allocation37_spill] sm:$0xff] }
  0xe1   : > { %1957 = vrcp.f32 %v4151_v14  ;;  %v402_v35 = vmul.f32 %v1936_v12, %v398_v54  ;;  %v396_v60 = vmul.f32 %v1940_v43, %v4134_v16  ;;  %v397_v22 = vmul.f32 %v1942_v9, %v4136_v21 }
  0xe2   : > { %1959 = vrcp.f32 %v4152_v33  ;;  %v670_v41 = vmul.f32 %v666_v62, %v4141_v58  ;;  %v379_v44 = vadd.f32 %v375_v50, %v355_v19  ;;  %v380_v51 = vadd.f32 %v376_v40, %v356_v30  ;;  %v4156_v50 = vld [vmem:[#allocation36_spill] sm:$0xff]  ;;  %v4158_v40 = vld [vmem:[#allocation99_spill] sm:$0xff] }
  0xe3   : > { %1961 = vrcp.f32 %v4153_v20  ;;  %v422_v31 = vmul.f32 %v1944_v24, %v4138_v61  ;;  %v403_v48 = vmul.f32 %v1938_v3, %v399_v32  ;;  %v671_v54 = vmul.f32 %v667_v49, %v4143_v38 }
  0xe4   : > { %1963 = vrcp.f32 %v4154_v53  ;;  %v672_v27 = vmul.f32 %v668_v57, %v4146_v17  ;;  %v3237_v12 = vmul.f32 %v669_v56, %v4147_v46  ;;  %v381_v21 = vadd.f32 %v377_v55, %v357_v6 }
  0xe5   : > { %v1946_v18 = vpop.eup %1945  ;;  %1965 = vrcp.f32 %v4155_v37  ;;  %v406_v8 = vadd.f32 %v402_v35, %v378_v63  ;;  %v400_v61 = vsub.f32 2.0, %v396_v60  ;;  %v401_v62 = vsub.f32 2.0, %v397_v22 }
  0xe6   : > { %v1948_v1 = vpop.eup %1947  ;;  %v423_v23 = vmul.f32 %v1946_v18, %v4142_v7  ;;  %1967 = vrcp.f32 %v4156_v50  ;;  %v674_v3 = vsub.f32 0.083333336, %v670_v41  ;;  %v426_v30 = vsub.f32 2.0, %v422_v31 }
  0xe7   : > { %v1950_v34 = vpop.eup %1949  ;;  %1969 = vrcp.f32 %v4157_v15  ;;  %v424_v49 = vmul.f32 %v1948_v1, %v4144_v5  ;;  %v3245_v32 = vmul.f32 0.5, %v4158_v40  ;;  %v407_v56 = vadd.f32 %v403_v48, %v379_v44 }
  0xe8   : > { %v1952_v16 = vpop.eup %1951  ;;  %v425_v57 = vmul.f32 %v1950_v34, %v4145_v25  ;;  %v675_v55 = vsub.f32 0.083333336, %v671_v54  ;;  %v676_v7 = vsub.f32 0.083333336, %v672_v27  ;;  %v677_v63 = vsub.f32 0.083333336, %v3237_v12 }
  0xe9   : > { %v1954_v19 = vpop.eup %1953  ;;  %v427_v60 = vsub.f32 2.0, %v423_v23  ;;  %v450_v22 = vmul.f32 %v1952_v16, %v4148_v0  ;;  %1971 = vrcp.f32 %v4159_v4  ;;  %v404_v25 = vmul.f32 %v1940_v43, %v400_v61  ;;  %v4163_v43 = vld [vmem:[#allocation103_spill] sm:$0xff] }
  0xea   : > { %v1956_v6 = vpop.eup %1955  ;;  %v451_v41 = vmul.f32 %v1954_v19, %v4149_v11  ;;  %v405_v31 = vmul.f32 %v1942_v9, %v401_v62  ;;  %1973 = vrcp.f32 %v4160_v52  ;;  %v678_v40 = vmul.f32 %v674_v3, %v4141_v58 }
  0xeb   : > { %v1958_v35 = vpop.eup %1957  ;;  %v428_v48 = vsub.f32 2.0, %v424_v49  ;;  %v429_v54 = vsub.f32 2.0, %v425_v57  ;;  %v430_v27 = vmul.f32 %v1944_v24, %v426_v30  ;;  %v452_v12 = vmul.f32 %v1956_v6, %v4150_v10 }
  0xec   : > { %v1960_v5 = vpop.eup %1959  ;;  %v453_v0 = vmul.f32 %v1958_v35, %v4151_v14  ;;  %v679_v11 = vmul.f32 %v675_v55, %v4143_v38  ;;  %v3257_v36 = vmul.f32 0.5, %v4161_v59  ;;  %v3260_v9 = vmul.f32 0.5, %v4163_v43 }
  0xed   : > { %v1962_v44 = vpop.eup %1961  ;;  %v431_v62 = vmul.f32 %v1946_v18, %v427_v60  ;;  %v454_v58 = vsub.f32 2.0, %v450_v22  ;;  %v455_v3 = vsub.f32 2.0, %v451_v41  ;;  %v474_v49 = vmul.f32 %v1960_v5, %v4152_v33  ;;  %v4165_v60 = vld [vmem:[#allocation40_spill] sm:$0xff] }
  0xee   : > { %v1964_v23 = vpop.eup %1963  ;;  %4162 = vst [vmem:[#allocation9_spill] sm:$0xff] %v3257_v36  ;;  %4164 = vst [vmem:[#allocation89_spill] sm:$0xff] %v3260_v9  ;;  %v408_v24 = vadd.f32 %v404_v25, %v380_v51  ;;  %v409_v57 = vadd.f32 %v405_v31, %v381_v21  ;;  %v475_v10 = vmul.f32 %v1962_v44, %v4153_v20  ;;  %v456_v36 = vsub.f32 2.0, %v452_v12  ;;  %v4167_v25 = vld [vmem:[#allocation43_spill] sm:$0xff] }
  0xef   : > { %v1966_v61 = vpop.eup %1965  ;;  %v680_v14 = vmul.f32 %v676_v7, %v4146_v17  ;;  %v432_v38 = vmul.f32 %v1948_v1, %v428_v48  ;;  %v433_v55 = vmul.f32 %v1950_v34, %v429_v54  ;;  %v434_v59 = vadd.f32 %v430_v27, %v406_v8  ;;  %v4166_v7 = vld [vmem:[#allocation41_spill] sm:$0xff] }
  0xf0   : > { %v1968_v30 = vpop.eup %1967  ;;  %v457_v43 = vsub.f32 2.0, %v453_v0  ;;  %v476_v9 = vmul.f32 %v1964_v23, %v4154_v53  ;;  %v477_v18 = vmul.f32 %v1966_v61, %v4155_v37  ;;  %1975 = vrcp.f32 %v4165_v60 }
  0xf1   : > { %v1970_v42 = vpop.eup %1969  ;;  %v435_v33 = vadd.f32 %v431_v62, %v407_v56  ;;  %v458_v51 = vmul.f32 %v1952_v16, %v454_v58  ;;  %v459_v21 = vmul.f32 %v1954_v19, %v455_v3  ;;  %v478_v22 = vsub.f32 2.0, %v474_v49  ;;  %v4177_v3 = vld [vmem:[#allocation10_spill] sm:$0xff] }
  0xf2   : > { %v479_v20 = vsub.f32 2.0, %v475_v10  ;;  %v502_v17 = vmul.f32 %v1968_v30, %v4156_v50  ;;  %1977 = vrcp.f32 %v4166_v7  ;;  %v681_v1 = vmul.f32 %v677_v63, %v4147_v46 }
  0xf3   : > { %v1972_v34 = vpop.eup %1971  ;;  %v436_v8 = vadd.f32 %v432_v38, %v408_v24  ;;  %v437_v41 = vadd.f32 %v433_v55, %v409_v57  ;;  %v503_v53 = vmul.f32 %v1970_v42, %v4157_v15  ;;  %1979 = vrcp.f32 %v4167_v25  ;;  %v4170_v15 = vld [vmem:[#allocation45_spill] sm:$0xff]  ;;  %v4180_v24 = vld [vmem:[#allocation104_spill] sm:$0xff] }
  0xf4   : > { %v1974_v37 = vpop.eup %1973  ;;  %v460_v31 = vmul.f32 %v1956_v6, %v456_v36  ;;  %v461_v56 = vmul.f32 %v1958_v35, %v457_v43  ;;  %v480_v16 = vsub.f32 2.0, %v476_v9  ;;  %v481_v19 = vsub.f32 2.0, %v477_v18  ;;  %v4184_v43 = vld [vmem:[#allocation111_spill] sm:$0xff] }
  0xf5   : > { %v462_v48 = vadd.f32 %v458_v51, %v434_v59  ;;  %v463_v54 = vadd.f32 %v459_v21, %v435_v33  ;;  %v482_v27 = vmul.f32 %v1960_v5, %v478_v22  ;;  %v4168_v50 = vsub.f32 %v4135_v13, %v3174_v26  ;;  %v4183_v59 = vld [vmem:[#allocation17_spill] sm:$0xff]  ;;  %v4185_v21 = vld [vmem:[#allocation42_spill] sm:$0xff] }
  0xf6   : > { %v483_v46 = vmul.f32 %v1962_v44, %v479_v20  ;;  %v504_v63 = vmul.f32 %v1972_v34, %v4159_v4  ;;  %v506_v0 = vsub.f32 2.0, %v502_v17  ;;  %1981 = vrcp.f32 %v4170_v15 }
  0xf7   : > { %v3276_v12 = vsub.f32 %v4168_v50, %v678_v40  ;;  %v505_v62 = vmul.f32 %v1974_v37, %v4160_v52  ;;  %v507_v36 = vsub.f32 2.0, %v503_v53  ;;  %v4171_v6 = vsub.f32 %v4137_v45, %v3178_v29  ;;  %v4178_v29 = vld [vmem:[#allocation107_spill] sm:$0xff] }
  0xf8   : > { %v4173_v5 = vsub.f32 %v4139_v28, %v3181_v39  ;;  %v464_v13 = vadd.f32 %v460_v31, %v436_v8  ;;  %v465_v40 = vadd.f32 %v461_v56, %v437_v41  ;;  %v484_v44 = vmul.f32 %v1964_v23, %v480_v16  ;;  %v4188_v8 = vld [vmem:[#allocation44_spill] sm:$0xff]  ;;  %v4189_v56 = vld [vmem:[#allocation21_spill] sm:$0xff] }
  0xf9   : > { %4169 = vst [vmem:[#allocation14_spill] sm:$0xff] %v3276_v12  ;;  %v3284_v35 = vsub.f32 %v4171_v6, %v679_v11  ;;  %v485_v4 = vmul.f32 %v1966_v61, %v481_v19  ;;  %v486_v9 = vadd.f32 %v482_v27, %v462_v48  ;;  %v4175_v58 = vsub.f32 %v4140_v47, %v3184_v2  ;;  %v4181_v61 = vld [vmem:[#allocation13_spill] sm:$0xff] }
  0xfa   : > { %v3289_v26 = vsub.f32 %v4173_v5, %v680_v14  ;;  %1983 = vrcp.f32 %v4177_v3  ;;  %v3298_v45 = vmul.f32 0.5, %v4178_v29  ;;  %v1976_v11 = vpop.eup %1975  ;;  %v487_v49 = vadd.f32 %v483_v46, %v463_v54  ;;  %v4182_v14 = vld [vmem:[#allocation108_spill] sm:$0xff]  ;;  %v4190_v54 = vld [vmem:[#allocation46_spill] sm:$0xff]  ;;  %v4191_v46 = vld [vmem:[#allocation47_spill] sm:$0xff] }
  0xfb   : > { %4172 = vst [vmem:[#allocation92_spill] sm:$0xff] %v3284_v35  ;;  %v3294_v52 = vsub.f32 %v4175_v58, %v681_v1  ;;  %v508_v39 = vsub.f32 2.0, %v504_v63  ;;  %v510_v28 = vmul.f32 %v1968_v30, %v506_v0  ;;  %v1010_v57 = vmul.f32 0.003968254, %v4180_v24  ;;  %v4186_v30 = vld [vmem:[#allocation105_spill] sm:$0xff]  ;;  %v4193_v63 = vld [vmem:[#allocation106_spill] sm:$0xff] }
  0xfc   : > { %4174 = vst [vmem:[#allocation11_spill] sm:$0xff] %v3289_v26  ;;  %4179 = vst [vmem:[#allocation57_spill] sm:$0xff] %v3298_v45  ;;  %v509_v10 = vsub.f32 2.0, %v505_v62  ;;  %v511_v23 = vmul.f32 %v1970_v42, %v507_v36  ;;  %1985 = vrcp.f32 %v4181_v61  ;;  %v1011_v38 = vmul.f32 0.003968254, %v4182_v14  ;;  %v1978_v2 = vpop.eup %1977  ;;  %v4187_v42 = vld [vmem:[#allocation113_spill] sm:$0xff] }
  0xfd   : > { %4176 = vst [vmem:[#allocation15_spill] sm:$0xff] %v3294_v52  ;;  %v488_v47 = vadd.f32 %v484_v44, %v464_v13  ;;  %v489_v55 = vadd.f32 %v485_v4, %v465_v40  ;;  %1987 = vrcp.f32 %v4183_v59  ;;  %v1012_v18 = vmul.f32 0.003968254, %v4184_v43  ;;  %v1980_v33 = vpop.eup %1979  ;;  %v4194_v36 = vld [vmem:[#allocation48_spill] sm:$0xff]  ;;  %v4195_v6 = vld [vmem:[#allocation89_spill] sm:$0xff]  ;;  %v4208_v13 = vld [vmem:[#allocation138_spill] sm:$0xff] }
  0xfe   : > { %v530_v51 = vmul.f32 %v1976_v11, %v4165_v60  ;;  %1989 = vrcp.f32 %v4185_v21  ;;  %v1013_v20 = vmul.f32 0.003968254, %v4187_v42  ;;  %v512_v17 = vmul.f32 %v1972_v34, %v508_v39  ;;  %v4192_v34 = vld [vmem:[#allocation9_spill] sm:$0xff]  ;;  %v4223_v26 = vld [vmem:[#allocation74_spill] sm:$0xff] }
  0xff   : > { %v514_v1 = vadd.f32 %v510_v28, %v486_v9  ;;  %1991 = vrcp.f32 %v4188_v8  ;;  %v1014_v41 = vsub.f32 0.008333334, %v1010_v57  ;;  %v513_v53 = vmul.f32 %v1974_v37, %v509_v10  ;;  %v4196_v5 = vld [vmem:[#allocation109_spill] sm:$0xff] }
 0x100   : > { %v515_v31 = vadd.f32 %v511_v23, %v487_v49  ;;  %1993 = vrcp.f32 %v4189_v56  ;;  %v1015_v16 = vsub.f32 0.008333334, %v1011_v38  ;;  %v1982_v19 = vpop.eup %1981  ;;  %v531_v60 = vmul.f32 %v1978_v2, %v4166_v7  ;;  %v4198_v39 = vld [vmem:[#allocation49_spill] sm:$0xff]  ;;  %v4199_v23 = vld [vmem:[#allocation50_spill] sm:$0xff] }
 0x101   : > { %v532_v48 = vmul.f32 %v1980_v33, %v4167_v25  ;;  %1995 = vrcp.f32 %v4190_v54  ;;  %v1016_v27 = vsub.f32 0.008333334, %v1012_v18  ;;  %v534_v50 = vsub.f32 2.0, %v530_v51  ;;  %v4202_v51 = vld [vmem:[#allocation51_spill] sm:$0xff] }
 0x102   : > { %1997 = vrcp.f32 %v4191_v46  ;;  %v1017_v62 = vsub.f32 0.008333334, %v1013_v20  ;;  %v516_v37 = vadd.f32 %v512_v17, %v488_v47  ;;  %v1018_v7 = vmul.f32 %v1014_v41, %v4180_v24  ;;  %v4200_v47 = vld [vmem:[#allocation132_spill] sm:$0xff] }
 0x103   : > { %1999 = vrcp.f32 %v4194_v36  ;;  %v517_v25 = vadd.f32 %v513_v53, %v489_v55  ;;  %v533_v44 = vmul.f32 %v1982_v19, %v4170_v15  ;;  %v1019_v58 = vmul.f32 %v1015_v16, %v4182_v14  ;;  %v4203_v17 = vld [vmem:[#allocation12_spill] sm:$0xff] }
 0x104   : > { %v1984_v40 = vpop.eup %1983  ;;  %v535_v29 = vsub.f32 2.0, %v531_v60  ;;  %v536_v49 = vsub.f32 2.0, %v532_v48  ;;  %2001 = vrcp.f32 %v4198_v39  ;;  %v1020_v28 = vmul.f32 %v1016_v27, %v4184_v43  ;;  %v4205_v16 = vld [vmem:[#allocation52_spill] sm:$0xff]  ;;  %v4206_v48 = vld [vmem:[#allocation135_spill] sm:$0xff] }
 0x105   : > { %v538_v10 = vmul.f32 %v1976_v11, %v534_v50  ;;  %2003 = vrcp.f32 %v4199_v23  ;;  %v3330_v38 = vmul.f32 %v1017_v62, %v4187_v42  ;;  %v3333_v15 = vmul.f32 0.5, %v4200_v47 }
 0x106   : > { %v1986_v57 = vpop.eup %1985  ;;  %v694_v18 = vmul.f32 %v1984_v40, %v4177_v3  ;;  %2005 = vrcp.f32 %v4202_v51  ;;  %v1022_v20 = vsub.f32 0.083333336, %v1018_v7  ;;  %v3340_v41 = vmul.f32 0.5, %v4203_v17 }
 0x107   : > { %4201 = vst [vmem:[#allocation58_spill] sm:$0xff] %v3333_v15  ;;  %v3335_v55 = vpop.eup %1987  ;;  %v537_v11 = vsub.f32 2.0, %v533_v44  ;;  %2007 = vrcp.f32 %v4205_v16  ;;  %v1023_v60 = vsub.f32 0.083333336, %v1019_v58  ;;  %v3344_v27 = vmul.f32 0.5, %v4206_v48  ;;  %v4235_v15 = vld [vmem:[#allocation136_spill] sm:$0xff] }
 0x108   : > { %4204 = vst [vmem:[#allocation59_spill] sm:$0xff] %v3340_v41  ;;  %v1990_v53 = vpop.eup %1989  ;;  %v539_v62 = vmul.f32 %v1978_v2, %v535_v29  ;;  %v540_v47 = vmul.f32 %v1980_v33, %v536_v49  ;;  %v1024_v9 = vsub.f32 0.083333336, %v1020_v28  ;;  %v3347_v3 = vmul.f32 0.5, %v4208_v13  ;;  %v4211_v2 = vld [vmem:[#allocation53_spill] sm:$0xff]  ;;  %v4212_v49 = vld [vmem:[#allocation54_spill] sm:$0xff] }
 0x109   : > { %4207 = vst [vmem:[#allocation62_spill] sm:$0xff] %v3344_v27  ;;  %v1992_v50 = vpop.eup %1991  ;;  %v3349_v7 = vadd.f32 %v538_v10, %v514_v1  ;;  %v695_v17 = vmul.f32 %v1986_v57, %v4181_v61  ;;  %v696_v44 = vmul.f32 %v3335_v55, %v4183_v59  ;;  %v698_v48 = vsub.f32 2.0, %v694_v18 }
 0x10a   : > { %4209 = vst [vmem:[#allocation22_spill] sm:$0xff] %v3347_v3  ;;  %v1994_v0 = vpop.eup %1993  ;;  %v714_v27 = vmul.f32 %v1990_v53, %v4185_v21  ;;  %2009 = vrcp.f32 %v4211_v2  ;;  %v3358_v33 = vmul.f32 %v1022_v20, %v4180_v24  ;;  %v541_v29 = vmul.f32 %v1982_v19, %v537_v11 }
 0x10b   : > { %4210 = vst [vmem:[#allocation64_spill] sm:$0xff] %v3349_v7  ;;  %v1996_v22 = vpop.eup %1995  ;;  %v715_v1 = vmul.f32 %v1992_v50, %v4188_v8  ;;  %2011 = vrcp.f32 %v4212_v49  ;;  %v3363_v61 = vmul.f32 %v1023_v60, %v4182_v14  ;;  %v3365_v28 = vadd.f32 %v539_v62, %v515_v31  ;;  %v4215_v62 = vld [vmem:[#allocation55_spill] sm:$0xff] }
 0x10c   : > { %v1998_v13 = vpop.eup %1997  ;;  %v3367_v10 = vadd.f32 %v540_v47, %v516_v37  ;;  %v697_v21 = vmul.f32 %v1994_v0, %v4189_v56  ;;  %v3371_v18 = vmul.f32 %v1024_v9, %v4184_v43  ;;  %v699_v19 = vsub.f32 2.0, %v695_v17  ;;  %v4217_v9 = vld [vmem:[#allocation56_spill] sm:$0xff]  ;;  %v4220_v7 = vld [vmem:[#allocation71_spill] sm:$0xff] }
 0x10d   : > { %v2000_v59 = vpop.eup %1999  ;;  %4213 = vst [vmem:[#allocation25_spill] sm:$0xff] %v3365_v28  ;;  %v700_v8 = vsub.f32 2.0, %v696_v44  ;;  %v716_v20 = vmul.f32 %v1996_v22, %v4190_v54  ;;  %v702_v14 = vmul.f32 %v1984_v40, %v698_v48  ;;  %v717_v60 = vmul.f32 %v1998_v13, %v4191_v46  ;;  %v4218_v46 = vld [vmem:[#allocation61_spill] sm:$0xff] }
 0x10e   : > { %4214 = vst [vmem:[#allocation66_spill] sm:$0xff] %v3367_v10  ;;  %v2002_v11 = vpop.eup %2001  ;;  %v718_v31 = vsub.f32 2.0, %v714_v27  ;;  %2013 = vrcp.f32 %v4215_v62  ;;  %v3378_v47 = vadd.f32 %v541_v29, %v517_v25  ;;  %v719_v56 = vsub.f32 2.0, %v715_v1  ;;  %v4219_v29 = vld [vmem:[#allocation70_spill] sm:$0xff] }
 0x10f   : > { %v2004_v37 = vpop.eup %2003  ;;  %v742_v43 = vmul.f32 %v2000_v59, %v4194_v36  ;;  %2015 = vrcp.f32 %v4217_v9  ;;  %v701_v40 = vsub.f32 2.0, %v697_v21  ;;  %v703_v44 = vmul.f32 %v1986_v57, %v699_v19  ;;  %v4221_v21 = vld [vmem:[#allocation72_spill] sm:$0xff] }
 0x110   : > { %4216 = vst [vmem:[#allocation16_spill] sm:$0xff] %v3378_v47  ;;  %v2006_v24 = vpop.eup %2005  ;;  %2017 = vrcp.f32 %v4218_v46  ;;  %v720_v48 = vsub.f32 2.0, %v716_v20  ;;  %v743_v25 = vmul.f32 %v2002_v11, %v4198_v39  ;;  %v721_v36 = vsub.f32 2.0, %v717_v60  ;;  %v4222_v20 = vld [vmem:[#allocation73_spill] sm:$0xff] }
 0x111   : > { %v2008_v27 = vpop.eup %2007  ;;  %2019 = vrcp.f32 %v4219_v29  ;;  %v722_v1 = vmul.f32 %v1990_v53, %v718_v31  ;;  %v744_v58 = vmul.f32 %v2004_v37, %v4199_v23  ;;  %v704_v17 = vmul.f32 %v3335_v55, %v700_v8 }
 0x112   : > { %2021 = vrcp.f32 %v4220_v7  ;;  %v723_v28 = vmul.f32 %v1992_v50, %v719_v56  ;;  %v746_v54 = vsub.f32 2.0, %v742_v43  ;;  %v745_v39 = vmul.f32 %v2006_v24, %v4202_v51  ;;  %v4224_v56 = vld [vmem:[#allocation75_spill] sm:$0xff]  ;;  %v4225_v51 = vld [vmem:[#allocation76_spill] sm:$0xff] }
 0x113   : > { %2023 = vrcp.f32 %v4221_v21  ;;  %v770_v19 = vmul.f32 %v2008_v27, %v4205_v16  ;;  %v705_v23 = vmul.f32 %v1994_v0, %v701_v40  ;;  %v724_v60 = vmul.f32 %v1996_v22, %v720_v48  ;;  %v4226_v22 = vld [vmem:[#allocation77_spill] sm:$0xff] }
 0x114   : > { %v2010_v10 = vpop.eup %2009  ;;  %2025 = vrcp.f32 %v4222_v20  ;;  %v747_v31 = vsub.f32 2.0, %v743_v25  ;;  %v725_v55 = vmul.f32 %v1998_v13, %v721_v36  ;;  %v726_v50 = vadd.f32 %v722_v1, %v702_v14  ;;  %v4227_v14 = vld [vmem:[#allocation78_spill] sm:$0xff] }
 0x115   : > { %v2012_v53 = vpop.eup %2011  ;;  %2027 = vrcp.f32 %v4223_v26  ;;  %v748_v8 = vsub.f32 2.0, %v744_v58  ;;  %v727_v43 = vadd.f32 %v723_v28, %v703_v44  ;;  %v750_v35 = vmul.f32 %v2000_v59, %v746_v54  ;;  %v4228_v44 = vld [vmem:[#allocation79_spill] sm:$0xff] }
 0x116   : > { %2029 = vrcp.f32 %v4224_v56  ;;  %v771_v57 = vmul.f32 %v2010_v10, %v4211_v2  ;;  %v749_v47 = vsub.f32 2.0, %v745_v39  ;;  %v772_v52 = vmul.f32 %v2012_v53, %v4212_v49  ;;  %v4229_v39 = vld [vmem:[#allocation80_spill] sm:$0xff] }
 0x117   : > { %2031 = vrcp.f32 %v4225_v51  ;;  %v774_v0 = vsub.f32 2.0, %v770_v19  ;;  %v728_v48 = vadd.f32 %v724_v60, %v704_v17  ;;  %v751_v13 = vmul.f32 %v2002_v11, %v747_v31  ;;  %v4230_v60 = vld [vmem:[#allocation81_spill] sm:$0xff] }
 0x118   : > { %v2014_v16 = vpop.eup %2013  ;;  %2033 = vrcp.f32 %v4226_v22  ;;  %v729_v59 = vadd.f32 %v725_v55, %v705_v23  ;;  %v752_v54 = vmul.f32 %v2004_v37, %v748_v8  ;;  %v754_v36 = vadd.f32 %v750_v35, %v726_v50 }
 0x119   : > { %v2016_v40 = vpop.eup %2015  ;;  %v773_v58 = vmul.f32 %v2014_v16, %v4215_v62  ;;  %2035 = vrcp.f32 %v4227_v14  ;;  %v775_v49 = vsub.f32 2.0, %v771_v57  ;;  %v753_v11 = vmul.f32 %v2006_v24, %v749_v47 }
 0x11a   : > { %v2018_v28 = vpop.eup %2017  ;;  %v798_v2 = vmul.f32 %v2016_v40, %v4217_v9  ;;  %2037 = vrcp.f32 %v4228_v44  ;;  %v776_v19 = vsub.f32 2.0, %v772_v52  ;;  %v778_v62 = vmul.f32 %v2008_v27, %v774_v0 }
 0x11b   : > { %v2020_v25 = vpop.eup %2019  ;;  %v799_v1 = vmul.f32 %v2018_v28, %v4218_v46  ;;  %2039 = vrcp.f32 %v4229_v39  ;;  %v755_v23 = vadd.f32 %v751_v13, %v727_v43  ;;  %v777_v37 = vsub.f32 2.0, %v773_v58  ;;  %v4231_v46 = vld [vmem:[#allocation82_spill] sm:$0xff] }
 0x11c   : > { %v2022_v17 = vpop.eup %2021  ;;  %2041 = vrcp.f32 %v4230_v60  ;;  %v800_v9 = vmul.f32 %v2020_v25, %v4219_v29  ;;  %v802_v35 = vsub.f32 2.0, %v798_v2  ;;  %v4232_v24 = vsub.f32 0.083333336, %v3330_v38  ;;  %v4234_v2 = vld [vmem:[#allocation83_spill] sm:$0xff] }
 0x11d   : > { %v2024_v31 = vpop.eup %2023  ;;  %v801_v55 = vmul.f32 %v2022_v17, %v4220_v7  ;;  %2043 = vrcp.f32 %v4231_v46  ;;  %v756_v27 = vadd.f32 %v752_v54, %v728_v48  ;;  %v779_v50 = vmul.f32 %v2010_v10, %v775_v49  ;;  %v4236_v49 = vld [vmem:[#allocation139_spill] sm:$0xff] }
 0x11e   : > { %v2026_v8 = vpop.eup %2025  ;;  %v822_v57 = vmul.f32 %v2024_v31, %v4221_v21  ;;  %v3418_v52 = vmul.f32 %v4232_v24, %v4187_v42  ;;  %v803_v43 = vsub.f32 2.0, %v799_v1  ;;  %v757_v13 = vadd.f32 %v753_v11, %v729_v59 }
 0x11f   : > { %v2028_v47 = vpop.eup %2027  ;;  %v823_v0 = vmul.f32 %v2026_v8, %v4222_v20  ;;  %v780_v7 = vmul.f32 %v2012_v53, %v776_v19  ;;  %v782_v58 = vadd.f32 %v778_v62, %v754_v36  ;;  %2045 = vrcp.f32 %v4234_v2  ;;  %v4237_v62 = vld [vmem:[#allocation141_spill] sm:$0xff] }
 0x120   : > { %4233 = vst [vmem:[#allocation67_spill] sm:$0xff] %v3418_v52  ;;  %v2030_v29 = vpop.eup %2029  ;;  %v781_v12 = vmul.f32 %v2014_v16, %v777_v37  ;;  %v804_v3 = vsub.f32 2.0, %v800_v9  ;;  %v805_v41 = vsub.f32 2.0, %v801_v55  ;;  %v3423_v38 = vmul.f32 0.003968254, %v4235_v15 }
 0x121   : > { %v2032_v21 = vpop.eup %2031  ;;  %v806_v24 = vmul.f32 %v2016_v40, %v802_v35  ;;  %v824_v10 = vmul.f32 %v2028_v47, %v4223_v26  ;;  %v825_v48 = vmul.f32 %v2030_v29, %v4224_v56  ;;  %v826_v20 = vsub.f32 2.0, %v822_v57  ;;  %v4238_v40 = vld [vmem:[#allocation142_spill] sm:$0xff] }
 0x122   : > { %v2034_v42 = vpop.eup %2033  ;;  %v783_v59 = vadd.f32 %v779_v50, %v755_v23  ;;  %v807_v53 = vmul.f32 %v2018_v28, %v803_v43  ;;  %v827_v36 = vsub.f32 2.0, %v823_v0  ;;  %v3428_v1 = vmul.f32 0.003968254, %v4236_v49 }
 0x123   : > { %v2036_v54 = vpop.eup %2035  ;;  %v784_v11 = vadd.f32 %v780_v7, %v756_v27  ;;  %v850_v19 = vmul.f32 %v2032_v21, %v4225_v51  ;;  %v3432_v37 = vmul.f32 0.003968254, %v4237_v62  ;;  %v3435_v9 = vmul.f32 0.003968254, %v4238_v40 }
 0x124   : > { %v2038_v16 = vpop.eup %2037  ;;  %v785_v56 = vadd.f32 %v781_v12, %v757_v13  ;;  %v808_v55 = vmul.f32 %v2020_v25, %v804_v3  ;;  %v809_v35 = vmul.f32 %v2022_v17, %v805_v41  ;;  %v851_v28 = vmul.f32 %v2034_v42, %v4226_v22 }
 0x125   : > { %v2040_v26 = vpop.eup %2039  ;;  %v810_v57 = vadd.f32 %v806_v24, %v782_v58  ;;  %v828_v50 = vsub.f32 2.0, %v824_v10  ;;  %v829_v43 = vsub.f32 2.0, %v825_v48  ;;  %v830_v0 = vmul.f32 %v2024_v31, %v826_v20  ;;  %v4240_v10 = vld [vmem:[#allocation28_spill] sm:$0xff] }
 0x126   : > { %v2042_v23 = vpop.eup %2041  ;;  %v811_v27 = vadd.f32 %v807_v53, %v783_v59  ;;  %v831_v7 = vmul.f32 %v2026_v8, %v827_v36  ;;  %v852_v51 = vmul.f32 %v2036_v54, %v4227_v14  ;;  %v1362_v45 = vsub.f32 0.008333334, %v3423_v38  ;;  %v4239_v14 = vld [vmem:[#allocation24_spill] sm:$0xff]  ;;  %v4241_v59 = vld [vmem:[#allocation29_spill] sm:$0xff] }
 0x127   : > { %v2044_v4 = vpop.eup %2043  ;;  %v853_v52 = vmul.f32 %v2038_v16, %v4228_v44  ;;  %v854_v40 = vsub.f32 2.0, %v850_v19  ;;  %v878_v12 = vmul.f32 %v2040_v26, %v4229_v39  ;;  %v1363_v41 = vsub.f32 0.008333334, %v3428_v1  ;;  %v4243_v1 = vld [vmem:[#allocation84_spill] sm:$0xff] }
 0x128   : > { %v812_v3 = vadd.f32 %v808_v55, %v784_v11  ;;  %v813_v22 = vadd.f32 %v809_v35, %v785_v56  ;;  %v855_v25 = vsub.f32 2.0, %v851_v28  ;;  %v879_v17 = vmul.f32 %v2042_v23, %v4230_v60  ;;  %v4245_v35 = vld [vmem:[#allocation88_spill] sm:$0xff] }
 0x129   : > { %v2046_v31 = vpop.eup %2045  ;;  %v832_v13 = vmul.f32 %v2028_v47, %v828_v50  ;;  %v833_v8 = vmul.f32 %v2030_v29, %v829_v43  ;;  %v834_v58 = vadd.f32 %v830_v0, %v810_v57  ;;  %2047 = vrcp.f32 %v4239_v14  ;;  %v4242_v47 = vld [vmem:[#allocation31_spill] sm:$0xff]  ;;  %v4246_v50 = vld [vmem:[#allocation90_spill] sm:$0xff] }
 0x12a   : > { %v835_v38 = vadd.f32 %v831_v7, %v811_v27  ;;  %v856_v24 = vsub.f32 2.0, %v852_v51  ;;  %v880_v44 = vmul.f32 %v2044_v4, %v4231_v46  ;;  %2049 = vrcp.f32 %v4240_v10 }
 0x12b   : > { %v857_v39 = vsub.f32 2.0, %v853_v52  ;;  %v858_v48 = vmul.f32 %v2032_v21, %v854_v40  ;;  %v882_v20 = vsub.f32 2.0, %v878_v12  ;;  %2051 = vrcp.f32 %v4241_v59  ;;  %v4244_v21 = vld [vmem:[#allocation86_spill] sm:$0xff] }
 0x12c   : > { %v859_v53 = vmul.f32 %v2034_v42, %v855_v25  ;;  %v881_v60 = vmul.f32 %v2046_v31, %v4234_v2  ;;  %v883_v36 = vsub.f32 2.0, %v879_v17  ;;  %2053 = vrcp.f32 %v4242_v47 }
 0x12d   : > { %v836_v29 = vadd.f32 %v832_v13, %v812_v3  ;;  %2055 = vrcp.f32 %v4243_v1  ;;  %v1364_v11 = vsub.f32 0.008333334, %v3432_v37  ;;  %v1365_v46 = vsub.f32 0.008333334, %v3435_v9  ;;  %v4255_v3 = vld [vmem:[#allocation112_spill] sm:$0xff]  ;;  %v4259_v13 = vld [vmem:[#allocation58_spill] sm:$0xff] }
 0x12e   : > { %v837_v19 = vadd.f32 %v833_v8, %v813_v22  ;;  %v860_v56 = vmul.f32 %v2036_v54, %v856_v24  ;;  %v884_v52 = vsub.f32 2.0, %v880_v44  ;;  %2057 = vrcp.f32 %v4244_v21  ;;  %v4256_v22 = vld [vmem:[#allocation57_spill] sm:$0xff]  ;;  %v4262_v24 = vld [vmem:[#allocation134_spill] sm:$0xff] }
 0x12f   : > { %v861_v40 = vmul.f32 %v2038_v16, %v857_v39  ;;  %v862_v55 = vadd.f32 %v858_v48, %v834_v58  ;;  %v886_v42 = vmul.f32 %v2040_v26, %v882_v20  ;;  %2059 = vrcp.f32 %v4245_v35  ;;  %v4260_v8 = vld [vmem:[#allocation133_spill] sm:$0xff]  ;;  %v4263_v39 = vld [vmem:[#allocation62_spill] sm:$0xff] }
 0x130   : > { %v863_v2 = vadd.f32 %v859_v53, %v835_v38  ;;  %v885_v28 = vsub.f32 2.0, %v881_v60  ;;  %v887_v57 = vmul.f32 %v2042_v23, %v883_v36  ;;  %2061 = vrcp.f32 %v4246_v50  ;;  %v4250_v23 = vld [vmem:[#allocation91_spill] sm:$0xff]  ;;  %v4266_v36 = vld [vmem:[#allocation22_spill] sm:$0xff] }
 0x131   : > { %v4247_v37 = vsub.f32 %v4186_v30, %v3245_v32  ;;  %v4248_v54 = vsub.f32 %v4193_v63, %v4192_v34  ;;  %v4249_v26 = vsub.f32 %v4196_v5, %v4195_v6  ;;  %2063 = vrcp.f32 %v4250_v23  ;;  %v4251_v34 = vld [vmem:[#allocation93_spill] sm:$0xff]  ;;  %v4252_v6 = vld [vmem:[#allocation142_spill] sm:$0xff]  ;;  %v4261_v38 = vld [vmem:[#allocation59_spill] sm:$0xff] }
 0x132   : > { %v864_v0 = vadd.f32 %v860_v56, %v836_v29  ;;  %v888_v27 = vmul.f32 %v2044_v4, %v884_v52  ;;  %v1366_v32 = vmul.f32 %v1362_v45, %v4235_v15  ;;  %v1367_v30 = vmul.f32 %v1363_v41, %v4236_v49  ;;  %v4253_v45 = vld [vmem:[#allocation94_spill] sm:$0xff]  ;;  %v4254_v41 = vld [vmem:[#allocation67_spill] sm:$0xff]  ;;  %v4267_v29 = vld [vmem:[#allocation140_spill] sm:$0xff] }
 0x133   : > { %v3460_v9 = vsub.f32 %v4247_v37, %v3358_v33  ;;  %v3466_v16 = vsub.f32 %v4248_v54, %v3363_v61  ;;  %v3472_v43 = vsub.f32 %v4249_v26, %v3371_v18  ;;  %v3477_v33 = vpop.eup %2047  ;;  %v3479_v7 = vadd.f32 %v886_v42, %v862_v55  ;;  %v4265_v60 = vld [vmem:[#allocation95_spill] sm:$0xff]  ;;  %v4268_v52 = vld [vmem:[#allocation96_spill] sm:$0xff] }
 0x134   : > { %2065 = vrcp.f32 %v4251_v34  ;;  %v3483_v63 = vmul.f32 %v1364_v11, %v4237_v62  ;;  %v3486_v5 = vmul.f32 %v1365_v46, %v4252_v6  ;;  %v3488_v61 = vpop.eup %2049  ;;  %v865_v18 = vadd.f32 %v861_v40, %v837_v19  ;;  %v4275_v11 = vld [vmem:[#allocation114_spill] sm:$0xff] }
 0x135   : > { %v889_v4 = vmul.f32 %v2046_v31, %v885_v28  ;;  %v3490_v51 = vadd.f32 %v887_v57, %v863_v2  ;;  %2067 = vrcp.f32 %v4253_v45  ;;  %v3493_v12 = vpop.eup %2051  ;;  %v4257_v25 = vsub.f32 %v4255_v3, %v4256_v22  ;;  %v4264_v31 = vld [vmem:[#allocation137_spill] sm:$0xff] }
 0x136   : > { %v1354_v58 = vsub.f32 %v4260_v8, %v4259_v13  ;;  %v1355_v44 = vsub.f32 %v4262_v24, %v4261_v38  ;;  %v3507_v20 = vpop.eup %2053  ;;  %v3509_v53 = vadd.f32 %v888_v27, %v864_v0  ;;  %2069 = vrcp.f32 %v4265_v60  ;;  %v4270_v57 = vld [vmem:[#allocation97_spill] sm:$0xff]  ;;  %v4273_v13 = vld [vmem:[#allocation102_spill] sm:$0xff] }
 0x137   : > { %v3499_v17 = vsub.f32 %v4257_v25, %v4254_v41  ;;  %v1370_v46 = vsub.f32 0.083333336, %v1366_v32  ;;  %v2056_v19 = vpop.eup %2055  ;;  %2071 = vrcp.f32 %v4268_v52  ;;  %v1371_v40 = vsub.f32 0.083333336, %v1367_v30  ;;  %v4271_v32 = vld [vmem:[#allocation98_spill] sm:$0xff] }
 0x138   : > { %v1372_v55 = vsub.f32 0.083333336, %v3483_v63  ;;  %v2058_v42 = vpop.eup %2057  ;;  %v3518_v2 = vadd.f32 %v889_v4, %v865_v18  ;;  %2073 = vrcp.f32 %v4270_v57  ;;  %v1373_v37 = vsub.f32 0.083333336, %v3486_v5  ;;  %v4272_v4 = vld [vmem:[#allocation100_spill] sm:$0xff]  ;;  %v4274_v38 = vld [vmem:[#allocation110_spill] sm:$0xff] }
 0x139   : > { %4258 = vst [vmem:[#allocation69_spill] sm:$0xff] %v3499_v17  ;;  %v2060_v54 = vpop.eup %2059  ;;  %v1042_v26 = vmul.f32 %v3477_v33, %v4239_v14  ;;  %v1043_v0 = vmul.f32 %v3488_v61, %v4240_v10  ;;  %v1044_v27 = vmul.f32 %v3493_v12, %v4241_v59  ;;  %2075 = vrcp.f32 %v4271_v32  ;;  %v4276_v59 = vld [vmem:[#allocation115_spill] sm:$0xff]  ;;  %v4277_v17 = vld [vmem:[#allocation116_spill] sm:$0xff] }
 0x13a   : > { %4269 = vst [vmem:[#allocation60_spill] sm:$0xff] %v3518_v2  ;;  %v2062_v30 = vpop.eup %2061  ;;  %v1062_v18 = vmul.f32 %v2056_v19, %v4243_v1  ;;  %v1063_v5 = vmul.f32 %v2058_v42, %v4244_v21  ;;  %2077 = vrcp.f32 %v4272_v4  ;;  %v1045_v3 = vmul.f32 %v3507_v20, %v4242_v47 }
 0x13b   : > { %v2064_v41 = vpop.eup %2063  ;;  %v1064_v22 = vmul.f32 %v2060_v54, %v4245_v35  ;;  %v1065_v25 = vmul.f32 %v2062_v30, %v4246_v50  ;;  %2079 = vrcp.f32 %v4273_v13  ;;  %v1374_v1 = vmul.f32 %v1370_v46, %v4235_v15 }
 0x13c   : > { %2081 = vrcp.f32 %v4274_v38  ;;  %v1375_v21 = vmul.f32 %v1371_v40, %v4236_v49  ;;  %v1046_v63 = vsub.f32 2.0, %v1042_v26  ;;  %v1047_v28 = vsub.f32 2.0, %v1043_v0 }
 0x13d   : > { %v1048_v56 = vsub.f32 2.0, %v1044_v27  ;;  %2083 = vrcp.f32 %v4275_v11  ;;  %v1066_v48 = vsub.f32 2.0, %v1062_v18  ;;  %v1067_v50 = vsub.f32 2.0, %v1063_v5 }
 0x13e   : > { %v2066_v24 = vpop.eup %2065  ;;  %v1090_v47 = vmul.f32 %v2064_v41, %v4250_v23  ;;  %2085 = vrcp.f32 %v4276_v59  ;;  %v1049_v8 = vsub.f32 2.0, %v1045_v3  ;;  %v1068_v10 = vsub.f32 2.0, %v1064_v22 }
 0x13f   : > { %v2068_v35 = vpop.eup %2067  ;;  %v1069_v2 = vsub.f32 2.0, %v1065_v25  ;;  %2087 = vrcp.f32 %v4277_v17  ;;  %v1091_v49 = vmul.f32 %v2066_v24, %v4251_v34  ;;  %v1376_v46 = vmul.f32 %v1372_v55, %v4237_v62 }
 0x140   : > { %v2070_v15 = vpop.eup %2069  ;;  %v1377_v40 = vmul.f32 %v1373_v37, %v4252_v6  ;;  %v3553_v26 = vsub.f32 %v1354_v58, %v1374_v1  ;;  %v1050_v27 = vmul.f32 %v3477_v33, %v1046_v63  ;;  %v1051_v23 = vmul.f32 %v3488_v61, %v1047_v28  ;;  %v4285_v28 = vld [vmem:[#allocation25_spill] sm:$0xff] }
 0x141   : > { %v2072_v0 = vpop.eup %2071  ;;  %v1092_v18 = vmul.f32 %v2068_v35, %v4253_v45  ;;  %v3558_v5 = vsub.f32 %v1355_v44, %v1375_v21  ;;  %v1052_v22 = vmul.f32 %v3493_v12, %v1048_v56  ;;  %v1070_v25 = vmul.f32 %v2056_v19, %v1066_v48  ;;  %v4279_v12 = vld [vmem:[#allocation14_spill] sm:$0xff]  ;;  %v4280_v48 = vld [vmem:[#allocation64_spill] sm:$0xff] }
 0x142   : > { %v2074_v3 = vpop.eup %2073  ;;  %v1071_v34 = vmul.f32 %v2058_v42, %v1067_v50  ;;  %v1094_v14 = vsub.f32 2.0, %v1090_v47  ;;  %v1053_v6 = vmul.f32 %v3507_v20, %v1049_v8  ;;  %v1072_v58 = vmul.f32 %v2060_v54, %v1068_v10  ;;  %v4282_v47 = vld [vmem:[#allocation128_spill] sm:$0xff] }
 0x143   : > { %v2076_v62 = vpop.eup %2075  ;;  %v1073_v55 = vmul.f32 %v2062_v30, %v1069_v2  ;;  %v1093_v37 = vmul.f32 %v2070_v15, %v4265_v60  ;;  %v1095_v63 = vsub.f32 2.0, %v1091_v49  ;;  %v1118_v61 = vmul.f32 %v2072_v0, %v4268_v52  ;;  %v4284_v52 = vld [vmem:[#allocation92_spill] sm:$0xff] }
 0x144   : > { %v2078_v33 = vpop.eup %2077  ;;  %v4278_v45 = vsub.f32 %v4264_v31, %v4263_v39  ;;  %v4281_v19 = vsub.f32 %v4279_v12, %v4280_v48  ;;  %v1096_v10 = vsub.f32 2.0, %v1092_v18  ;;  %v1119_v42 = vmul.f32 %v2074_v3, %v4270_v57  ;;  %v4287_v31 = vld [vmem:[#allocation129_spill] sm:$0xff] }
 0x145   : > { %v2080_v20 = vpop.eup %2079  ;;  %v4283_v60 = vsub.f32 %v4267_v29, %v4266_v36  ;;  %v4286_v39 = vsub.f32 %v4284_v52, %v4285_v28  ;;  %v1074_v8 = vadd.f32 %v1070_v25, %v1050_v27  ;;  %v1075_v1 = vadd.f32 %v1071_v34, %v1051_v23  ;;  %v4288_v48 = vld [vmem:[#allocation117_spill] sm:$0xff]  ;;  %v4290_v25 = vld [vmem:[#allocation119_spill] sm:$0xff]  ;;  %v4295_v28 = vld [vmem:[#allocation124_spill] sm:$0xff] }
 0x146   : > { %v3567_v44 = vsub.f32 %v4278_v45, %v1376_v46  ;;  %v3573_v56 = vmul.f32 %v4282_v47, %v4281_v19  ;;  %v2082_v30 = vpop.eup %2081  ;;  %v1098_v21 = vmul.f32 %v2064_v41, %v1094_v14  ;;  %v1120_v50 = vmul.f32 %v2076_v62, %v4271_v32  ;;  %v4289_v41 = vld [vmem:[#allocation118_spill] sm:$0xff] }
 0x147   : > { %v3579_v2 = vsub.f32 %v4283_v60, %v1377_v40  ;;  %v3585_v54 = vmul.f32 %v4287_v31, %v4286_v39  ;;  %v2084_v49 = vpop.eup %2083  ;;  %v1076_v46 = vadd.f32 %v1072_v58, %v1052_v22  ;;  %v1077_v57 = vadd.f32 %v1073_v55, %v1053_v6  ;;  %v4292_v55 = vld [vmem:[#allocation121_spill] sm:$0xff] }
 0x148   : > { %v1097_v18 = vsub.f32 2.0, %v1093_v37  ;;  %v1121_v36 = vmul.f32 %v2078_v33, %v4272_v4  ;;  %v2086_v29 = vpop.eup %2085  ;;  %v1099_v40 = vmul.f32 %v2066_v24, %v1095_v63  ;;  %v1122_v45 = vsub.f32 2.0, %v1118_v61  ;;  %v4293_v61 = vld [vmem:[#allocation122_spill] sm:$0xff]  ;;  %v4296_v31 = vld [vmem:[#allocation125_spill] sm:$0xff] }
 0x149   : > { %v1146_v12 = vmul.f32 %v2080_v20, %v4273_v13  ;;  %2089 = vrcp.f32 %v4288_v48  ;;  %v2088_v19 = vpop.eup %2087  ;;  %v1100_v47 = vmul.f32 %v2068_v35, %v1096_v10  ;;  %v1123_v27 = vsub.f32 2.0, %v1119_v42  ;;  %v4291_v13 = vld [vmem:[#allocation120_spill] sm:$0xff] }
 0x14a   : > { %v1147_v14 = vmul.f32 %v2082_v30, %v4274_v38  ;;  %2091 = vrcp.f32 %v4289_v41  ;;  %v1102_v32 = vadd.f32 %v1098_v21, %v1074_v8  ;;  %v1124_v23 = vsub.f32 2.0, %v1120_v50  ;;  %v4298_v21 = vld [vmem:[#allocation11_spill] sm:$0xff]  ;;  %v4299_v50 = vld [vmem:[#allocation66_spill] sm:$0xff] }
 0x14b   : > { %v1148_v22 = vmul.f32 %v2084_v49, %v4275_v11  ;;  %2093 = vrcp.f32 %v4290_v25  ;;  %v1101_v4 = vmul.f32 %v2070_v15, %v1097_v18  ;;  %v1125_v24 = vsub.f32 2.0, %v1121_v36  ;;  %v4294_v15 = vld [vmem:[#allocation123_spill] sm:$0xff] }
 0x14c   : > { %v1149_v34 = vmul.f32 %v2086_v29, %v4276_v59  ;;  %2095 = vrcp.f32 %v4291_v13  ;;  %v1126_v6 = vmul.f32 %v2072_v0, %v1122_v45  ;;  %v1150_v58 = vsub.f32 2.0, %v1146_v12  ;;  %v4303_v45 = vld [vmem:[#allocation15_spill] sm:$0xff]  ;;  %v4304_v12 = vld [vmem:[#allocation16_spill] sm:$0xff] }
 0x14d   : > { %v1170_v35 = vmul.f32 %v2088_v19, %v4277_v17  ;;  %2097 = vrcp.f32 %v4292_v55  ;;  %v1103_v38 = vadd.f32 %v1099_v40, %v1075_v1  ;;  %v1127_v37 = vmul.f32 %v2074_v3, %v1123_v27  ;;  %v4297_v1 = vld [vmem:[#allocation126_spill] sm:$0xff]  ;;  %v4302_v40 = vld [vmem:[#allocation127_spill] sm:$0xff] }
 0x14e   : > { %v1151_v63 = vsub.f32 2.0, %v1147_v14  ;;  %2099 = vrcp.f32 %v4293_v61  ;;  %v1104_v11 = vadd.f32 %v1100_v47, %v1076_v46  ;;  %v1128_v10 = vmul.f32 %v2076_v62, %v1124_v23  ;;  %v4301_v46 = vld [vmem:[#allocation130_spill] sm:$0xff]  ;;  %v4306_v47 = vld [vmem:[#allocation131_spill] sm:$0xff] }
 0x14f   : > { %v1152_v42 = vsub.f32 2.0, %v1148_v22  ;;  %2101 = vrcp.f32 %v4294_v15  ;;  %v1105_v60 = vadd.f32 %v1101_v4, %v1077_v57  ;;  %v1129_v59 = vmul.f32 %v2078_v33, %v1125_v24  ;;  %v4307_v22 = vld [vmem:[#allocation7_spill] sm:$0xff] }
 0x150   : > { %v1153_v52 = vsub.f32 2.0, %v1149_v34  ;;  %2103 = vrcp.f32 %v4295_v28  ;;  %v1130_v0 = vadd.f32 %v1126_v6, %v1102_v32  ;;  %v1154_v39 = vmul.f32 %v2080_v20, %v1150_v58  ;;  %v4308_v58 = vld [vmem:[#allocation85_spill] sm:$0xff] }
 0x151   : > { %v1174_v17 = vsub.f32 2.0, %v1170_v35  ;;  %2105 = vrcp.f32 %v4296_v31  ;;  %v1131_v8 = vadd.f32 %v1127_v37, %v1103_v38  ;;  %v1155_v3 = vmul.f32 %v2082_v30, %v1151_v63 }
 0x152   : > { %2107 = vrcp.f32 %v4297_v1  ;;  %v4300_v62 = vsub.f32 %v4298_v21, %v4299_v50  ;;  %v1132_v57 = vadd.f32 %v1128_v10, %v1104_v11  ;;  %v1156_v33 = vmul.f32 %v2084_v49, %v1152_v42  ;;  %v4310_v11 = vld [vmem:[#allocation143_spill] sm:$0xff] }
 0x153   : > { %v2090_v36 = vpop.eup %2089  ;;  %2109 = vrcp.f32 %v4302_v40  ;;  %v4305_v20 = vsub.f32 %v4303_v45, %v4304_v12  ;;  %v1133_v32 = vadd.f32 %v1129_v59, %v1105_v60  ;;  %v1157_v30 = vmul.f32 %v2086_v29, %v1153_v52 }
 0x154   : > { %v1472_v18 = vmul.f32 %v4301_v46, %v4300_v62  ;;  %v2092_v14 = vpop.eup %2091  ;;  %v1171_v23 = vmul.f32 %v2090_v36, %v4288_v48  ;;  %v3616_v4 = vadd.f32 %v3573_v56, %v4307_v22  ;;  %v1158_v34 = vadd.f32 %v1154_v39, %v1130_v0 }
 0x155   : > { %v1473_v27 = vmul.f32 %v4306_v47, %v4305_v20  ;;  %v2094_v24 = vpop.eup %2093  ;;  %v1172_v49 = vmul.f32 %v2092_v14, %v4289_v41  ;;  %v1178_v6 = vmul.f32 %v2088_v19, %v1174_v17  ;;  %v3621_v35 = vadd.f32 %v3585_v54, %v4308_v58  ;;  %v4311_v19 = vld [vmem:[#allocation8_spill] sm:$0xff] }
 0x156   : > { %v2096_v38 = vpop.eup %2095  ;;  %v1159_v37 = vadd.f32 %v1155_v3, %v1131_v8  ;;  %v1173_v63 = vmul.f32 %v2094_v24, %v4290_v25  ;;  %v1175_v29 = vsub.f32 2.0, %v1171_v23  ;;  %v4309_v48 = vsub.f32 %v3460_v9, %v3479_v7 }
 0x157   : > { %v2098_v10 = vpop.eup %2097  ;;  %v1160_v42 = vadd.f32 %v1156_v33, %v1132_v57  ;;  %v1176_v60 = vsub.f32 2.0, %v1172_v49  ;;  %v1198_v41 = vmul.f32 %v2096_v38, %v4291_v13  ;;  %v1476_v59 = vadd.f32 %v1472_v18, %v4311_v19  ;;  %v4317_v19 = vld [vmem:[#allocation24_spill] sm:$0xff] }
 0x158   : > { %v1478_v56 = vmul.f32 %v4310_v11, %v4309_v48  ;;  %v2100_v52 = vpop.eup %2099  ;;  %v1161_v54 = vadd.f32 %v1157_v30, %v1133_v32  ;;  %v1177_v0 = vsub.f32 2.0, %v1173_v63  ;;  %v1179_v39 = vmul.f32 %v2090_v36, %v1175_v29  ;;  %v4314_v11 = vld [vmem:[#allocation144_spill] sm:$0xff] }
 0x159   : > { %v1199_v17 = vmul.f32 %v2098_v10, %v4292_v55  ;;  %v2102_v25 = vpop.eup %2101  ;;  %v1180_v8 = vmul.f32 %v2092_v14, %v1176_v60  ;;  %v1182_v3 = vadd.f32 %v1178_v6, %v1158_v34  ;;  %v1200_v9 = vmul.f32 %v2100_v52, %v4293_v61 }
 0x15a   : > { %v1202_v7 = vsub.f32 2.0, %v1198_v41  ;;  %v2104_v21 = vpop.eup %2103  ;;  %v1181_v50 = vmul.f32 %v2094_v24, %v1177_v0  ;;  %v1183_v62 = vadd.f32 %v1179_v39, %v1159_v37  ;;  %v1201_v46 = vmul.f32 %v2102_v25, %v4294_v15  ;;  %v4319_v39 = vld [vmem:[#allocation60_spill] sm:$0xff] }
 0x15b   : > { %v1203_v13 = vsub.f32 2.0, %v1199_v17  ;;  %v2106_v57 = vpop.eup %2105  ;;  %v1184_v18 = vadd.f32 %v1180_v8, %v1160_v42  ;;  %v1204_v33 = vsub.f32 2.0, %v1200_v9  ;;  %v1226_v36 = vmul.f32 %v2104_v21, %v4295_v28 }
 0x15c   : > { %v1206_v45 = vmul.f32 %v2096_v38, %v1202_v7  ;;  %v2108_v12 = vpop.eup %2107  ;;  %v1185_v55 = vadd.f32 %v1181_v50, %v1161_v54  ;;  %v1205_v20 = vsub.f32 2.0, %v1201_v46  ;;  %v1227_v14 = vmul.f32 %v2106_v57, %v4296_v31  ;;  %v4312_v38 = vld [vmem:[#allocation87_spill] sm:$0xff] }
 0x15d   : > { %v1207_v47 = vmul.f32 %v2098_v10, %v1203_v13  ;;  %v2110_v61 = vpop.eup %2109  ;;  %v1208_v32 = vmul.f32 %v2100_v52, %v1204_v33  ;;  %v1228_v23 = vmul.f32 %v2108_v12, %v4297_v1  ;;  %v1230_v22 = vsub.f32 2.0, %v1226_v36  ;;  %v4324_v46 = vld [vmem:[#allocation31_spill] sm:$0xff] }
 0x15e   : > { %v1210_v30 = vadd.f32 %v1206_v45, %v1182_v3  ;;  %v1209_v15 = vmul.f32 %v2102_v25, %v1205_v20  ;;  %v1229_v34 = vmul.f32 %v2110_v61, %v4302_v40  ;;  %v1231_v49 = vsub.f32 2.0, %v1227_v14  ;;  %v4316_v40 = vld [vmem:[#allocation145_spill] sm:$0xff]  ;;  %v4321_v25 = vld [vmem:[#allocation146_spill] sm:$0xff]  ;;  %v4322_v3 = vld [vmem:[#allocation28_spill] sm:$0xff] }
 0x15f   : > { %v1211_v24 = vadd.f32 %v1207_v47, %v1183_v62  ;;  %v1212_v6 = vadd.f32 %v1208_v32, %v1184_v18  ;;  %v1232_v58 = vsub.f32 2.0, %v1228_v23  ;;  %v1234_v28 = vmul.f32 %v2104_v21, %v1230_v22  ;;  %v4323_v21 = vld [vmem:[#allocation29_spill] sm:$0xff] }
 0x160   : > { %v1477_v37 = vadd.f32 %v1473_v27, %v4312_v38  ;;  %v1213_v63 = vadd.f32 %v1209_v15, %v1185_v55  ;;  %v1233_v29 = vsub.f32 2.0, %v1229_v34  ;;  %v1235_v48 = vmul.f32 %v2106_v57, %v1231_v49  ;;  %v4318_v27 = vld [vmem:[#allocation69_spill] sm:$0xff] }
 0x161   : > { %v4313_v31 = vsub.f32 %v3466_v16, %v3490_v51  ;;  %v1236_v1 = vmul.f32 %v2108_v12, %v1232_v58  ;;  %v1238_v42 = vadd.f32 %v1234_v28, %v1210_v30  ;;  %v4315_v60 = vsub.f32 %v3472_v43, %v3509_v53 }
 0x162   : > { %v1486_v52 = vsub.f32 2.0, %v4317_v19  ;;  %v1237_v54 = vmul.f32 %v2110_v61, %v1233_v29  ;;  %v1239_v0 = vadd.f32 %v1235_v48, %v1211_v24  ;;  %v4320_v17 = vsub.f32 %v4318_v27, %v4319_v39 }
 0x163   : > { %v1479_v10 = vmul.f32 %v4314_v11, %v4313_v31  ;;  %v1480_v41 = vmul.f32 %v4316_v40, %v4315_v60  ;;  %v1487_v16 = vsub.f32 2.0, %v4322_v3  ;;  %v1240_v51 = vadd.f32 %v1236_v1, %v1212_v6 }
 0x164   : > { %v1481_v8 = vmul.f32 %v4321_v25, %v4320_v17  ;;  %v1382_v9 = vsub.f32 %v3553_v26, %v1238_v42  ;;  %v1482_v7 = vadd.f32 %v1478_v56, %v3616_v4  ;;  %v1488_v43 = vsub.f32 2.0, %v4323_v21 }
 0x165   : > { %v1241_v53 = vadd.f32 %v1237_v54, %v1213_v63  ;;  %v1383_v50 = vsub.f32 %v3558_v5, %v1239_v0  ;;  %v1483_v62 = vadd.f32 %v1479_v10, %v3621_v35  ;;  %v1489_v13 = vsub.f32 2.0, %v4324_v46 }
 0x166   : > { %v1384_v57 = vsub.f32 %v3567_v44, %v1240_v51  ;;  %v1484_v18 = vadd.f32 %v1480_v41, %v1476_v59  ;;  %v1490_v33 = vmul.f32 %v1486_v52, %v1382_v9  ;;  %v1485_v36 = vadd.f32 %v1481_v8, %v1477_v37 }
 0x167   : > { %v1385_v45 = vsub.f32 %v3579_v2, %v1241_v53  ;;  %v1491_v12 = vmul.f32 %v1487_v16, %v1383_v50 }
 0x168   : > { %v1492_v26 = vmul.f32 %v1488_v43, %v1384_v57  ;;  %v1494_v55 = vadd.f32 %v1490_v33, %v1482_v7 }
 0x169   : > { %v1493_v4 = vmul.f32 %v1489_v13, %v1385_v45  ;;  %v1495_v56 = vadd.f32 %v1491_v12, %v1483_v62  ;;  %v1533_v61 = vpop.xlane.xlu0 %1532 }
 0x16a   : > { %v1496_v20 = vadd.f32 %v1492_v26, %v1484_v18  ;;  %v1534_v44 = vrot.slane %v1533_v61, 4 }
 0x16b   : > { %v1497_v5 = vadd.f32 %v1493_v4, %v1485_v36  ;;  %v1548_v47 = vadd.f32 %v1495_v56, %v1494_v55 }
 0x16c   : > { %v1535_v59 = vadd.f32 %v1534_v44, %v1533_v61 }
 0x16d   : > { %v1549_v35 = vadd.f32 %v1548_v47, %v1496_v20 }
 0x16e   : > { %v1536_v32 = vrot.slane %v1535_v59, 2 }
 0x16f   : > { %v1550_v14 = vadd.f32 %v1549_v35, %v1497_v5 }
 0x170   : > { %v1537_v30 = vadd.f32 %v1536_v32, %v1535_v59 }
 0x171   : > { %1551 = vadd.xlane.f32.xlu0 %v1550_v14 }
 0x172   : > { %v1538_v2 = vrot.slane %v1537_v30, 1 }
 0x174   : > { %v1539_v23 = vadd.f32 %v1538_v2, %v1537_v30 }
 0x176   : > { %1730 = vpush %v1539_v23 }
 0x1a7   : > { %s1731_s29 = spop %1730 }
 0x1a8   : > { %v1541_v22 = vstv %s1731_s29 }
 0x1a9   : > { %1543 = vst [vmem:[%s297_s28] sm:$0xff] %v1541_v22 }
 0x1fe   : > { %v1552_v15 = vpop.xlane.xlu0 %1551 }
 0x1ff   : > { %v1553_v24 = vrot.slane %v1552_v15, 4 }
 0x201   : > { %v1554_v34 = vadd.f32 %v1553_v24, %v1552_v15 }
 0x203   : > { %v1555_v49 = vrot.slane %v1554_v34, 2 }
 0x205   : > { %v1556_v6 = vadd.f32 %v1555_v49, %v1554_v34 }
 0x207   : > { %v1557_v58 = vrot.slane %v1556_v6, 1 }
 0x209   : > { %v1558_v28 = vadd.f32 %v1557_v58, %v1556_v6 }
 0x20b   : > { %1732 = vpush %v1558_v28 }
 0x23c   : > { %s1733_s18 = spop %1732 }
 0x23d   : > { %v1560_v38 = vstv %s1733_s18 }
 0x23e   : > { %1562 = vst [vmem:[%s301_s6] sm:$0xff] %v1560_v38 }
 0x23f PF: > { %s18_s20 = sadd.s32 1, %s2191_s20   ;;  %s4325_s15 = smov %s2175_s16 }
 0x240   : > { %p15_p9 = scmp.ge.s32.totalorder %s18_s20, 4   ;;  %s4326_s16 = smov %s2179_s17 }
 0x241   : > { %s4327_s17 = smov %s2270_s27  ;;  %s4328_s18 = smov %s2187_s19 }
 0x242   : > { %s4329_s19 = smov %s4331_s22  ;;  %17 = sbr.rel (!%p15_p9) target bundleno = 4 (0x4), region = 98 }
 0x249   :  { %1596 = vsyncpa [#allocation5], 1 }
 0x24a   :  { %1598 = vsyncpa [#allocation5 + $0x1], 1 }

</bundles_post_ra>
